<compile_context>
chip_gen: v6e
topology: v6e:2x2x1
jax: 0.10.0
libtpu: 0.0.40
codegen_flags: <defaults>
</compile_context>

<pallas_src>
import functools

import jax
import jax.numpy as jnp
from jax import lax
from jax.experimental import pallas as pl
from jax.experimental.pallas import tpu as pltpu

_LANES = 128      # lane-dense padded width for the class dimension
_GRU_CHUNK = 8    # timesteps per GRU loop iteration (aligned sublane chunks)


# ---------------------------------------------------------------------------
# Fused single-stage kernel
# ---------------------------------------------------------------------------
def _stage_kernel(x_ref, m_ref,
                  w_in_ref, b_in_ref,
                  w_dil_ref, b_dil_ref, w_pw_ref, b_pw_ref,
                  w_ih_ref, b_ih_ref, w_hh_ref, b_hh_ref,
                  w_out_ref, b_out_ref, w_app_ref, b_app_ref,
                  w_fc_ref, w_fp_ref, b_fuse_ref,
                  fused_ref, prog_ref,
                  gi_ref, gru_ref,
                  *, dilations, H, F, CP, Bb):
    T = x_ref.shape[1]           # padded sequence length (multiple of 8)
    f32 = jnp.float32
    bf16 = jnp.bfloat16
    t_iota = lax.broadcasted_iota(jnp.int32, (T, 1), 0)

    def shift_rep(a, s, head):
        """y[t] = a[max(t - s, 0)] -- causal shift, replicate left padding."""
        if s <= 0:
            return a
        if s >= T:                                   # guard: shift >= seq length
            return head
        rolled = pltpu.roll(a, shift=s, axis=0)      # XLU sublane rotate
        return jnp.where(t_iota < s, head, rolled)

    # -------- phase 1: per-row input conv, dilated stack, prob head, gi -----
    for b in range(Bb):
        x = x_ref[b]                                 # (T, dim)
        m = m_ref[b]                                 # (T, 1)
        m_f = jnp.broadcast_to(m, (T, F))            # hoisted mask broadcasts
        m_c = jnp.broadcast_to(m, (T, CP))

        act = (jnp.dot(x.astype(bf16), w_in_ref[...],
                       preferred_element_type=f32) + b_in_ref[...])

        # h[t] = W0 x[t-2d] + W1 x[t-d] + W2 x[t]  (replicate left padding)
        for l, d in enumerate(dilations):
            head = jnp.broadcast_to(act[:1, :], act.shape)
            xs1 = shift_rep(act, d, head)
            xs2 = shift_rep(act, 2 * d, head)
            hid = (jnp.dot(xs2.astype(bf16), w_dil_ref[l, 0],
                           preferred_element_type=f32)
                   + jnp.dot(xs1.astype(bf16), w_dil_ref[l, 1],
                             preferred_element_type=f32)
                   + jnp.dot(act.astype(bf16), w_dil_ref[l, 2],
                             preferred_element_type=f32)
                   + b_dil_ref[l])
            hid = jnp.maximum(hid, 0.0)              # ReLU
            res = (jnp.dot(hid.astype(bf16), w_pw_ref[l],
                           preferred_element_type=f32) + b_pw_ref[l])
            act = (act + res) * m_f                  # dropout == identity (eval)

        act_bf = act.astype(bf16)
        prob = (jnp.dot(act_bf, w_out_ref[...], preferred_element_type=f32)
                + b_out_ref[...]) * m_c
        # fused = (prob @ Wc + prog @ Wp + b_fuse) * m ; accumulate prob part now
        fused_ref[b] = (jnp.dot(prob.astype(bf16), w_fc_ref[...],
                                preferred_element_type=f32) + b_fuse_ref[...])
        # hoisted GRU input projection (one (T,F)x(F,3H) matmul per row)
        gi_ref[pl.ds(b * T, T), :] = (
            jnp.dot(act_bf, w_ih_ref[...], preferred_element_type=f32)
            + b_ih_ref[...])

    # -------- phase 2: batched GRU recurrence (PyTorch gate order [r,z,n]) --
    w_hh = w_hh_ref[...]                             # (H, 3H) f32
    b_hh = b_hh_ref[...]                             # (1, 3H) f32
    CH = _GRU_CHUNK
    n_chunks = T // CH

    def chunk_step(c, h):                            # h: (Bb, H) f32 carry
        # one aligned (CH, 3H) gi load per row for this chunk
        gi_c = [gi_ref[pl.ds(pl.multiple_of(b * T + c * CH, CH), CH), :]
                for b in range(Bb)]
        hs = []
        for j in range(CH):
            gi_t = jnp.concatenate([g[j:j + 1, :] for g in gi_c], axis=0)
            gh = jnp.dot(h, w_hh, preferred_element_type=f32) + b_hh
            rz = jax.nn.sigmoid(gi_t[:, :2 * H] + gh[:, :2 * H])   # fused r|z
            r, z = rz[:, :H], rz[:, H:]
            n = jnp.tanh(gi_t[:, 2 * H:] + r * gh[:, 2 * H:])
            h = (1.0 - z) * n + z * h
            hs.append(h)
        # one aligned (CH, H) store per row for this chunk
        for b in range(Bb):
            gru_ref[pl.ds(pl.multiple_of(b * T + c * CH, CH), CH), :] = (
                jnp.concatenate([hj[b:b + 1, :] for hj in hs], axis=0))
        return h

    lax.fori_loop(0, n_chunks, chunk_step, jnp.zeros((Bb, H), f32))

    # -------- phase 3: progress head + probability/progress fusion ----------
    w_app = w_app_ref[...]
    b_app = b_app_ref[...]
    w_fp = w_fp_ref[...]
    for b in range(Bb):
        m_c = jnp.broadcast_to(m_ref[b], (T, CP))
        gru_b = gru_ref[pl.ds(b * T, T), :]          # (T, H)
        prog = (jnp.dot(gru_b.astype(bf16), w_app, preferred_element_type=f32)
                + b_app) * m_c
        prog_ref[b] = prog
        fused_ref[b] = (fused_ref[b]
                        + jnp.dot(prog.astype(bf16), w_fp,
                                  preferred_element_type=f32)) * m_c


# ---------------------------------------------------------------------------
# Wrapper: weight packing + pallas_call
# ---------------------------------------------------------------------------
def single_stage_forward(x, mask, params, *, batch_block=None):
    """x: (B, dim, T), mask: (B, num_classes, T) -- PyTorch NCT convention.

    batch_block: batch rows per program (must divide B).  Default: B (all rows
    in one program, maximizing GRU-chain amortization -- right for v5e/v6e).
    On v7x pass batch_block=B//2 so both TensorCores get a program.
    """
    B, dim, T = x.shape
    F = params["w_in"].shape[0]
    H = params["w_hh"].shape[1]
    C = params["w_out"].shape[0]
    L = len(params["layers"])
    CP = _LANES

    Bb = B if batch_block is None else batch_block
    assert B % Bb == 0, "batch_block must divide the batch size"

    # pad T to a multiple of the GRU chunk; padded tail is masked to zero and
    # sliced off (causality => it cannot affect valid outputs).
    Tp = ((T + _GRU_CHUNK - 1) // _GRU_CHUNK) * _GRU_CHUNK

    f32, bf16 = jnp.float32, jnp.bfloat16

    xt = jnp.transpose(x, (0, 2, 1)).astype(f32)                      # (B, T, dim)
    m = jnp.transpose(mask[:, 0:1, :], (0, 2, 1)).astype(f32)         # (B, T, 1)
    if Tp != T:
        xt = jnp.pad(xt, ((0, 0), (0, Tp - T), (0, 0)))
        m = jnp.pad(m, ((0, 0), (0, Tp - T), (0, 0)))

    # ---- weight packing (pre-transpose / stack per-layer / lane-pad) -------
    w_in_t = params["w_in"].T.astype(bf16)                            # (dim, F)
    b_in = params["b_in"].astype(f32)                                 # (1, F)

    # per-tap transposed dilated-conv weights: (L, 3, F, F), tap k multiplies
    # x[t - (2-k)*d]  (k=0 -> x[t-2d], k=1 -> x[t-d], k=2 -> x[t])
    w_dil_t = jnp.stack(
        [jnp.stack([lp["w_dil"][:, :, k].T for k in range(3)], axis=0)
         for lp in params["layers"]], axis=0).astype(bf16)
    b_dil = jnp.stack([lp["b_dil"] for lp in params["layers"]], 0).astype(f32)
    w_pw_t = jnp.stack([lp["w_pw"].T for lp in params["layers"]], 0).astype(bf16)
    b_pw = jnp.stack([lp["b_pw"] for lp in params["layers"]], 0).astype(f32)

    w_ih_t = params["w_ih"].T.astype(bf16)                            # (F, 3H)
    b_ih = params["b_ih"].astype(f32)                                 # (1, 3H)
    w_hh_t = params["w_hh"].T.astype(f32)                             # (H, 3H)
    b_hh = params["b_hh"].astype(f32)                                 # (1, 3H)

    def pad_lanes(a):
        return jnp.pad(a, ((0, 0), (0, CP - a.shape[1])))

    w_out_t = pad_lanes(params["w_out"].T).astype(bf16)               # (F, CP)
    b_out = pad_lanes(params["b_out"]).astype(f32)                    # (1, CP)
    w_app_t = pad_lanes(params["w_app"].T).astype(bf16)               # (F, CP)
    b_app = pad_lanes(params["b_app"]).astype(f32)                    # (1, CP)
    w_fc_t = jnp.zeros((CP, CP), f32).at[:C, :C].set(
        params["w_fuse"][:, :C].T).astype(bf16)
    w_fp_t = jnp.zeros((CP, CP), f32).at[:C, :C].set(
        params["w_fuse"][:, C:].T).astype(bf16)
    b_fuse = pad_lanes(params["b_fuse"]).astype(f32)                  # (1, CP)

    weights = (w_in_t, b_in, w_dil_t, b_dil, w_pw_t, b_pw,
               w_ih_t, b_ih, w_hh_t, b_hh,
               w_out_t, b_out, w_app_t, b_app, w_fc_t, w_fp_t, b_fuse)

    # ---- BlockSpecs: grid over batch blocks, full (Bb, Tp, .) per program --
    def blk_spec(shape):
        nd = len(shape)
        return pl.BlockSpec((Bb,) + tuple(shape[1:]),
                            lambda g: (g,) + (0,) * (nd - 1))

    def const_spec(shape):
        nd = len(shape)
        return pl.BlockSpec(tuple(shape), lambda g: (0,) * nd)

    kernel = functools.partial(
        _stage_kernel,
        dilations=tuple(2 ** i for i in range(L)),
        H=H, F=F, CP=CP, Bb=Bb)

    # raise the scoped-VMEM limit only when the resident working set needs it
    # (v5e default scoped limit is 16 MiB); stay below v7x's 64 MiB physical.
    resident = 4 * Bb * Tp * (dim + 1 + 4 * F + 4 * H + 6 * CP)
    extra = {}
    if resident > 8 * 1024 * 1024:
        extra["vmem_limit_bytes"] = int(min(56 * 1024 * 1024,
                                            max(32 * 1024 * 1024, 2 * resident)))

    out_struct = jax.ShapeDtypeStruct((B, Tp, CP), jnp.float32)
    fused_p, prog_p = pl.pallas_call(
        kernel,
        grid=(B // Bb,),
        in_specs=[blk_spec(xt.shape), blk_spec(m.shape)]
                 + [const_spec(w.shape) for w in weights],
        out_specs=[blk_spec((B, Tp, CP)), blk_spec((B, Tp, CP))],
        out_shape=(out_struct, out_struct),
        scratch_shapes=[pltpu.VMEM((Bb * Tp, 3 * H), jnp.float32),  # GRU input proj
                        pltpu.VMEM((Bb * Tp, H), jnp.float32)],     # GRU hidden states
        compiler_params=pltpu.CompilerParams(
            dimension_semantics=("parallel",), **extra),
    )(xt, m, *weights)

    # slice lane/time padding off and return PyTorch-shaped (B, C, T)
    fused = jnp.transpose(fused_p[:, :T, :C], (0, 2, 1))
    prog = jnp.transpose(prog_p[:, :T, :C], (0, 2, 1))
    return fused, prog


# ---------------------------------------------------------------------------
# Parameters
# ---------------------------------------------------------------------------
def init_params(key, num_layers, num_f_maps, dim, num_classes):
    keys = iter(jax.random.split(key, 8 + 4 * num_layers + 16))

    def w(shape, scale=0.1):
        return (scale * jax.random.normal(next(keys), shape)).astype(jnp.float32)

    return {
        "w_in": w((num_f_maps, dim)), "b_in": w((1, num_f_maps)),
        "layers": [dict(w_dil=w((num_f_maps, num_f_maps, 3)), b_dil=w((1, num_f_maps)),
                        w_pw=w((num_f_maps, num_f_maps)), b_pw=w((1, num_f_maps)))
                   for _ in range(num_layers)],
        "w_out": w((num_classes, num_f_maps)), "b_out": w((1, num_classes)),
        "w_ih": w((3 * num_f_maps, num_f_maps)), "w_hh": w((3 * num_f_maps, num_f_maps)),
        "b_ih": w((1, 3 * num_f_maps)), "b_hh": w((1, 3 * num_f_maps)),
        "w_app": w((num_classes, num_f_maps)), "b_app": w((1, num_classes)),
        "w_fuse": w((num_classes, 2 * num_classes)), "b_fuse": w((1, num_classes)),
    }


# ---------------------------------------------------------------------------
# Pure-JAX reference (for correctness check)
# ---------------------------------------------------------------------------
def _shift_replicate_ref(x, s):
    # y[:, t] = x[:, max(t - s, 0)]  (replicate left padding), x: (B, T, C)
    T = x.shape[1]
    if s >= T:
        return jnp.broadcast_to(x[:, :1, :], x.shape)
    return jnp.concatenate([jnp.repeat(x[:, :1, :], s, axis=1), x[:, :-s, :]], axis=1)


def ref_forward(x, mask, p):
    xt = jnp.transpose(x, (0, 2, 1))
    m = jnp.transpose(mask[:, 0:1, :], (0, 2, 1))
    out = xt @ p["w_in"].T + p["b_in"]
    for i, lp in enumerate(p["layers"]):
        d = 2 ** i
        xs1 = _shift_replicate_ref(out, d)
        xs2 = _shift_replicate_ref(out, 2 * d)
        w0, w1, w2 = lp["w_dil"][:, :, 0], lp["w_dil"][:, :, 1], lp["w_dil"][:, :, 2]
        h = jax.nn.relu(xs2 @ w0.T + xs1 @ w1.T + out @ w2.T + lp["b_dil"])
        out = (out + (h @ lp["w_pw"].T + lp["b_pw"])) * m

    H = p["w_hh"].shape[1]

    def gru_step(h, x_t):
        gi = x_t @ p["w_ih"].T + p["b_ih"][0]
        gh = h @ p["w_hh"].T + p["b_hh"][0]
        r = jax.nn.sigmoid(gi[:, :H] + gh[:, :H])
        z = jax.nn.sigmoid(gi[:, H:2 * H] + gh[:, H:2 * H])
        n = jnp.tanh(gi[:, 2 * H:] + r * gh[:, 2 * H:])
        h_new = (1.0 - z) * n + z * h
        return h_new, h_new

    _, hs = lax.scan(gru_step, jnp.zeros((out.shape[0], H), jnp.float32),
                     jnp.transpose(out, (1, 0, 2)))
    gru_out = jnp.transpose(hs, (1, 0, 2))

    C = p["w_out"].shape[0]
    prob = (out @ p["w_out"].T + p["b_out"]) * m
    prog = (gru_out @ p["w_app"].T + p["b_app"]) * m
    fused = (prob @ p["w_fuse"][:, :C].T + prog @ p["w_fuse"][:, C:].T + p["b_fuse"]) * m
    return jnp.transpose(fused, (0, 2, 1)), jnp.transpose(prog, (0, 2, 1))


if __name__ == "__main__":
    num_layers, num_f_maps, dim, num_classes = 3, 32, 8, 6
    B, T = 2, 64

    key = jax.random.PRNGKey(0)
    kx, kp = jax.random.split(key)
    x = jax.random.normal(kx, (B, dim, T), jnp.float32)
    mask = jnp.ones((B, num_classes, T), jnp.float32)
    mask = mask.at[1, :, 48:].set(0.0)                 # ragged second sequence
    params = init_params(kp, num_layers, num_f_maps, dim, num_classes)

    out, progress_out = single_stage_forward(x, mask, params)
    out = jax.block_until_ready(out)
    progress_out = jax.block_until_ready(progress_out)

    ref_out, ref_prog = ref_forward(x, mask, params)
    assert out.shape == (B, num_classes, T)
    assert progress_out.shape == (B, num_classes, T)
    assert jnp.allclose(out, ref_out, atol=2e-2, rtol=2e-2)
    assert jnp.allclose(progress_out, ref_prog, atol=2e-2, rtol=2e-2)

    print("KERNEL_OK")
</pallas_src>

<mosaic_0001>
module attributes {stable_mosaic.version = 11 : i64} {
  func.func @_stage_kernel(%arg0: i32, %arg1: memref<2x64x8xf32, #tpu.memory_space<vmem>>, %arg2: memref<2x64x1xf32, #tpu.memory_space<vmem>>, %arg3: memref<8x32xbf16, #tpu.memory_space<vmem>>, %arg4: memref<1x32xf32, #tpu.memory_space<vmem>>, %arg5: memref<3x3x32x32xbf16, #tpu.memory_space<vmem>>, %arg6: memref<3x1x32xf32, #tpu.memory_space<vmem>>, %arg7: memref<3x32x32xbf16, #tpu.memory_space<vmem>>, %arg8: memref<3x1x32xf32, #tpu.memory_space<vmem>>, %arg9: memref<32x96xbf16, #tpu.memory_space<vmem>>, %arg10: memref<1x96xf32, #tpu.memory_space<vmem>>, %arg11: memref<32x96xf32, #tpu.memory_space<vmem>>, %arg12: memref<1x96xf32, #tpu.memory_space<vmem>>, %arg13: memref<32x128xbf16, #tpu.memory_space<vmem>>, %arg14: memref<1x128xf32, #tpu.memory_space<vmem>>, %arg15: memref<32x128xbf16, #tpu.memory_space<vmem>>, %arg16: memref<1x128xf32, #tpu.memory_space<vmem>>, %arg17: memref<128x128xbf16, #tpu.memory_space<vmem>>, %arg18: memref<128x128xbf16, #tpu.memory_space<vmem>>, %arg19: memref<1x128xf32, #tpu.memory_space<vmem>>, %arg20: memref<2x64x128xf32, #tpu.memory_space<vmem>>, %arg21: memref<2x64x128xf32, #tpu.memory_space<vmem>>, %arg22: memref<128x96xf32, #tpu.memory_space<vmem>>, %arg23: memref<128x32xf32, #tpu.memory_space<vmem>>) attributes {dimension_semantics = [#tpu.dimension_semantics<parallel>], iteration_bounds = array<i64: 1>, scalar_prefetch = 0 : i64, scratch_operands = 2 : i64, tpu.core_type = #tpu.core_type<tc>, window_params = [{transform_indices = @transform_0, window_bounds = array<i64: 2, 64, 8>}, {transform_indices = @transform_1, window_bounds = array<i64: 2, 64, 1>}, {pipeline_mode = #tpu.pipeline_mode<synchronous>, transform_indices = @transform_2, window_bounds = array<i64: 8, 32>}, {pipeline_mode = #tpu.pipeline_mode<synchronous>, transform_indices = @transform_3, window_bounds = array<i64: 1, 32>}, {pipeline_mode = #tpu.pipeline_mode<synchronous>, transform_indices = @transform_4, window_bounds = array<i64: 3, 3, 32, 32>}, {pipeline_mode = #tpu.pipeline_mode<synchronous>, transform_indices = @transform_5, window_bounds = array<i64: 3, 1, 32>}, {pipeline_mode = #tpu.pipeline_mode<synchronous>, transform_indices = @transform_6, window_bounds = array<i64: 3, 32, 32>}, {pipeline_mode = #tpu.pipeline_mode<synchronous>, transform_indices = @transform_7, window_bounds = array<i64: 3, 1, 32>}, {pipeline_mode = #tpu.pipeline_mode<synchronous>, transform_indices = @transform_8, window_bounds = array<i64: 32, 96>}, {pipeline_mode = #tpu.pipeline_mode<synchronous>, transform_indices = @transform_9, window_bounds = array<i64: 1, 96>}, {pipeline_mode = #tpu.pipeline_mode<synchronous>, transform_indices = @transform_10, window_bounds = array<i64: 32, 96>}, {pipeline_mode = #tpu.pipeline_mode<synchronous>, transform_indices = @transform_11, window_bounds = array<i64: 1, 96>}, {pipeline_mode = #tpu.pipeline_mode<synchronous>, transform_indices = @transform_12, window_bounds = array<i64: 32, 128>}, {pipeline_mode = #tpu.pipeline_mode<synchronous>, transform_indices = @transform_13, window_bounds = array<i64: 1, 128>}, {pipeline_mode = #tpu.pipeline_mode<synchronous>, transform_indices = @transform_14, window_bounds = array<i64: 32, 128>}, {pipeline_mode = #tpu.pipeline_mode<synchronous>, transform_indices = @transform_15, window_bounds = array<i64: 1, 128>}, {pipeline_mode = #tpu.pipeline_mode<synchronous>, transform_indices = @transform_16, window_bounds = array<i64: 128, 128>}, {pipeline_mode = #tpu.pipeline_mode<synchronous>, transform_indices = @transform_17, window_bounds = array<i64: 128, 128>}, {pipeline_mode = #tpu.pipeline_mode<synchronous>, transform_indices = @transform_18, window_bounds = array<i64: 1, 128>}, {transform_indices = @transform_19, window_bounds = array<i64: 2, 64, 128>}, {transform_indices = @transform_20, window_bounds = array<i64: 2, 64, 128>}]} {
    %0 = tpu.iota {dimensions = array<i32: 0>} : vector<64x1xi32>
    %c0 = arith.constant 0 : index
    %c0_0 = arith.constant 0 : index
    %c0_1 = arith.constant 0 : index
    %1 = vector.load %arg1[%c0, %c0_0, %c0_1] : memref<2x64x8xf32, #tpu.memory_space<vmem>>, vector<1x64x8xf32>
    %2 = vector.shape_cast %1 : vector<1x64x8xf32> to vector<64x8xf32>
    %c0_2 = arith.constant 0 : index
    %c0_3 = arith.constant 0 : index
    %c0_4 = arith.constant 0 : index
    %3 = vector.load %arg2[%c0_2, %c0_3, %c0_4] : memref<2x64x1xf32, #tpu.memory_space<vmem>>, vector<1x64x1xf32>
    %4 = vector.shape_cast %3 : vector<1x64x1xf32> to vector<64x1xf32>
    %5 = vector.shape_cast %4 : vector<64x1xf32> to vector<64x1xf32>
    %6 = vector.broadcast %5 : vector<64x1xf32> to vector<64x32xf32>
    %7 = vector.shape_cast %4 : vector<64x1xf32> to vector<64x1xf32>
    %8 = vector.broadcast %7 : vector<64x1xf32> to vector<64x128xf32>
    %9 = arith.truncf %2 : vector<64x8xf32> to vector<64x8xbf16>
    %c0_5 = arith.constant 0 : index
    %c0_6 = arith.constant 0 : index
    %10 = vector.load %arg3[%c0_5, %c0_6] : memref<8x32xbf16, #tpu.memory_space<vmem>>, vector<8x32xbf16>
    %cst = arith.constant dense<0.000000e+00> : vector<64x32xf32>
    %11 = tpu.matmul %9, %10, %cst {dimension_numbers = #tpu.dot_dimension_numbers<[1], [0], [0], [1], [0, 0, 1, 1], [], []>} : vector<64x8xbf16>, vector<8x32xbf16>, vector<64x32xf32> -> vector<64x32xf32>
    %c0_7 = arith.constant 0 : index
    %c0_8 = arith.constant 0 : index
    %12 = vector.load %arg4[%c0_7, %c0_8] : memref<1x32xf32, #tpu.memory_space<vmem>>, vector<1x32xf32>
    %13 = vector.broadcast %12 : vector<1x32xf32> to vector<64x32xf32>
    %14 = arith.addf %11, %13 : vector<64x32xf32>
    %15 = vector.extract_strided_slice %14 {offsets = [0, 0], sizes = [1, 32], strides = [1, 1]} : vector<64x32xf32> to vector<1x32xf32>
    %16 = vector.shape_cast %15 : vector<1x32xf32> to vector<1x32xf32>
    %17 = vector.broadcast %16 : vector<1x32xf32> to vector<64x32xf32>
    %c1_i32 = arith.constant 1 : i32
    %18 = tpu.dynamic_rotate %14 by %c1_i32 dim 0 : vector<64x32xf32>, i32 -> vector<64x32xf32>
    %c1_i32_9 = arith.constant 1 : i32
    %19 = vector.broadcast %c1_i32_9 : i32 to vector<64x1xi32>
    %20 = arith.cmpi slt, %0, %19 : vector<64x1xi32>
    %21 = vector.shape_cast %20 : vector<64x1xi1> to vector<64x1xi1>
    %22 = vector.broadcast %21 : vector<64x1xi1> to vector<64x32xi1>
    %23 = arith.select %22, %17, %18 : vector<64x32xi1>, vector<64x32xf32>
    %c2_i32 = arith.constant 2 : i32
    %24 = tpu.dynamic_rotate %14 by %c2_i32 dim 0 : vector<64x32xf32>, i32 -> vector<64x32xf32>
    %c2_i32_10 = arith.constant 2 : i32
    %25 = vector.broadcast %c2_i32_10 : i32 to vector<64x1xi32>
    %26 = arith.cmpi slt, %0, %25 : vector<64x1xi32>
    %27 = vector.shape_cast %26 : vector<64x1xi1> to vector<64x1xi1>
    %28 = vector.broadcast %27 : vector<64x1xi1> to vector<64x32xi1>
    %29 = arith.select %28, %17, %24 : vector<64x32xi1>, vector<64x32xf32>
    %30 = arith.truncf %29 : vector<64x32xf32> to vector<64x32xbf16>
    %c0_11 = arith.constant 0 : index
    %c0_12 = arith.constant 0 : index
    %c0_13 = arith.constant 0 : index
    %c0_14 = arith.constant 0 : index
    %31 = vector.load %arg5[%c0_11, %c0_12, %c0_13, %c0_14] : memref<3x3x32x32xbf16, #tpu.memory_space<vmem>>, vector<1x1x32x32xbf16>
    %32 = vector.shape_cast %31 : vector<1x1x32x32xbf16> to vector<32x32xbf16>
    %cst_15 = arith.constant dense<0.000000e+00> : vector<64x32xf32>
    %33 = tpu.matmul %30, %32, %cst_15 {dimension_numbers = #tpu.dot_dimension_numbers<[1], [0], [0], [1], [0, 0, 1, 1], [], []>} : vector<64x32xbf16>, vector<32x32xbf16>, vector<64x32xf32> -> vector<64x32xf32>
    %34 = arith.truncf %23 : vector<64x32xf32> to vector<64x32xbf16>
    %c0_16 = arith.constant 0 : index
    %c1 = arith.constant 1 : index
    %c0_17 = arith.constant 0 : index
    %c0_18 = arith.constant 0 : index
    %35 = vector.load %arg5[%c0_16, %c1, %c0_17, %c0_18] : memref<3x3x32x32xbf16, #tpu.memory_space<vmem>>, vector<1x1x32x32xbf16>
    %36 = vector.shape_cast %35 : vector<1x1x32x32xbf16> to vector<32x32xbf16>
    %cst_19 = arith.constant dense<0.000000e+00> : vector<64x32xf32>
    %37 = tpu.matmul %34, %36, %cst_19 {dimension_numbers = #tpu.dot_dimension_numbers<[1], [0], [0], [1], [0, 0, 1, 1], [], []>} : vector<64x32xbf16>, vector<32x32xbf16>, vector<64x32xf32> -> vector<64x32xf32>
    %38 = arith.addf %33, %37 : vector<64x32xf32>
    %39 = arith.truncf %14 : vector<64x32xf32> to vector<64x32xbf16>
    %c0_20 = arith.constant 0 : index
    %c2 = arith.constant 2 : index
    %c0_21 = arith.constant 0 : index
    %c0_22 = arith.constant 0 : index
    %40 = vector.load %arg5[%c0_20, %c2, %c0_21, %c0_22] : memref<3x3x32x32xbf16, #tpu.memory_space<vmem>>, vector<1x1x32x32xbf16>
    %41 = vector.shape_cast %40 : vector<1x1x32x32xbf16> to vector<32x32xbf16>
    %cst_23 = arith.constant dense<0.000000e+00> : vector<64x32xf32>
    %42 = tpu.matmul %39, %41, %cst_23 {dimension_numbers = #tpu.dot_dimension_numbers<[1], [0], [0], [1], [0, 0, 1, 1], [], []>} : vector<64x32xbf16>, vector<32x32xbf16>, vector<64x32xf32> -> vector<64x32xf32>
    %43 = arith.addf %38, %42 : vector<64x32xf32>
    %c0_24 = arith.constant 0 : index
    %c0_25 = arith.constant 0 : index
    %c0_26 = arith.constant 0 : index
    %44 = vector.load %arg6[%c0_24, %c0_25, %c0_26] : memref<3x1x32xf32, #tpu.memory_space<vmem>>, vector<1x1x32xf32>
    %45 = vector.shape_cast %44 : vector<1x1x32xf32> to vector<1x32xf32>
    %46 = vector.broadcast %45 : vector<1x32xf32> to vector<64x32xf32>
    %47 = arith.addf %43, %46 : vector<64x32xf32>
    %cst_27 = arith.constant 0.000000e+00 : f32
    %48 = vector.broadcast %cst_27 : f32 to vector<64x32xf32>
    %49 = arith.maximumf %47, %48 : vector<64x32xf32>
    %50 = arith.truncf %49 : vector<64x32xf32> to vector<64x32xbf16>
    %c0_28 = arith.constant 0 : index
    %c0_29 = arith.constant 0 : index
    %c0_30 = arith.constant 0 : index
    %51 = vector.load %arg7[%c0_28, %c0_29, %c0_30] : memref<3x32x32xbf16, #tpu.memory_space<vmem>>, vector<1x32x32xbf16>
    %52 = vector.shape_cast %51 : vector<1x32x32xbf16> to vector<32x32xbf16>
    %cst_31 = arith.constant dense<0.000000e+00> : vector<64x32xf32>
    %53 = tpu.matmul %50, %52, %cst_31 {dimension_numbers = #tpu.dot_dimension_numbers<[1], [0], [0], [1], [0, 0, 1, 1], [], []>} : vector<64x32xbf16>, vector<32x32xbf16>, vector<64x32xf32> -> vector<64x32xf32>
    %c0_32 = arith.constant 0 : index
    %c0_33 = arith.constant 0 : index
    %c0_34 = arith.constant 0 : index
    %54 = vector.load %arg8[%c0_32, %c0_33, %c0_34] : memref<3x1x32xf32, #tpu.memory_space<vmem>>, vector<1x1x32xf32>
    %55 = vector.shape_cast %54 : vector<1x1x32xf32> to vector<1x32xf32>
    %56 = vector.broadcast %55 : vector<1x32xf32> to vector<64x32xf32>
    %57 = arith.addf %53, %56 : vector<64x32xf32>
    %58 = arith.addf %14, %57 : vector<64x32xf32>
    %59 = arith.mulf %58, %6 : vector<64x32xf32>
    %60 = vector.extract_strided_slice %59 {offsets = [0, 0], sizes = [1, 32], strides = [1, 1]} : vector<64x32xf32> to vector<1x32xf32>
    %61 = vector.shape_cast %60 : vector<1x32xf32> to vector<1x32xf32>
    %62 = vector.broadcast %61 : vector<1x32xf32> to vector<64x32xf32>
    %c2_i32_35 = arith.constant 2 : i32
    %63 = tpu.dynamic_rotate %59 by %c2_i32_35 dim 0 : vector<64x32xf32>, i32 -> vector<64x32xf32>
    %c2_i32_36 = arith.constant 2 : i32
    %64 = vector.broadcast %c2_i32_36 : i32 to vector<64x1xi32>
    %65 = arith.cmpi slt, %0, %64 : vector<64x1xi32>
    %66 = vector.shape_cast %65 : vector<64x1xi1> to vector<64x1xi1>
    %67 = vector.broadcast %66 : vector<64x1xi1> to vector<64x32xi1>
    %68 = arith.select %67, %62, %63 : vector<64x32xi1>, vector<64x32xf32>
    %c4_i32 = arith.constant 4 : i32
    %69 = tpu.dynamic_rotate %59 by %c4_i32 dim 0 : vector<64x32xf32>, i32 -> vector<64x32xf32>
    %c4_i32_37 = arith.constant 4 : i32
    %70 = vector.broadcast %c4_i32_37 : i32 to vector<64x1xi32>
    %71 = arith.cmpi slt, %0, %70 : vector<64x1xi32>
    %72 = vector.shape_cast %71 : vector<64x1xi1> to vector<64x1xi1>
    %73 = vector.broadcast %72 : vector<64x1xi1> to vector<64x32xi1>
    %74 = arith.select %73, %62, %69 : vector<64x32xi1>, vector<64x32xf32>
    %75 = arith.truncf %74 : vector<64x32xf32> to vector<64x32xbf16>
    %c1_38 = arith.constant 1 : index
    %c0_39 = arith.constant 0 : index
    %c0_40 = arith.constant 0 : index
    %c0_41 = arith.constant 0 : index
    %76 = vector.load %arg5[%c1_38, %c0_39, %c0_40, %c0_41] : memref<3x3x32x32xbf16, #tpu.memory_space<vmem>>, vector<1x1x32x32xbf16>
    %77 = vector.shape_cast %76 : vector<1x1x32x32xbf16> to vector<32x32xbf16>
    %cst_42 = arith.constant dense<0.000000e+00> : vector<64x32xf32>
    %78 = tpu.matmul %75, %77, %cst_42 {dimension_numbers = #tpu.dot_dimension_numbers<[1], [0], [0], [1], [0, 0, 1, 1], [], []>} : vector<64x32xbf16>, vector<32x32xbf16>, vector<64x32xf32> -> vector<64x32xf32>
    %79 = arith.truncf %68 : vector<64x32xf32> to vector<64x32xbf16>
    %c1_43 = arith.constant 1 : index
    %c1_44 = arith.constant 1 : index
    %c0_45 = arith.constant 0 : index
    %c0_46 = arith.constant 0 : index
    %80 = vector.load %arg5[%c1_43, %c1_44, %c0_45, %c0_46] : memref<3x3x32x32xbf16, #tpu.memory_space<vmem>>, vector<1x1x32x32xbf16>
    %81 = vector.shape_cast %80 : vector<1x1x32x32xbf16> to vector<32x32xbf16>
    %cst_47 = arith.constant dense<0.000000e+00> : vector<64x32xf32>
    %82 = tpu.matmul %79, %81, %cst_47 {dimension_numbers = #tpu.dot_dimension_numbers<[1], [0], [0], [1], [0, 0, 1, 1], [], []>} : vector<64x32xbf16>, vector<32x32xbf16>, vector<64x32xf32> -> vector<64x32xf32>
    %83 = arith.addf %78, %82 : vector<64x32xf32>
    %84 = arith.truncf %59 : vector<64x32xf32> to vector<64x32xbf16>
    %c1_48 = arith.constant 1 : index
    %c2_49 = arith.constant 2 : index
    %c0_50 = arith.constant 0 : index
    %c0_51 = arith.constant 0 : index
    %85 = vector.load %arg5[%c1_48, %c2_49, %c0_50, %c0_51] : memref<3x3x32x32xbf16, #tpu.memory_space<vmem>>, vector<1x1x32x32xbf16>
    %86 = vector.shape_cast %85 : vector<1x1x32x32xbf16> to vector<32x32xbf16>
    %cst_52 = arith.constant dense<0.000000e+00> : vector<64x32xf32>
    %87 = tpu.matmul %84, %86, %cst_52 {dimension_numbers = #tpu.dot_dimension_numbers<[1], [0], [0], [1], [0, 0, 1, 1], [], []>} : vector<64x32xbf16>, vector<32x32xbf16>, vector<64x32xf32> -> vector<64x32xf32>
    %88 = arith.addf %83, %87 : vector<64x32xf32>
    %c1_53 = arith.constant 1 : index
    %c0_54 = arith.constant 0 : index
    %c0_55 = arith.constant 0 : index
    %89 = vector.load %arg6[%c1_53, %c0_54, %c0_55] : memref<3x1x32xf32, #tpu.memory_space<vmem>>, vector<1x1x32xf32>
    %90 = vector.shape_cast %89 : vector<1x1x32xf32> to vector<1x32xf32>
    %91 = vector.broadcast %90 : vector<1x32xf32> to vector<64x32xf32>
    %92 = arith.addf %88, %91 : vector<64x32xf32>
    %cst_56 = arith.constant 0.000000e+00 : f32
    %93 = vector.broadcast %cst_56 : f32 to vector<64x32xf32>
    %94 = arith.maximumf %92, %93 : vector<64x32xf32>
    %95 = arith.truncf %94 : vector<64x32xf32> to vector<64x32xbf16>
    %c1_57 = arith.constant 1 : index
    %c0_58 = arith.constant 0 : index
    %c0_59 = arith.constant 0 : index
    %96 = vector.load %arg7[%c1_57, %c0_58, %c0_59] : memref<3x32x32xbf16, #tpu.memory_space<vmem>>, vector<1x32x32xbf16>
    %97 = vector.shape_cast %96 : vector<1x32x32xbf16> to vector<32x32xbf16>
    %cst_60 = arith.constant dense<0.000000e+00> : vector<64x32xf32>
    %98 = tpu.matmul %95, %97, %cst_60 {dimension_numbers = #tpu.dot_dimension_numbers<[1], [0], [0], [1], [0, 0, 1, 1], [], []>} : vector<64x32xbf16>, vector<32x32xbf16>, vector<64x32xf32> -> vector<64x32xf32>
    %c1_61 = arith.constant 1 : index
    %c0_62 = arith.constant 0 : index
    %c0_63 = arith.constant 0 : index
    %99 = vector.load %arg8[%c1_61, %c0_62, %c0_63] : memref<3x1x32xf32, #tpu.memory_space<vmem>>, vector<1x1x32xf32>
    %100 = vector.shape_cast %99 : vector<1x1x32xf32> to vector<1x32xf32>
    %101 = vector.broadcast %100 : vector<1x32xf32> to vector<64x32xf32>
    %102 = arith.addf %98, %101 : vector<64x32xf32>
    %103 = arith.addf %59, %102 : vector<64x32xf32>
    %104 = arith.mulf %103, %6 : vector<64x32xf32>
    %105 = vector.extract_strided_slice %104 {offsets = [0, 0], sizes = [1, 32], strides = [1, 1]} : vector<64x32xf32> to vector<1x32xf32>
    %106 = vector.shape_cast %105 : vector<1x32xf32> to vector<1x32xf32>
    %107 = vector.broadcast %106 : vector<1x32xf32> to vector<64x32xf32>
    %c4_i32_64 = arith.constant 4 : i32
    %108 = tpu.dynamic_rotate %104 by %c4_i32_64 dim 0 : vector<64x32xf32>, i32 -> vector<64x32xf32>
    %c4_i32_65 = arith.constant 4 : i32
    %109 = vector.broadcast %c4_i32_65 : i32 to vector<64x1xi32>
    %110 = arith.cmpi slt, %0, %109 : vector<64x1xi32>
    %111 = vector.shape_cast %110 : vector<64x1xi1> to vector<64x1xi1>
    %112 = vector.broadcast %111 : vector<64x1xi1> to vector<64x32xi1>
    %113 = arith.select %112, %107, %108 : vector<64x32xi1>, vector<64x32xf32>
    %c8_i32 = arith.constant 8 : i32
    %114 = tpu.dynamic_rotate %104 by %c8_i32 dim 0 : vector<64x32xf32>, i32 -> vector<64x32xf32>
    %c8_i32_66 = arith.constant 8 : i32
    %115 = vector.broadcast %c8_i32_66 : i32 to vector<64x1xi32>
    %116 = arith.cmpi slt, %0, %115 : vector<64x1xi32>
    %117 = vector.shape_cast %116 : vector<64x1xi1> to vector<64x1xi1>
    %118 = vector.broadcast %117 : vector<64x1xi1> to vector<64x32xi1>
    %119 = arith.select %118, %107, %114 : vector<64x32xi1>, vector<64x32xf32>
    %120 = arith.truncf %119 : vector<64x32xf32> to vector<64x32xbf16>
    %c2_67 = arith.constant 2 : index
    %c0_68 = arith.constant 0 : index
    %c0_69 = arith.constant 0 : index
    %c0_70 = arith.constant 0 : index
    %121 = vector.load %arg5[%c2_67, %c0_68, %c0_69, %c0_70] : memref<3x3x32x32xbf16, #tpu.memory_space<vmem>>, vector<1x1x32x32xbf16>
    %122 = vector.shape_cast %121 : vector<1x1x32x32xbf16> to vector<32x32xbf16>
    %cst_71 = arith.constant dense<0.000000e+00> : vector<64x32xf32>
    %123 = tpu.matmul %120, %122, %cst_71 {dimension_numbers = #tpu.dot_dimension_numbers<[1], [0], [0], [1], [0, 0, 1, 1], [], []>} : vector<64x32xbf16>, vector<32x32xbf16>, vector<64x32xf32> -> vector<64x32xf32>
    %124 = arith.truncf %113 : vector<64x32xf32> to vector<64x32xbf16>
    %c2_72 = arith.constant 2 : index
    %c1_73 = arith.constant 1 : index
    %c0_74 = arith.constant 0 : index
    %c0_75 = arith.constant 0 : index
    %125 = vector.load %arg5[%c2_72, %c1_73, %c0_74, %c0_75] : memref<3x3x32x32xbf16, #tpu.memory_space<vmem>>, vector<1x1x32x32xbf16>
    %126 = vector.shape_cast %125 : vector<1x1x32x32xbf16> to vector<32x32xbf16>
    %cst_76 = arith.constant dense<0.000000e+00> : vector<64x32xf32>
    %127 = tpu.matmul %124, %126, %cst_76 {dimension_numbers = #tpu.dot_dimension_numbers<[1], [0], [0], [1], [0, 0, 1, 1], [], []>} : vector<64x32xbf16>, vector<32x32xbf16>, vector<64x32xf32> -> vector<64x32xf32>
    %128 = arith.addf %123, %127 : vector<64x32xf32>
    %129 = arith.truncf %104 : vector<64x32xf32> to vector<64x32xbf16>
    %c2_77 = arith.constant 2 : index
    %c2_78 = arith.constant 2 : index
    %c0_79 = arith.constant 0 : index
    %c0_80 = arith.constant 0 : index
    %130 = vector.load %arg5[%c2_77, %c2_78, %c0_79, %c0_80] : memref<3x3x32x32xbf16, #tpu.memory_space<vmem>>, vector<1x1x32x32xbf16>
    %131 = vector.shape_cast %130 : vector<1x1x32x32xbf16> to vector<32x32xbf16>
    %cst_81 = arith.constant dense<0.000000e+00> : vector<64x32xf32>
    %132 = tpu.matmul %129, %131, %cst_81 {dimension_numbers = #tpu.dot_dimension_numbers<[1], [0], [0], [1], [0, 0, 1, 1], [], []>} : vector<64x32xbf16>, vector<32x32xbf16>, vector<64x32xf32> -> vector<64x32xf32>
    %133 = arith.addf %128, %132 : vector<64x32xf32>
    %c2_82 = arith.constant 2 : index
    %c0_83 = arith.constant 0 : index
    %c0_84 = arith.constant 0 : index
    %134 = vector.load %arg6[%c2_82, %c0_83, %c0_84] : memref<3x1x32xf32, #tpu.memory_space<vmem>>, vector<1x1x32xf32>
    %135 = vector.shape_cast %134 : vector<1x1x32xf32> to vector<1x32xf32>
    %136 = vector.broadcast %135 : vector<1x32xf32> to vector<64x32xf32>
    %137 = arith.addf %133, %136 : vector<64x32xf32>
    %cst_85 = arith.constant 0.000000e+00 : f32
    %138 = vector.broadcast %cst_85 : f32 to vector<64x32xf32>
    %139 = arith.maximumf %137, %138 : vector<64x32xf32>
    %140 = arith.truncf %139 : vector<64x32xf32> to vector<64x32xbf16>
    %c2_86 = arith.constant 2 : index
    %c0_87 = arith.constant 0 : index
    %c0_88 = arith.constant 0 : index
    %141 = vector.load %arg7[%c2_86, %c0_87, %c0_88] : memref<3x32x32xbf16, #tpu.memory_space<vmem>>, vector<1x32x32xbf16>
    %142 = vector.shape_cast %141 : vector<1x32x32xbf16> to vector<32x32xbf16>
    %cst_89 = arith.constant dense<0.000000e+00> : vector<64x32xf32>
    %143 = tpu.matmul %140, %142, %cst_89 {dimension_numbers = #tpu.dot_dimension_numbers<[1], [0], [0], [1], [0, 0, 1, 1], [], []>} : vector<64x32xbf16>, vector<32x32xbf16>, vector<64x32xf32> -> vector<64x32xf32>
    %c2_90 = arith.constant 2 : index
    %c0_91 = arith.constant 0 : index
    %c0_92 = arith.constant 0 : index
    %144 = vector.load %arg8[%c2_90, %c0_91, %c0_92] : memref<3x1x32xf32, #tpu.memory_space<vmem>>, vector<1x1x32xf32>
    %145 = vector.shape_cast %144 : vector<1x1x32xf32> to vector<1x32xf32>
    %146 = vector.broadcast %145 : vector<1x32xf32> to vector<64x32xf32>
    %147 = arith.addf %143, %146 : vector<64x32xf32>
    %148 = arith.addf %104, %147 : vector<64x32xf32>
    %149 = arith.mulf %148, %6 : vector<64x32xf32>
    %150 = arith.truncf %149 : vector<64x32xf32> to vector<64x32xbf16>
    %c0_93 = arith.constant 0 : index
    %c0_94 = arith.constant 0 : index
    %151 = vector.load %arg13[%c0_93, %c0_94] : memref<32x128xbf16, #tpu.memory_space<vmem>>, vector<32x128xbf16>
    %cst_95 = arith.constant dense<0.000000e+00> : vector<64x128xf32>
    %152 = tpu.matmul %150, %151, %cst_95 {dimension_numbers = #tpu.dot_dimension_numbers<[1], [0], [0], [1], [0, 0, 1, 1], [], []>} : vector<64x32xbf16>, vector<32x128xbf16>, vector<64x128xf32> -> vector<64x128xf32>
    %c0_96 = arith.constant 0 : index
    %c0_97 = arith.constant 0 : index
    %153 = vector.load %arg14[%c0_96, %c0_97] : memref<1x128xf32, #tpu.memory_space<vmem>>, vector<1x128xf32>
    %154 = vector.broadcast %153 : vector<1x128xf32> to vector<64x128xf32>
    %155 = arith.addf %152, %154 : vector<64x128xf32>
    %156 = arith.mulf %155, %8 : vector<64x128xf32>
    %157 = arith.truncf %156 : vector<64x128xf32> to vector<64x128xbf16>
    %c0_98 = arith.constant 0 : index
    %c0_99 = arith.constant 0 : index
    %158 = vector.load %arg17[%c0_98, %c0_99] : memref<128x128xbf16, #tpu.memory_space<vmem>>, vector<128x128xbf16>
    %cst_100 = arith.constant dense<0.000000e+00> : vector<64x128xf32>
    %159 = tpu.matmul %157, %158, %cst_100 {dimension_numbers = #tpu.dot_dimension_numbers<[1], [0], [0], [1], [0, 0, 1, 1], [], []>} : vector<64x128xbf16>, vector<128x128xbf16>, vector<64x128xf32> -> vector<64x128xf32>
    %c0_101 = arith.constant 0 : index
    %c0_102 = arith.constant 0 : index
    %160 = vector.load %arg19[%c0_101, %c0_102] : memref<1x128xf32, #tpu.memory_space<vmem>>, vector<1x128xf32>
    %161 = vector.broadcast %160 : vector<1x128xf32> to vector<64x128xf32>
    %162 = arith.addf %159, %161 : vector<64x128xf32>
    %c0_103 = arith.constant 0 : index
    %c0_104 = arith.constant 0 : index
    %c0_105 = arith.constant 0 : index
    %163 = vector.load %arg20[%c0_103, %c0_104, %c0_105] : memref<2x64x128xf32, #tpu.memory_space<vmem>>, vector<1x64x128xf32>
    %164 = vector.shape_cast %163 : vector<1x64x128xf32> to vector<64x128xf32>
    %165 = vector.shape_cast %162 : vector<64x128xf32> to vector<1x64x128xf32>
    tpu.vector_store %arg20[%c0_103, %c0_104, %c0_105], %165 {strides = array<i32>} : memref<2x64x128xf32, #tpu.memory_space<vmem>>, vector<1x64x128xf32>,
    %c0_106 = arith.constant 0 : index
    %c0_107 = arith.constant 0 : index
    %166 = vector.load %arg9[%c0_106, %c0_107] : memref<32x96xbf16, #tpu.memory_space<vmem>>, vector<32x96xbf16>
    %cst_108 = arith.constant dense<0.000000e+00> : vector<64x96xf32>
    %167 = tpu.matmul %150, %166, %cst_108 {dimension_numbers = #tpu.dot_dimension_numbers<[1], [0], [0], [1], [0, 0, 1, 1], [], []>} : vector<64x32xbf16>, vector<32x96xbf16>, vector<64x96xf32> -> vector<64x96xf32>
    %c0_109 = arith.constant 0 : index
    %c0_110 = arith.constant 0 : index
    %168 = vector.load %arg10[%c0_109, %c0_110] : memref<1x96xf32, #tpu.memory_space<vmem>>, vector<1x96xf32>
    %169 = vector.broadcast %168 : vector<1x96xf32> to vector<64x96xf32>
    %170 = arith.addf %167, %169 : vector<64x96xf32>
    %c0_111 = arith.constant 0 : index
    %c0_112 = arith.constant 0 : index
    %171 = vector.load %arg22[%c0_111, %c0_112] : memref<128x96xf32, #tpu.memory_space<vmem>>, vector<64x96xf32>
    tpu.vector_store %arg22[%c0_111, %c0_112], %170 {strides = array<i32>} : memref<128x96xf32, #tpu.memory_space<vmem>>, vector<64x96xf32>,
    %c1_113 = arith.constant 1 : index
    %c0_114 = arith.constant 0 : index
    %c0_115 = arith.constant 0 : index
    %172 = vector.load %arg1[%c1_113, %c0_114, %c0_115] : memref<2x64x8xf32, #tpu.memory_space<vmem>>, vector<1x64x8xf32>
    %173 = vector.shape_cast %172 : vector<1x64x8xf32> to vector<64x8xf32>
    %c1_116 = arith.constant 1 : index
    %c0_117 = arith.constant 0 : index
    %c0_118 = arith.constant 0 : index
    %174 = vector.load %arg2[%c1_116, %c0_117, %c0_118] : memref<2x64x1xf32, #tpu.memory_space<vmem>>, vector<1x64x1xf32>
    %175 = vector.shape_cast %174 : vector<1x64x1xf32> to vector<64x1xf32>
    %176 = vector.shape_cast %175 : vector<64x1xf32> to vector<64x1xf32>
    %177 = vector.broadcast %176 : vector<64x1xf32> to vector<64x32xf32>
    %178 = vector.shape_cast %175 : vector<64x1xf32> to vector<64x1xf32>
    %179 = vector.broadcast %178 : vector<64x1xf32> to vector<64x128xf32>
    %180 = arith.truncf %173 : vector<64x8xf32> to vector<64x8xbf16>
    %c0_119 = arith.constant 0 : index
    %c0_120 = arith.constant 0 : index
    %181 = vector.load %arg3[%c0_119, %c0_120] : memref<8x32xbf16, #tpu.memory_space<vmem>>, vector<8x32xbf16>
    %cst_121 = arith.constant dense<0.000000e+00> : vector<64x32xf32>
    %182 = tpu.matmul %180, %181, %cst_121 {dimension_numbers = #tpu.dot_dimension_numbers<[1], [0], [0], [1], [0, 0, 1, 1], [], []>} : vector<64x8xbf16>, vector<8x32xbf16>, vector<64x32xf32> -> vector<64x32xf32>
    %c0_122 = arith.constant 0 : index
    %c0_123 = arith.constant 0 : index
    %183 = vector.load %arg4[%c0_122, %c0_123] : memref<1x32xf32, #tpu.memory_space<vmem>>, vector<1x32xf32>
    %184 = vector.broadcast %183 : vector<1x32xf32> to vector<64x32xf32>
    %185 = arith.addf %182, %184 : vector<64x32xf32>
    %186 = vector.extract_strided_slice %185 {offsets = [0, 0], sizes = [1, 32], strides = [1, 1]} : vector<64x32xf32> to vector<1x32xf32>
    %187 = vector.shape_cast %186 : vector<1x32xf32> to vector<1x32xf32>
    %188 = vector.broadcast %187 : vector<1x32xf32> to vector<64x32xf32>
    %c1_i32_124 = arith.constant 1 : i32
    %189 = tpu.dynamic_rotate %185 by %c1_i32_124 dim 0 : vector<64x32xf32>, i32 -> vector<64x32xf32>
    %c1_i32_125 = arith.constant 1 : i32
    %190 = vector.broadcast %c1_i32_125 : i32 to vector<64x1xi32>
    %191 = arith.cmpi slt, %0, %190 : vector<64x1xi32>
    %192 = vector.shape_cast %191 : vector<64x1xi1> to vector<64x1xi1>
    %193 = vector.broadcast %192 : vector<64x1xi1> to vector<64x32xi1>
    %194 = arith.select %193, %188, %189 : vector<64x32xi1>, vector<64x32xf32>
    %c2_i32_126 = arith.constant 2 : i32
    %195 = tpu.dynamic_rotate %185 by %c2_i32_126 dim 0 : vector<64x32xf32>, i32 -> vector<64x32xf32>
    %c2_i32_127 = arith.constant 2 : i32
    %196 = vector.broadcast %c2_i32_127 : i32 to vector<64x1xi32>
    %197 = arith.cmpi slt, %0, %196 : vector<64x1xi32>
    %198 = vector.shape_cast %197 : vector<64x1xi1> to vector<64x1xi1>
    %199 = vector.broadcast %198 : vector<64x1xi1> to vector<64x32xi1>
    %200 = arith.select %199, %188, %195 : vector<64x32xi1>, vector<64x32xf32>
    %201 = arith.truncf %200 : vector<64x32xf32> to vector<64x32xbf16>
    %c0_128 = arith.constant 0 : index
    %c0_129 = arith.constant 0 : index
    %c0_130 = arith.constant 0 : index
    %c0_131 = arith.constant 0 : index
    %202 = vector.load %arg5[%c0_128, %c0_129, %c0_130, %c0_131] : memref<3x3x32x32xbf16, #tpu.memory_space<vmem>>, vector<1x1x32x32xbf16>
    %203 = vector.shape_cast %202 : vector<1x1x32x32xbf16> to vector<32x32xbf16>
    %cst_132 = arith.constant dense<0.000000e+00> : vector<64x32xf32>
    %204 = tpu.matmul %201, %203, %cst_132 {dimension_numbers = #tpu.dot_dimension_numbers<[1], [0], [0], [1], [0, 0, 1, 1], [], []>} : vector<64x32xbf16>, vector<32x32xbf16>, vector<64x32xf32> -> vector<64x32xf32>
    %205 = arith.truncf %194 : vector<64x32xf32> to vector<64x32xbf16>
    %c0_133 = arith.constant 0 : index
    %c1_134 = arith.constant 1 : index
    %c0_135 = arith.constant 0 : index
    %c0_136 = arith.constant 0 : index
    %206 = vector.load %arg5[%c0_133, %c1_134, %c0_135, %c0_136] : memref<3x3x32x32xbf16, #tpu.memory_space<vmem>>, vector<1x1x32x32xbf16>
    %207 = vector.shape_cast %206 : vector<1x1x32x32xbf16> to vector<32x32xbf16>
    %cst_137 = arith.constant dense<0.000000e+00> : vector<64x32xf32>
    %208 = tpu.matmul %205, %207, %cst_137 {dimension_numbers = #tpu.dot_dimension_numbers<[1], [0], [0], [1], [0, 0, 1, 1], [], []>} : vector<64x32xbf16>, vector<32x32xbf16>, vector<64x32xf32> -> vector<64x32xf32>
    %209 = arith.addf %204, %208 : vector<64x32xf32>
    %210 = arith.truncf %185 : vector<64x32xf32> to vector<64x32xbf16>
    %c0_138 = arith.constant 0 : index
    %c2_139 = arith.constant 2 : index
    %c0_140 = arith.constant 0 : index
    %c0_141 = arith.constant 0 : index
    %211 = vector.load %arg5[%c0_138, %c2_139, %c0_140, %c0_141] : memref<3x3x32x32xbf16, #tpu.memory_space<vmem>>, vector<1x1x32x32xbf16>
    %212 = vector.shape_cast %211 : vector<1x1x32x32xbf16> to vector<32x32xbf16>
    %cst_142 = arith.constant dense<0.000000e+00> : vector<64x32xf32>
    %213 = tpu.matmul %210, %212, %cst_142 {dimension_numbers = #tpu.dot_dimension_numbers<[1], [0], [0], [1], [0, 0, 1, 1], [], []>} : vector<64x32xbf16>, vector<32x32xbf16>, vector<64x32xf32> -> vector<64x32xf32>
    %214 = arith.addf %209, %213 : vector<64x32xf32>
    %c0_143 = arith.constant 0 : index
    %c0_144 = arith.constant 0 : index
    %c0_145 = arith.constant 0 : index
    %215 = vector.load %arg6[%c0_143, %c0_144, %c0_145] : memref<3x1x32xf32, #tpu.memory_space<vmem>>, vector<1x1x32xf32>
    %216 = vector.shape_cast %215 : vector<1x1x32xf32> to vector<1x32xf32>
    %217 = vector.broadcast %216 : vector<1x32xf32> to vector<64x32xf32>
    %218 = arith.addf %214, %217 : vector<64x32xf32>
    %cst_146 = arith.constant 0.000000e+00 : f32
    %219 = vector.broadcast %cst_146 : f32 to vector<64x32xf32>
    %220 = arith.maximumf %218, %219 : vector<64x32xf32>
    %221 = arith.truncf %220 : vector<64x32xf32> to vector<64x32xbf16>
    %c0_147 = arith.constant 0 : index
    %c0_148 = arith.constant 0 : index
    %c0_149 = arith.constant 0 : index
    %222 = vector.load %arg7[%c0_147, %c0_148, %c0_149] : memref<3x32x32xbf16, #tpu.memory_space<vmem>>, vector<1x32x32xbf16>
    %223 = vector.shape_cast %222 : vector<1x32x32xbf16> to vector<32x32xbf16>
    %cst_150 = arith.constant dense<0.000000e+00> : vector<64x32xf32>
    %224 = tpu.matmul %221, %223, %cst_150 {dimension_numbers = #tpu.dot_dimension_numbers<[1], [0], [0], [1], [0, 0, 1, 1], [], []>} : vector<64x32xbf16>, vector<32x32xbf16>, vector<64x32xf32> -> vector<64x32xf32>
    %c0_151 = arith.constant 0 : index
    %c0_152 = arith.constant 0 : index
    %c0_153 = arith.constant 0 : index
    %225 = vector.load %arg8[%c0_151, %c0_152, %c0_153] : memref<3x1x32xf32, #tpu.memory_space<vmem>>, vector<1x1x32xf32>
    %226 = vector.shape_cast %225 : vector<1x1x32xf32> to vector<1x32xf32>
    %227 = vector.broadcast %226 : vector<1x32xf32> to vector<64x32xf32>
    %228 = arith.addf %224, %227 : vector<64x32xf32>
    %229 = arith.addf %185, %228 : vector<64x32xf32>
    %230 = arith.mulf %229, %177 : vector<64x32xf32>
    %231 = vector.extract_strided_slice %230 {offsets = [0, 0], sizes = [1, 32], strides = [1, 1]} : vector<64x32xf32> to vector<1x32xf32>
    %232 = vector.shape_cast %231 : vector<1x32xf32> to vector<1x32xf32>
    %233 = vector.broadcast %232 : vector<1x32xf32> to vector<64x32xf32>
    %c2_i32_154 = arith.constant 2 : i32
    %234 = tpu.dynamic_rotate %230 by %c2_i32_154 dim 0 : vector<64x32xf32>, i32 -> vector<64x32xf32>
    %c2_i32_155 = arith.constant 2 : i32
    %235 = vector.broadcast %c2_i32_155 : i32 to vector<64x1xi32>
    %236 = arith.cmpi slt, %0, %235 : vector<64x1xi32>
    %237 = vector.shape_cast %236 : vector<64x1xi1> to vector<64x1xi1>
    %238 = vector.broadcast %237 : vector<64x1xi1> to vector<64x32xi1>
    %239 = arith.select %238, %233, %234 : vector<64x32xi1>, vector<64x32xf32>
    %c4_i32_156 = arith.constant 4 : i32
    %240 = tpu.dynamic_rotate %230 by %c4_i32_156 dim 0 : vector<64x32xf32>, i32 -> vector<64x32xf32>
    %c4_i32_157 = arith.constant 4 : i32
    %241 = vector.broadcast %c4_i32_157 : i32 to vector<64x1xi32>
    %242 = arith.cmpi slt, %0, %241 : vector<64x1xi32>
    %243 = vector.shape_cast %242 : vector<64x1xi1> to vector<64x1xi1>
    %244 = vector.broadcast %243 : vector<64x1xi1> to vector<64x32xi1>
    %245 = arith.select %244, %233, %240 : vector<64x32xi1>, vector<64x32xf32>
    %246 = arith.truncf %245 : vector<64x32xf32> to vector<64x32xbf16>
    %c1_158 = arith.constant 1 : index
    %c0_159 = arith.constant 0 : index
    %c0_160 = arith.constant 0 : index
    %c0_161 = arith.constant 0 : index
    %247 = vector.load %arg5[%c1_158, %c0_159, %c0_160, %c0_161] : memref<3x3x32x32xbf16, #tpu.memory_space<vmem>>, vector<1x1x32x32xbf16>
    %248 = vector.shape_cast %247 : vector<1x1x32x32xbf16> to vector<32x32xbf16>
    %cst_162 = arith.constant dense<0.000000e+00> : vector<64x32xf32>
    %249 = tpu.matmul %246, %248, %cst_162 {dimension_numbers = #tpu.dot_dimension_numbers<[1], [0], [0], [1], [0, 0, 1, 1], [], []>} : vector<64x32xbf16>, vector<32x32xbf16>, vector<64x32xf32> -> vector<64x32xf32>
    %250 = arith.truncf %239 : vector<64x32xf32> to vector<64x32xbf16>
    %c1_163 = arith.constant 1 : index
    %c1_164 = arith.constant 1 : index
    %c0_165 = arith.constant 0 : index
    %c0_166 = arith.constant 0 : index
    %251 = vector.load %arg5[%c1_163, %c1_164, %c0_165, %c0_166] : memref<3x3x32x32xbf16, #tpu.memory_space<vmem>>, vector<1x1x32x32xbf16>
    %252 = vector.shape_cast %251 : vector<1x1x32x32xbf16> to vector<32x32xbf16>
    %cst_167 = arith.constant dense<0.000000e+00> : vector<64x32xf32>
    %253 = tpu.matmul %250, %252, %cst_167 {dimension_numbers = #tpu.dot_dimension_numbers<[1], [0], [0], [1], [0, 0, 1, 1], [], []>} : vector<64x32xbf16>, vector<32x32xbf16>, vector<64x32xf32> -> vector<64x32xf32>
    %254 = arith.addf %249, %253 : vector<64x32xf32>
    %255 = arith.truncf %230 : vector<64x32xf32> to vector<64x32xbf16>
    %c1_168 = arith.constant 1 : index
    %c2_169 = arith.constant 2 : index
    %c0_170 = arith.constant 0 : index
    %c0_171 = arith.constant 0 : index
    %256 = vector.load %arg5[%c1_168, %c2_169, %c0_170, %c0_171] : memref<3x3x32x32xbf16, #tpu.memory_space<vmem>>, vector<1x1x32x32xbf16>
    %257 = vector.shape_cast %256 : vector<1x1x32x32xbf16> to vector<32x32xbf16>
    %cst_172 = arith.constant dense<0.000000e+00> : vector<64x32xf32>
    %258 = tpu.matmul %255, %257, %cst_172 {dimension_numbers = #tpu.dot_dimension_numbers<[1], [0], [0], [1], [0, 0, 1, 1], [], []>} : vector<64x32xbf16>, vector<32x32xbf16>, vector<64x32xf32> -> vector<64x32xf32>
    %259 = arith.addf %254, %258 : vector<64x32xf32>
    %c1_173 = arith.constant 1 : index
    %c0_174 = arith.constant 0 : index
    %c0_175 = arith.constant 0 : index
    %260 = vector.load %arg6[%c1_173, %c0_174, %c0_175] : memref<3x1x32xf32, #tpu.memory_space<vmem>>, vector<1x1x32xf32>
    %261 = vector.shape_cast %260 : vector<1x1x32xf32> to vector<1x32xf32>
    %262 = vector.broadcast %261 : vector<1x32xf32> to vector<64x32xf32>
    %263 = arith.addf %259, %262 : vector<64x32xf32>
    %cst_176 = arith.constant 0.000000e+00 : f32
    %264 = vector.broadcast %cst_176 : f32 to vector<64x32xf32>
    %265 = arith.maximumf %263, %264 : vector<64x32xf32>
    %266 = arith.truncf %265 : vector<64x32xf32> to vector<64x32xbf16>
    %c1_177 = arith.constant 1 : index
    %c0_178 = arith.constant 0 : index
    %c0_179 = arith.constant 0 : index
    %267 = vector.load %arg7[%c1_177, %c0_178, %c0_179] : memref<3x32x32xbf16, #tpu.memory_space<vmem>>, vector<1x32x32xbf16>
    %268 = vector.shape_cast %267 : vector<1x32x32xbf16> to vector<32x32xbf16>
    %cst_180 = arith.constant dense<0.000000e+00> : vector<64x32xf32>
    %269 = tpu.matmul %266, %268, %cst_180 {dimension_numbers = #tpu.dot_dimension_numbers<[1], [0], [0], [1], [0, 0, 1, 1], [], []>} : vector<64x32xbf16>, vector<32x32xbf16>, vector<64x32xf32> -> vector<64x32xf32>
    %c1_181 = arith.constant 1 : index
    %c0_182 = arith.constant 0 : index
    %c0_183 = arith.constant 0 : index
    %270 = vector.load %arg8[%c1_181, %c0_182, %c0_183] : memref<3x1x32xf32, #tpu.memory_space<vmem>>, vector<1x1x32xf32>
    %271 = vector.shape_cast %270 : vector<1x1x32xf32> to vector<1x32xf32>
    %272 = vector.broadcast %271 : vector<1x32xf32> to vector<64x32xf32>
    %273 = arith.addf %269, %272 : vector<64x32xf32>
    %274 = arith.addf %230, %273 : vector<64x32xf32>
    %275 = arith.mulf %274, %177 : vector<64x32xf32>
    %276 = vector.extract_strided_slice %275 {offsets = [0, 0], sizes = [1, 32], strides = [1, 1]} : vector<64x32xf32> to vector<1x32xf32>
    %277 = vector.shape_cast %276 : vector<1x32xf32> to vector<1x32xf32>
    %278 = vector.broadcast %277 : vector<1x32xf32> to vector<64x32xf32>
    %c4_i32_184 = arith.constant 4 : i32
    %279 = tpu.dynamic_rotate %275 by %c4_i32_184 dim 0 : vector<64x32xf32>, i32 -> vector<64x32xf32>
    %c4_i32_185 = arith.constant 4 : i32
    %280 = vector.broadcast %c4_i32_185 : i32 to vector<64x1xi32>
    %281 = arith.cmpi slt, %0, %280 : vector<64x1xi32>
    %282 = vector.shape_cast %281 : vector<64x1xi1> to vector<64x1xi1>
    %283 = vector.broadcast %282 : vector<64x1xi1> to vector<64x32xi1>
    %284 = arith.select %283, %278, %279 : vector<64x32xi1>, vector<64x32xf32>
    %c8_i32_186 = arith.constant 8 : i32
    %285 = tpu.dynamic_rotate %275 by %c8_i32_186 dim 0 : vector<64x32xf32>, i32 -> vector<64x32xf32>
    %c8_i32_187 = arith.constant 8 : i32
    %286 = vector.broadcast %c8_i32_187 : i32 to vector<64x1xi32>
    %287 = arith.cmpi slt, %0, %286 : vector<64x1xi32>
    %288 = vector.shape_cast %287 : vector<64x1xi1> to vector<64x1xi1>
    %289 = vector.broadcast %288 : vector<64x1xi1> to vector<64x32xi1>
    %290 = arith.select %289, %278, %285 : vector<64x32xi1>, vector<64x32xf32>
    %291 = arith.truncf %290 : vector<64x32xf32> to vector<64x32xbf16>
    %c2_188 = arith.constant 2 : index
    %c0_189 = arith.constant 0 : index
    %c0_190 = arith.constant 0 : index
    %c0_191 = arith.constant 0 : index
    %292 = vector.load %arg5[%c2_188, %c0_189, %c0_190, %c0_191] : memref<3x3x32x32xbf16, #tpu.memory_space<vmem>>, vector<1x1x32x32xbf16>
    %293 = vector.shape_cast %292 : vector<1x1x32x32xbf16> to vector<32x32xbf16>
    %cst_192 = arith.constant dense<0.000000e+00> : vector<64x32xf32>
    %294 = tpu.matmul %291, %293, %cst_192 {dimension_numbers = #tpu.dot_dimension_numbers<[1], [0], [0], [1], [0, 0, 1, 1], [], []>} : vector<64x32xbf16>, vector<32x32xbf16>, vector<64x32xf32> -> vector<64x32xf32>
    %295 = arith.truncf %284 : vector<64x32xf32> to vector<64x32xbf16>
    %c2_193 = arith.constant 2 : index
    %c1_194 = arith.constant 1 : index
    %c0_195 = arith.constant 0 : index
    %c0_196 = arith.constant 0 : index
    %296 = vector.load %arg5[%c2_193, %c1_194, %c0_195, %c0_196] : memref<3x3x32x32xbf16, #tpu.memory_space<vmem>>, vector<1x1x32x32xbf16>
    %297 = vector.shape_cast %296 : vector<1x1x32x32xbf16> to vector<32x32xbf16>
    %cst_197 = arith.constant dense<0.000000e+00> : vector<64x32xf32>
    %298 = tpu.matmul %295, %297, %cst_197 {dimension_numbers = #tpu.dot_dimension_numbers<[1], [0], [0], [1], [0, 0, 1, 1], [], []>} : vector<64x32xbf16>, vector<32x32xbf16>, vector<64x32xf32> -> vector<64x32xf32>
    %299 = arith.addf %294, %298 : vector<64x32xf32>
    %300 = arith.truncf %275 : vector<64x32xf32> to vector<64x32xbf16>
    %c2_198 = arith.constant 2 : index
    %c2_199 = arith.constant 2 : index
    %c0_200 = arith.constant 0 : index
    %c0_201 = arith.constant 0 : index
    %301 = vector.load %arg5[%c2_198, %c2_199, %c0_200, %c0_201] : memref<3x3x32x32xbf16, #tpu.memory_space<vmem>>, vector<1x1x32x32xbf16>
    %302 = vector.shape_cast %301 : vector<1x1x32x32xbf16> to vector<32x32xbf16>
    %cst_202 = arith.constant dense<0.000000e+00> : vector<64x32xf32>
    %303 = tpu.matmul %300, %302, %cst_202 {dimension_numbers = #tpu.dot_dimension_numbers<[1], [0], [0], [1], [0, 0, 1, 1], [], []>} : vector<64x32xbf16>, vector<32x32xbf16>, vector<64x32xf32> -> vector<64x32xf32>
    %304 = arith.addf %299, %303 : vector<64x32xf32>
    %c2_203 = arith.constant 2 : index
    %c0_204 = arith.constant 0 : index
    %c0_205 = arith.constant 0 : index
    %305 = vector.load %arg6[%c2_203, %c0_204, %c0_205] : memref<3x1x32xf32, #tpu.memory_space<vmem>>, vector<1x1x32xf32>
    %306 = vector.shape_cast %305 : vector<1x1x32xf32> to vector<1x32xf32>
    %307 = vector.broadcast %306 : vector<1x32xf32> to vector<64x32xf32>
    %308 = arith.addf %304, %307 : vector<64x32xf32>
    %cst_206 = arith.constant 0.000000e+00 : f32
    %309 = vector.broadcast %cst_206 : f32 to vector<64x32xf32>
    %310 = arith.maximumf %308, %309 : vector<64x32xf32>
    %311 = arith.truncf %310 : vector<64x32xf32> to vector<64x32xbf16>
    %c2_207 = arith.constant 2 : index
    %c0_208 = arith.constant 0 : index
    %c0_209 = arith.constant 0 : index
    %312 = vector.load %arg7[%c2_207, %c0_208, %c0_209] : memref<3x32x32xbf16, #tpu.memory_space<vmem>>, vector<1x32x32xbf16>
    %313 = vector.shape_cast %312 : vector<1x32x32xbf16> to vector<32x32xbf16>
    %cst_210 = arith.constant dense<0.000000e+00> : vector<64x32xf32>
    %314 = tpu.matmul %311, %313, %cst_210 {dimension_numbers = #tpu.dot_dimension_numbers<[1], [0], [0], [1], [0, 0, 1, 1], [], []>} : vector<64x32xbf16>, vector<32x32xbf16>, vector<64x32xf32> -> vector<64x32xf32>
    %c2_211 = arith.constant 2 : index
    %c0_212 = arith.constant 0 : index
    %c0_213 = arith.constant 0 : index
    %315 = vector.load %arg8[%c2_211, %c0_212, %c0_213] : memref<3x1x32xf32, #tpu.memory_space<vmem>>, vector<1x1x32xf32>
    %316 = vector.shape_cast %315 : vector<1x1x32xf32> to vector<1x32xf32>
    %317 = vector.broadcast %316 : vector<1x32xf32> to vector<64x32xf32>
    %318 = arith.addf %314, %317 : vector<64x32xf32>
    %319 = arith.addf %275, %318 : vector<64x32xf32>
    %320 = arith.mulf %319, %177 : vector<64x32xf32>
    %321 = arith.truncf %320 : vector<64x32xf32> to vector<64x32xbf16>
    %c0_214 = arith.constant 0 : index
    %c0_215 = arith.constant 0 : index
    %322 = vector.load %arg13[%c0_214, %c0_215] : memref<32x128xbf16, #tpu.memory_space<vmem>>, vector<32x128xbf16>
    %cst_216 = arith.constant dense<0.000000e+00> : vector<64x128xf32>
    %323 = tpu.matmul %321, %322, %cst_216 {dimension_numbers = #tpu.dot_dimension_numbers<[1], [0], [0], [1], [0, 0, 1, 1], [], []>} : vector<64x32xbf16>, vector<32x128xbf16>, vector<64x128xf32> -> vector<64x128xf32>
    %c0_217 = arith.constant 0 : index
    %c0_218 = arith.constant 0 : index
    %324 = vector.load %arg14[%c0_217, %c0_218] : memref<1x128xf32, #tpu.memory_space<vmem>>, vector<1x128xf32>
    %325 = vector.broadcast %324 : vector<1x128xf32> to vector<64x128xf32>
    %326 = arith.addf %323, %325 : vector<64x128xf32>
    %327 = arith.mulf %326, %179 : vector<64x128xf32>
    %328 = arith.truncf %327 : vector<64x128xf32> to vector<64x128xbf16>
    %c0_219 = arith.constant 0 : index
    %c0_220 = arith.constant 0 : index
    %329 = vector.load %arg17[%c0_219, %c0_220] : memref<128x128xbf16, #tpu.memory_space<vmem>>, vector<128x128xbf16>
    %cst_221 = arith.constant dense<0.000000e+00> : vector<64x128xf32>
    %330 = tpu.matmul %328, %329, %cst_221 {dimension_numbers = #tpu.dot_dimension_numbers<[1], [0], [0], [1], [0, 0, 1, 1], [], []>} : vector<64x128xbf16>, vector<128x128xbf16>, vector<64x128xf32> -> vector<64x128xf32>
    %c0_222 = arith.constant 0 : index
    %c0_223 = arith.constant 0 : index
    %331 = vector.load %arg19[%c0_222, %c0_223] : memref<1x128xf32, #tpu.memory_space<vmem>>, vector<1x128xf32>
    %332 = vector.broadcast %331 : vector<1x128xf32> to vector<64x128xf32>
    %333 = arith.addf %330, %332 : vector<64x128xf32>
    %c1_224 = arith.constant 1 : index
    %c0_225 = arith.constant 0 : index
    %c0_226 = arith.constant 0 : index
    %334 = vector.load %arg20[%c1_224, %c0_225, %c0_226] : memref<2x64x128xf32, #tpu.memory_space<vmem>>, vector<1x64x128xf32>
    %335 = vector.shape_cast %334 : vector<1x64x128xf32> to vector<64x128xf32>
    %336 = vector.shape_cast %333 : vector<64x128xf32> to vector<1x64x128xf32>
    tpu.vector_store %arg20[%c1_224, %c0_225, %c0_226], %336 {strides = array<i32>} : memref<2x64x128xf32, #tpu.memory_space<vmem>>, vector<1x64x128xf32>,
    %c0_227 = arith.constant 0 : index
    %c0_228 = arith.constant 0 : index
    %337 = vector.load %arg9[%c0_227, %c0_228] : memref<32x96xbf16, #tpu.memory_space<vmem>>, vector<32x96xbf16>
    %cst_229 = arith.constant dense<0.000000e+00> : vector<64x96xf32>
    %338 = tpu.matmul %321, %337, %cst_229 {dimension_numbers = #tpu.dot_dimension_numbers<[1], [0], [0], [1], [0, 0, 1, 1], [], []>} : vector<64x32xbf16>, vector<32x96xbf16>, vector<64x96xf32> -> vector<64x96xf32>
    %c0_230 = arith.constant 0 : index
    %c0_231 = arith.constant 0 : index
    %339 = vector.load %arg10[%c0_230, %c0_231] : memref<1x96xf32, #tpu.memory_space<vmem>>, vector<1x96xf32>
    %340 = vector.broadcast %339 : vector<1x96xf32> to vector<64x96xf32>
    %341 = arith.addf %338, %340 : vector<64x96xf32>
    %c64 = arith.constant 64 : index
    %c0_232 = arith.constant 0 : index
    %342 = vector.load %arg22[%c64, %c0_232] : memref<128x96xf32, #tpu.memory_space<vmem>>, vector<64x96xf32>
    tpu.vector_store %arg22[%c64, %c0_232], %341 {strides = array<i32>} : memref<128x96xf32, #tpu.memory_space<vmem>>, vector<64x96xf32>,
    %c0_233 = arith.constant 0 : index
    %c0_234 = arith.constant 0 : index
    %343 = vector.load %arg11[%c0_233, %c0_234] : memref<32x96xf32, #tpu.memory_space<vmem>>, vector<32x96xf32>
    %c0_235 = arith.constant 0 : index
    %c0_236 = arith.constant 0 : index
    %344 = vector.load %arg12[%c0_235, %c0_236] : memref<1x96xf32, #tpu.memory_space<vmem>>, vector<1x96xf32>
    %cst_237 = arith.constant 0.000000e+00 : f32
    %345 = vector.broadcast %cst_237 : f32 to vector<2x32xf32>
    %c0_i32 = arith.constant 0 : i32
    %c8_i32_238 = arith.constant 8 : i32
    %346 = arith.addi %c0_i32, %c8_i32_238 : i32
    %c1_i32_239 = arith.constant 1 : i32
    %347 = scf.for %arg24 = %c0_i32 to %346 step %c1_i32_239 iter_args(%arg25 = %345) -> (vector<2x32xf32>)  : i32 {
      %c8_i32_279 = arith.constant 8 : i32
      %395 = arith.muli %arg24, %c8_i32_279 : i32
      %c0_i32_280 = arith.constant 0 : i32
      %396 = arith.addi %c0_i32_280, %395 : i32
      %397 = tpu.assume_multiple %396, 8 : i32
      %398 = arith.index_cast %397 : i32 to index
      %c0_281 = arith.constant 0 : index
      %399 = vector.load %arg22[%398, %c0_281] : memref<128x96xf32, #tpu.memory_space<vmem>>, vector<8x96xf32>
      %c8_i32_282 = arith.constant 8 : i32
      %400 = arith.muli %arg24, %c8_i32_282 : i32
      %c64_i32 = arith.constant 64 : i32
      %401 = arith.addi %c64_i32, %400 : i32
      %402 = tpu.assume_multiple %401, 8 : i32
      %403 = arith.index_cast %402 : i32 to index
      %c0_283 = arith.constant 0 : index
      %404 = vector.load %arg22[%403, %c0_283] : memref<128x96xf32, #tpu.memory_space<vmem>>, vector<8x96xf32>
      %405 = vector.extract_strided_slice %399 {offsets = [0, 0], sizes = [1, 96], strides = [1, 1]} : vector<8x96xf32> to vector<1x96xf32>
      %406 = vector.extract_strided_slice %404 {offsets = [0, 0], sizes = [1, 96], strides = [1, 1]} : vector<8x96xf32> to vector<1x96xf32>
      %407 = tpu.concatenate %405, %406 in 0 : vector<1x96xf32>, vector<1x96xf32> -> vector<2x96xf32>
      %cst_284 = arith.constant dense<0.000000e+00> : vector<2x96xf32>
      %408 = tpu.matmul %arg25, %343, %cst_284 {dimension_numbers = #tpu.dot_dimension_numbers<[1], [0], [0], [1], [0, 0, 1, 1], [], []>} : vector<2x32xf32>, vector<32x96xf32>, vector<2x96xf32> -> vector<2x96xf32>
      %409 = vector.broadcast %344 : vector<1x96xf32> to vector<2x96xf32>
      %410 = arith.addf %408, %409 : vector<2x96xf32>
      %411 = vector.extract_strided_slice %407 {offsets = [0, 0], sizes = [2, 64], strides = [1, 1]} : vector<2x96xf32> to vector<2x64xf32>
      %412 = vector.extract_strided_slice %410 {offsets = [0, 0], sizes = [2, 64], strides = [1, 1]} : vector<2x96xf32> to vector<2x64xf32>
      %413 = arith.addf %411, %412 : vector<2x64xf32>
      %414 = arith.negf %413 : vector<2x64xf32>
      %415 = math.exp %414 : vector<2x64xf32>
      %cst_285 = arith.constant 1.000000e+00 : f32
      %416 = vector.broadcast %cst_285 : f32 to vector<2x64xf32>
      %417 = arith.addf %416, %415 : vector<2x64xf32>
      %418 = arith.divf %416, %417 : vector<2x64xf32>
      %419 = vector.extract_strided_slice %418 {offsets = [0, 0], sizes = [2, 32], strides = [1, 1]} : vector<2x64xf32> to vector<2x32xf32>
      %420 = vector.extract_strided_slice %418 {offsets = [0, 32], sizes = [2, 32], strides = [1, 1]} : vector<2x64xf32> to vector<2x32xf32>
      %421 = vector.extract_strided_slice %407 {offsets = [0, 64], sizes = [2, 32], strides = [1, 1]} : vector<2x96xf32> to vector<2x32xf32>
      %422 = vector.extract_strided_slice %410 {offsets = [0, 64], sizes = [2, 32], strides = [1, 1]} : vector<2x96xf32> to vector<2x32xf32>
      %423 = arith.mulf %419, %422 : vector<2x32xf32>
      %424 = arith.addf %421, %423 : vector<2x32xf32>
      %425 = math.tanh %424 : vector<2x32xf32>
      %cst_286 = arith.constant 1.000000e+00 : f32
      %426 = vector.broadcast %cst_286 : f32 to vector<2x32xf32>
      %427 = arith.subf %426, %420 : vector<2x32xf32>
      %428 = arith.mulf %427, %425 : vector<2x32xf32>
      %429 = arith.mulf %420, %arg25 : vector<2x32xf32>
      %430 = arith.addf %428, %429 : vector<2x32xf32>
      %431 = vector.extract_strided_slice %399 {offsets = [1, 0], sizes = [1, 96], strides = [1, 1]} : vector<8x96xf32> to vector<1x96xf32>
      %432 = vector.extract_strided_slice %404 {offsets = [1, 0], sizes = [1, 96], strides = [1, 1]} : vector<8x96xf32> to vector<1x96xf32>
      %433 = tpu.concatenate %431, %432 in 0 : vector<1x96xf32>, vector<1x96xf32> -> vector<2x96xf32>
      %cst_287 = arith.constant dense<0.000000e+00> : vector<2x96xf32>
      %434 = tpu.matmul %430, %343, %cst_287 {dimension_numbers = #tpu.dot_dimension_numbers<[1], [0], [0], [1], [0, 0, 1, 1], [], []>} : vector<2x32xf32>, vector<32x96xf32>, vector<2x96xf32> -> vector<2x96xf32>
      %435 = vector.broadcast %344 : vector<1x96xf32> to vector<2x96xf32>
      %436 = arith.addf %434, %435 : vector<2x96xf32>
      %437 = vector.extract_strided_slice %433 {offsets = [0, 0], sizes = [2, 64], strides = [1, 1]} : vector<2x96xf32> to vector<2x64xf32>
      %438 = vector.extract_strided_slice %436 {offsets = [0, 0], sizes = [2, 64], strides = [1, 1]} : vector<2x96xf32> to vector<2x64xf32>
      %439 = arith.addf %437, %438 : vector<2x64xf32>
      %440 = arith.negf %439 : vector<2x64xf32>
      %441 = math.exp %440 : vector<2x64xf32>
      %cst_288 = arith.constant 1.000000e+00 : f32
      %442 = vector.broadcast %cst_288 : f32 to vector<2x64xf32>
      %443 = arith.addf %442, %441 : vector<2x64xf32>
      %444 = arith.divf %442, %443 : vector<2x64xf32>
      %445 = vector.extract_strided_slice %444 {offsets = [0, 0], sizes = [2, 32], strides = [1, 1]} : vector<2x64xf32> to vector<2x32xf32>
      %446 = vector.extract_strided_slice %444 {offsets = [0, 32], sizes = [2, 32], strides = [1, 1]} : vector<2x64xf32> to vector<2x32xf32>
      %447 = vector.extract_strided_slice %433 {offsets = [0, 64], sizes = [2, 32], strides = [1, 1]} : vector<2x96xf32> to vector<2x32xf32>
      %448 = vector.extract_strided_slice %436 {offsets = [0, 64], sizes = [2, 32], strides = [1, 1]} : vector<2x96xf32> to vector<2x32xf32>
      %449 = arith.mulf %445, %448 : vector<2x32xf32>
      %450 = arith.addf %447, %449 : vector<2x32xf32>
      %451 = math.tanh %450 : vector<2x32xf32>
      %cst_289 = arith.constant 1.000000e+00 : f32
      %452 = vector.broadcast %cst_289 : f32 to vector<2x32xf32>
      %453 = arith.subf %452, %446 : vector<2x32xf32>
      %454 = arith.mulf %453, %451 : vector<2x32xf32>
      %455 = arith.mulf %446, %430 : vector<2x32xf32>
      %456 = arith.addf %454, %455 : vector<2x32xf32>
      %457 = vector.extract_strided_slice %399 {offsets = [2, 0], sizes = [1, 96], strides = [1, 1]} : vector<8x96xf32> to vector<1x96xf32>
      %458 = vector.extract_strided_slice %404 {offsets = [2, 0], sizes = [1, 96], strides = [1, 1]} : vector<8x96xf32> to vector<1x96xf32>
      %459 = tpu.concatenate %457, %458 in 0 : vector<1x96xf32>, vector<1x96xf32> -> vector<2x96xf32>
      %cst_290 = arith.constant dense<0.000000e+00> : vector<2x96xf32>
      %460 = tpu.matmul %456, %343, %cst_290 {dimension_numbers = #tpu.dot_dimension_numbers<[1], [0], [0], [1], [0, 0, 1, 1], [], []>} : vector<2x32xf32>, vector<32x96xf32>, vector<2x96xf32> -> vector<2x96xf32>
      %461 = vector.broadcast %344 : vector<1x96xf32> to vector<2x96xf32>
      %462 = arith.addf %460, %461 : vector<2x96xf32>
      %463 = vector.extract_strided_slice %459 {offsets = [0, 0], sizes = [2, 64], strides = [1, 1]} : vector<2x96xf32> to vector<2x64xf32>
      %464 = vector.extract_strided_slice %462 {offsets = [0, 0], sizes = [2, 64], strides = [1, 1]} : vector<2x96xf32> to vector<2x64xf32>
      %465 = arith.addf %463, %464 : vector<2x64xf32>
      %466 = arith.negf %465 : vector<2x64xf32>
      %467 = math.exp %466 : vector<2x64xf32>
      %cst_291 = arith.constant 1.000000e+00 : f32
      %468 = vector.broadcast %cst_291 : f32 to vector<2x64xf32>
      %469 = arith.addf %468, %467 : vector<2x64xf32>
      %470 = arith.divf %468, %469 : vector<2x64xf32>
      %471 = vector.extract_strided_slice %470 {offsets = [0, 0], sizes = [2, 32], strides = [1, 1]} : vector<2x64xf32> to vector<2x32xf32>
      %472 = vector.extract_strided_slice %470 {offsets = [0, 32], sizes = [2, 32], strides = [1, 1]} : vector<2x64xf32> to vector<2x32xf32>
      %473 = vector.extract_strided_slice %459 {offsets = [0, 64], sizes = [2, 32], strides = [1, 1]} : vector<2x96xf32> to vector<2x32xf32>
      %474 = vector.extract_strided_slice %462 {offsets = [0, 64], sizes = [2, 32], strides = [1, 1]} : vector<2x96xf32> to vector<2x32xf32>
      %475 = arith.mulf %471, %474 : vector<2x32xf32>
      %476 = arith.addf %473, %475 : vector<2x32xf32>
      %477 = math.tanh %476 : vector<2x32xf32>
      %cst_292 = arith.constant 1.000000e+00 : f32
      %478 = vector.broadcast %cst_292 : f32 to vector<2x32xf32>
      %479 = arith.subf %478, %472 : vector<2x32xf32>
      %480 = arith.mulf %479, %477 : vector<2x32xf32>
      %481 = arith.mulf %472, %456 : vector<2x32xf32>
      %482 = arith.addf %480, %481 : vector<2x32xf32>
      %483 = vector.extract_strided_slice %399 {offsets = [3, 0], sizes = [1, 96], strides = [1, 1]} : vector<8x96xf32> to vector<1x96xf32>
      %484 = vector.extract_strided_slice %404 {offsets = [3, 0], sizes = [1, 96], strides = [1, 1]} : vector<8x96xf32> to vector<1x96xf32>
      %485 = tpu.concatenate %483, %484 in 0 : vector<1x96xf32>, vector<1x96xf32> -> vector<2x96xf32>
      %cst_293 = arith.constant dense<0.000000e+00> : vector<2x96xf32>
      %486 = tpu.matmul %482, %343, %cst_293 {dimension_numbers = #tpu.dot_dimension_numbers<[1], [0], [0], [1], [0, 0, 1, 1], [], []>} : vector<2x32xf32>, vector<32x96xf32>, vector<2x96xf32> -> vector<2x96xf32>
      %487 = vector.broadcast %344 : vector<1x96xf32> to vector<2x96xf32>
      %488 = arith.addf %486, %487 : vector<2x96xf32>
      %489 = vector.extract_strided_slice %485 {offsets = [0, 0], sizes = [2, 64], strides = [1, 1]} : vector<2x96xf32> to vector<2x64xf32>
      %490 = vector.extract_strided_slice %488 {offsets = [0, 0], sizes = [2, 64], strides = [1, 1]} : vector<2x96xf32> to vector<2x64xf32>
      %491 = arith.addf %489, %490 : vector<2x64xf32>
      %492 = arith.negf %491 : vector<2x64xf32>
      %493 = math.exp %492 : vector<2x64xf32>
      %cst_294 = arith.constant 1.000000e+00 : f32
      %494 = vector.broadcast %cst_294 : f32 to vector<2x64xf32>
      %495 = arith.addf %494, %493 : vector<2x64xf32>
      %496 = arith.divf %494, %495 : vector<2x64xf32>
      %497 = vector.extract_strided_slice %496 {offsets = [0, 0], sizes = [2, 32], strides = [1, 1]} : vector<2x64xf32> to vector<2x32xf32>
      %498 = vector.extract_strided_slice %496 {offsets = [0, 32], sizes = [2, 32], strides = [1, 1]} : vector<2x64xf32> to vector<2x32xf32>
      %499 = vector.extract_strided_slice %485 {offsets = [0, 64], sizes = [2, 32], strides = [1, 1]} : vector<2x96xf32> to vector<2x32xf32>
      %500 = vector.extract_strided_slice %488 {offsets = [0, 64], sizes = [2, 32], strides = [1, 1]} : vector<2x96xf32> to vector<2x32xf32>
      %501 = arith.mulf %497, %500 : vector<2x32xf32>
      %502 = arith.addf %499, %501 : vector<2x32xf32>
      %503 = math.tanh %502 : vector<2x32xf32>
      %cst_295 = arith.constant 1.000000e+00 : f32
      %504 = vector.broadcast %cst_295 : f32 to vector<2x32xf32>
      %505 = arith.subf %504, %498 : vector<2x32xf32>
      %506 = arith.mulf %505, %503 : vector<2x32xf32>
      %507 = arith.mulf %498, %482 : vector<2x32xf32>
      %508 = arith.addf %506, %507 : vector<2x32xf32>
      %509 = vector.extract_strided_slice %399 {offsets = [4, 0], sizes = [1, 96], strides = [1, 1]} : vector<8x96xf32> to vector<1x96xf32>
      %510 = vector.extract_strided_slice %404 {offsets = [4, 0], sizes = [1, 96], strides = [1, 1]} : vector<8x96xf32> to vector<1x96xf32>
      %511 = tpu.concatenate %509, %510 in 0 : vector<1x96xf32>, vector<1x96xf32> -> vector<2x96xf32>
      %cst_296 = arith.constant dense<0.000000e+00> : vector<2x96xf32>
      %512 = tpu.matmul %508, %343, %cst_296 {dimension_numbers = #tpu.dot_dimension_numbers<[1], [0], [0], [1], [0, 0, 1, 1], [], []>} : vector<2x32xf32>, vector<32x96xf32>, vector<2x96xf32> -> vector<2x96xf32>
      %513 = vector.broadcast %344 : vector<1x96xf32> to vector<2x96xf32>
      %514 = arith.addf %512, %513 : vector<2x96xf32>
      %515 = vector.extract_strided_slice %511 {offsets = [0, 0], sizes = [2, 64], strides = [1, 1]} : vector<2x96xf32> to vector<2x64xf32>
      %516 = vector.extract_strided_slice %514 {offsets = [0, 0], sizes = [2, 64], strides = [1, 1]} : vector<2x96xf32> to vector<2x64xf32>
      %517 = arith.addf %515, %516 : vector<2x64xf32>
      %518 = arith.negf %517 : vector<2x64xf32>
      %519 = math.exp %518 : vector<2x64xf32>
      %cst_297 = arith.constant 1.000000e+00 : f32
      %520 = vector.broadcast %cst_297 : f32 to vector<2x64xf32>
      %521 = arith.addf %520, %519 : vector<2x64xf32>
      %522 = arith.divf %520, %521 : vector<2x64xf32>
      %523 = vector.extract_strided_slice %522 {offsets = [0, 0], sizes = [2, 32], strides = [1, 1]} : vector<2x64xf32> to vector<2x32xf32>
      %524 = vector.extract_strided_slice %522 {offsets = [0, 32], sizes = [2, 32], strides = [1, 1]} : vector<2x64xf32> to vector<2x32xf32>
      %525 = vector.extract_strided_slice %511 {offsets = [0, 64], sizes = [2, 32], strides = [1, 1]} : vector<2x96xf32> to vector<2x32xf32>
      %526 = vector.extract_strided_slice %514 {offsets = [0, 64], sizes = [2, 32], strides = [1, 1]} : vector<2x96xf32> to vector<2x32xf32>
      %527 = arith.mulf %523, %526 : vector<2x32xf32>
      %528 = arith.addf %525, %527 : vector<2x32xf32>
      %529 = math.tanh %528 : vector<2x32xf32>
      %cst_298 = arith.constant 1.000000e+00 : f32
      %530 = vector.broadcast %cst_298 : f32 to vector<2x32xf32>
      %531 = arith.subf %530, %524 : vector<2x32xf32>
      %532 = arith.mulf %531, %529 : vector<2x32xf32>
      %533 = arith.mulf %524, %508 : vector<2x32xf32>
      %534 = arith.addf %532, %533 : vector<2x32xf32>
      %535 = vector.extract_strided_slice %399 {offsets = [5, 0], sizes = [1, 96], strides = [1, 1]} : vector<8x96xf32> to vector<1x96xf32>
      %536 = vector.extract_strided_slice %404 {offsets = [5, 0], sizes = [1, 96], strides = [1, 1]} : vector<8x96xf32> to vector<1x96xf32>
      %537 = tpu.concatenate %535, %536 in 0 : vector<1x96xf32>, vector<1x96xf32> -> vector<2x96xf32>
      %cst_299 = arith.constant dense<0.000000e+00> : vector<2x96xf32>
      %538 = tpu.matmul %534, %343, %cst_299 {dimension_numbers = #tpu.dot_dimension_numbers<[1], [0], [0], [1], [0, 0, 1, 1], [], []>} : vector<2x32xf32>, vector<32x96xf32>, vector<2x96xf32> -> vector<2x96xf32>
      %539 = vector.broadcast %344 : vector<1x96xf32> to vector<2x96xf32>
      %540 = arith.addf %538, %539 : vector<2x96xf32>
      %541 = vector.extract_strided_slice %537 {offsets = [0, 0], sizes = [2, 64], strides = [1, 1]} : vector<2x96xf32> to vector<2x64xf32>
      %542 = vector.extract_strided_slice %540 {offsets = [0, 0], sizes = [2, 64], strides = [1, 1]} : vector<2x96xf32> to vector<2x64xf32>
      %543 = arith.addf %541, %542 : vector<2x64xf32>
      %544 = arith.negf %543 : vector<2x64xf32>
      %545 = math.exp %544 : vector<2x64xf32>
      %cst_300 = arith.constant 1.000000e+00 : f32
      %546 = vector.broadcast %cst_300 : f32 to vector<2x64xf32>
      %547 = arith.addf %546, %545 : vector<2x64xf32>
      %548 = arith.divf %546, %547 : vector<2x64xf32>
      %549 = vector.extract_strided_slice %548 {offsets = [0, 0], sizes = [2, 32], strides = [1, 1]} : vector<2x64xf32> to vector<2x32xf32>
      %550 = vector.extract_strided_slice %548 {offsets = [0, 32], sizes = [2, 32], strides = [1, 1]} : vector<2x64xf32> to vector<2x32xf32>
      %551 = vector.extract_strided_slice %537 {offsets = [0, 64], sizes = [2, 32], strides = [1, 1]} : vector<2x96xf32> to vector<2x32xf32>
      %552 = vector.extract_strided_slice %540 {offsets = [0, 64], sizes = [2, 32], strides = [1, 1]} : vector<2x96xf32> to vector<2x32xf32>
      %553 = arith.mulf %549, %552 : vector<2x32xf32>
      %554 = arith.addf %551, %553 : vector<2x32xf32>
      %555 = math.tanh %554 : vector<2x32xf32>
      %cst_301 = arith.constant 1.000000e+00 : f32
      %556 = vector.broadcast %cst_301 : f32 to vector<2x32xf32>
      %557 = arith.subf %556, %550 : vector<2x32xf32>
      %558 = arith.mulf %557, %555 : vector<2x32xf32>
      %559 = arith.mulf %550, %534 : vector<2x32xf32>
      %560 = arith.addf %558, %559 : vector<2x32xf32>
      %561 = vector.extract_strided_slice %399 {offsets = [6, 0], sizes = [1, 96], strides = [1, 1]} : vector<8x96xf32> to vector<1x96xf32>
      %562 = vector.extract_strided_slice %404 {offsets = [6, 0], sizes = [1, 96], strides = [1, 1]} : vector<8x96xf32> to vector<1x96xf32>
      %563 = tpu.concatenate %561, %562 in 0 : vector<1x96xf32>, vector<1x96xf32> -> vector<2x96xf32>
      %cst_302 = arith.constant dense<0.000000e+00> : vector<2x96xf32>
      %564 = tpu.matmul %560, %343, %cst_302 {dimension_numbers = #tpu.dot_dimension_numbers<[1], [0], [0], [1], [0, 0, 1, 1], [], []>} : vector<2x32xf32>, vector<32x96xf32>, vector<2x96xf32> -> vector<2x96xf32>
      %565 = vector.broadcast %344 : vector<1x96xf32> to vector<2x96xf32>
      %566 = arith.addf %564, %565 : vector<2x96xf32>
      %567 = vector.extract_strided_slice %563 {offsets = [0, 0], sizes = [2, 64], strides = [1, 1]} : vector<2x96xf32> to vector<2x64xf32>
      %568 = vector.extract_strided_slice %566 {offsets = [0, 0], sizes = [2, 64], strides = [1, 1]} : vector<2x96xf32> to vector<2x64xf32>
      %569 = arith.addf %567, %568 : vector<2x64xf32>
      %570 = arith.negf %569 : vector<2x64xf32>
      %571 = math.exp %570 : vector<2x64xf32>
      %cst_303 = arith.constant 1.000000e+00 : f32
      %572 = vector.broadcast %cst_303 : f32 to vector<2x64xf32>
      %573 = arith.addf %572, %571 : vector<2x64xf32>
      %574 = arith.divf %572, %573 : vector<2x64xf32>
      %575 = vector.extract_strided_slice %574 {offsets = [0, 0], sizes = [2, 32], strides = [1, 1]} : vector<2x64xf32> to vector<2x32xf32>
      %576 = vector.extract_strided_slice %574 {offsets = [0, 32], sizes = [2, 32], strides = [1, 1]} : vector<2x64xf32> to vector<2x32xf32>
      %577 = vector.extract_strided_slice %563 {offsets = [0, 64], sizes = [2, 32], strides = [1, 1]} : vector<2x96xf32> to vector<2x32xf32>
      %578 = vector.extract_strided_slice %566 {offsets = [0, 64], sizes = [2, 32], strides = [1, 1]} : vector<2x96xf32> to vector<2x32xf32>
      %579 = arith.mulf %575, %578 : vector<2x32xf32>
      %580 = arith.addf %577, %579 : vector<2x32xf32>
      %581 = math.tanh %580 : vector<2x32xf32>
      %cst_304 = arith.constant 1.000000e+00 : f32
      %582 = vector.broadcast %cst_304 : f32 to vector<2x32xf32>
      %583 = arith.subf %582, %576 : vector<2x32xf32>
      %584 = arith.mulf %583, %581 : vector<2x32xf32>
      %585 = arith.mulf %576, %560 : vector<2x32xf32>
      %586 = arith.addf %584, %585 : vector<2x32xf32>
      %587 = vector.extract_strided_slice %399 {offsets = [7, 0], sizes = [1, 96], strides = [1, 1]} : vector<8x96xf32> to vector<1x96xf32>
      %588 = vector.extract_strided_slice %404 {offsets = [7, 0], sizes = [1, 96], strides = [1, 1]} : vector<8x96xf32> to vector<1x96xf32>
      %589 = tpu.concatenate %587, %588 in 0 : vector<1x96xf32>, vector<1x96xf32> -> vector<2x96xf32>
      %cst_305 = arith.constant dense<0.000000e+00> : vector<2x96xf32>
      %590 = tpu.matmul %586, %343, %cst_305 {dimension_numbers = #tpu.dot_dimension_numbers<[1], [0], [0], [1], [0, 0, 1, 1], [], []>} : vector<2x32xf32>, vector<32x96xf32>, vector<2x96xf32> -> vector<2x96xf32>
      %591 = vector.broadcast %344 : vector<1x96xf32> to vector<2x96xf32>
      %592 = arith.addf %590, %591 : vector<2x96xf32>
      %593 = vector.extract_strided_slice %589 {offsets = [0, 0], sizes = [2, 64], strides = [1, 1]} : vector<2x96xf32> to vector<2x64xf32>
      %594 = vector.extract_strided_slice %592 {offsets = [0, 0], sizes = [2, 64], strides = [1, 1]} : vector<2x96xf32> to vector<2x64xf32>
      %595 = arith.addf %593, %594 : vector<2x64xf32>
      %596 = arith.negf %595 : vector<2x64xf32>
      %597 = math.exp %596 : vector<2x64xf32>
      %cst_306 = arith.constant 1.000000e+00 : f32
      %598 = vector.broadcast %cst_306 : f32 to vector<2x64xf32>
      %599 = arith.addf %598, %597 : vector<2x64xf32>
      %600 = arith.divf %598, %599 : vector<2x64xf32>
      %601 = vector.extract_strided_slice %600 {offsets = [0, 0], sizes = [2, 32], strides = [1, 1]} : vector<2x64xf32> to vector<2x32xf32>
      %602 = vector.extract_strided_slice %600 {offsets = [0, 32], sizes = [2, 32], strides = [1, 1]} : vector<2x64xf32> to vector<2x32xf32>
      %603 = vector.extract_strided_slice %589 {offsets = [0, 64], sizes = [2, 32], strides = [1, 1]} : vector<2x96xf32> to vector<2x32xf32>
      %604 = vector.extract_strided_slice %592 {offsets = [0, 64], sizes = [2, 32], strides = [1, 1]} : vector<2x96xf32> to vector<2x32xf32>
      %605 = arith.mulf %601, %604 : vector<2x32xf32>
      %606 = arith.addf %603, %605 : vector<2x32xf32>
      %607 = math.tanh %606 : vector<2x32xf32>
      %cst_307 = arith.constant 1.000000e+00 : f32
      %608 = vector.broadcast %cst_307 : f32 to vector<2x32xf32>
      %609 = arith.subf %608, %602 : vector<2x32xf32>
      %610 = arith.mulf %609, %607 : vector<2x32xf32>
      %611 = arith.mulf %602, %586 : vector<2x32xf32>
      %612 = arith.addf %610, %611 : vector<2x32xf32>
      %613 = vector.extract_strided_slice %430 {offsets = [0, 0], sizes = [1, 32], strides = [1, 1]} : vector<2x32xf32> to vector<1x32xf32>
      %614 = vector.extract_strided_slice %456 {offsets = [0, 0], sizes = [1, 32], strides = [1, 1]} : vector<2x32xf32> to vector<1x32xf32>
      %615 = vector.extract_strided_slice %482 {offsets = [0, 0], sizes = [1, 32], strides = [1, 1]} : vector<2x32xf32> to vector<1x32xf32>
      %616 = vector.extract_strided_slice %508 {offsets = [0, 0], sizes = [1, 32], strides = [1, 1]} : vector<2x32xf32> to vector<1x32xf32>
      %617 = vector.extract_strided_slice %534 {offsets = [0, 0], sizes = [1, 32], strides = [1, 1]} : vector<2x32xf32> to vector<1x32xf32>
      %618 = vector.extract_strided_slice %560 {offsets = [0, 0], sizes = [1, 32], strides = [1, 1]} : vector<2x32xf32> to vector<1x32xf32>
      %619 = vector.extract_strided_slice %586 {offsets = [0, 0], sizes = [1, 32], strides = [1, 1]} : vector<2x32xf32> to vector<1x32xf32>
      %620 = vector.extract_strided_slice %612 {offsets = [0, 0], sizes = [1, 32], strides = [1, 1]} : vector<2x32xf32> to vector<1x32xf32>
      %621 = tpu.concatenate %613, %614, %615, %616, %617, %618, %619, %620 in 0 : vector<1x32xf32>, vector<1x32xf32>, vector<1x32xf32>, vector<1x32xf32>, vector<1x32xf32>, vector<1x32xf32>, vector<1x32xf32>, vector<1x32xf32> -> vector<8x32xf32>
      %c8_i32_308 = arith.constant 8 : i32
      %622 = arith.muli %arg24, %c8_i32_308 : i32
      %c0_i32_309 = arith.constant 0 : i32
      %623 = arith.addi %c0_i32_309, %622 : i32
      %624 = tpu.assume_multiple %623, 8 : i32
      %625 = arith.index_cast %624 : i32 to index
      %c0_310 = arith.constant 0 : index
      %626 = vector.load %arg23[%625, %c0_310] : memref<128x32xf32, #tpu.memory_space<vmem>>, vector<8x32xf32>
      tpu.vector_store %arg23[%625, %c0_310], %621 {strides = array<i32>} : memref<128x32xf32, #tpu.memory_space<vmem>>, vector<8x32xf32>,
      %627 = vector.extract_strided_slice %430 {offsets = [1, 0], sizes = [1, 32], strides = [1, 1]} : vector<2x32xf32> to vector<1x32xf32>
      %628 = vector.extract_strided_slice %456 {offsets = [1, 0], sizes = [1, 32], strides = [1, 1]} : vector<2x32xf32> to vector<1x32xf32>
      %629 = vector.extract_strided_slice %482 {offsets = [1, 0], sizes = [1, 32], strides = [1, 1]} : vector<2x32xf32> to vector<1x32xf32>
      %630 = vector.extract_strided_slice %508 {offsets = [1, 0], sizes = [1, 32], strides = [1, 1]} : vector<2x32xf32> to vector<1x32xf32>
      %631 = vector.extract_strided_slice %534 {offsets = [1, 0], sizes = [1, 32], strides = [1, 1]} : vector<2x32xf32> to vector<1x32xf32>
      %632 = vector.extract_strided_slice %560 {offsets = [1, 0], sizes = [1, 32], strides = [1, 1]} : vector<2x32xf32> to vector<1x32xf32>
      %633 = vector.extract_strided_slice %586 {offsets = [1, 0], sizes = [1, 32], strides = [1, 1]} : vector<2x32xf32> to vector<1x32xf32>
      %634 = vector.extract_strided_slice %612 {offsets = [1, 0], sizes = [1, 32], strides = [1, 1]} : vector<2x32xf32> to vector<1x32xf32>
      %635 = tpu.concatenate %627, %628, %629, %630, %631, %632, %633, %634 in 0 : vector<1x32xf32>, vector<1x32xf32>, vector<1x32xf32>, vector<1x32xf32>, vector<1x32xf32>, vector<1x32xf32>, vector<1x32xf32>, vector<1x32xf32> -> vector<8x32xf32>
      %c8_i32_311 = arith.constant 8 : i32
      %636 = arith.muli %arg24, %c8_i32_311 : i32
      %c64_i32_312 = arith.constant 64 : i32
      %637 = arith.addi %c64_i32_312, %636 : i32
      %638 = tpu.assume_multiple %637, 8 : i32
      %639 = arith.index_cast %638 : i32 to index
      %c0_313 = arith.constant 0 : index
      %640 = vector.load %arg23[%639, %c0_313] : memref<128x32xf32, #tpu.memory_space<vmem>>, vector<8x32xf32>
      tpu.vector_store %arg23[%639, %c0_313], %635 {strides = array<i32>} : memref<128x32xf32, #tpu.memory_space<vmem>>, vector<8x32xf32>,
      scf.yield %612 : vector<2x32xf32>
    }
    %c8_i32_240 = arith.constant 8 : i32
    %c0_241 = arith.constant 0 : index
    %c0_242 = arith.constant 0 : index
    %348 = vector.load %arg15[%c0_241, %c0_242] : memref<32x128xbf16, #tpu.memory_space<vmem>>, vector<32x128xbf16>
    %c0_243 = arith.constant 0 : index
    %c0_244 = arith.constant 0 : index
    %349 = vector.load %arg16[%c0_243, %c0_244] : memref<1x128xf32, #tpu.memory_space<vmem>>, vector<1x128xf32>
    %c0_245 = arith.constant 0 : index
    %c0_246 = arith.constant 0 : index
    %350 = vector.load %arg18[%c0_245, %c0_246] : memref<128x128xbf16, #tpu.memory_space<vmem>>, vector<128x128xbf16>
    %c0_247 = arith.constant 0 : index
    %c0_248 = arith.constant 0 : index
    %c0_249 = arith.constant 0 : index
    %351 = vector.load %arg2[%c0_247, %c0_248, %c0_249] : memref<2x64x1xf32, #tpu.memory_space<vmem>>, vector<1x64x1xf32>
    %352 = vector.shape_cast %351 : vector<1x64x1xf32> to vector<64x1xf32>
    %353 = vector.shape_cast %352 : vector<64x1xf32> to vector<64x1xf32>
    %354 = vector.broadcast %353 : vector<64x1xf32> to vector<64x128xf32>
    %c0_250 = arith.constant 0 : index
    %c0_251 = arith.constant 0 : index
    %355 = vector.load %arg23[%c0_250, %c0_251] : memref<128x32xf32, #tpu.memory_space<vmem>>, vector<64x32xf32>
    %356 = arith.truncf %355 : vector<64x32xf32> to vector<64x32xbf16>
    %cst_252 = arith.constant dense<0.000000e+00> : vector<64x128xf32>
    %357 = tpu.matmul %356, %348, %cst_252 {dimension_numbers = #tpu.dot_dimension_numbers<[1], [0], [0], [1], [0, 0, 1, 1], [], []>} : vector<64x32xbf16>, vector<32x128xbf16>, vector<64x128xf32> -> vector<64x128xf32>
    %358 = vector.broadcast %349 : vector<1x128xf32> to vector<64x128xf32>
    %359 = arith.addf %357, %358 : vector<64x128xf32>
    %360 = arith.mulf %359, %354 : vector<64x128xf32>
    %c0_253 = arith.constant 0 : index
    %c0_254 = arith.constant 0 : index
    %c0_255 = arith.constant 0 : index
    %361 = vector.load %arg21[%c0_253, %c0_254, %c0_255] : memref<2x64x128xf32, #tpu.memory_space<vmem>>, vector<1x64x128xf32>
    %362 = vector.shape_cast %361 : vector<1x64x128xf32> to vector<64x128xf32>
    %363 = vector.shape_cast %360 : vector<64x128xf32> to vector<1x64x128xf32>
    tpu.vector_store %arg21[%c0_253, %c0_254, %c0_255], %363 {strides = array<i32>} : memref<2x64x128xf32, #tpu.memory_space<vmem>>, vector<1x64x128xf32>,
    %c0_256 = arith.constant 0 : index
    %c0_257 = arith.constant 0 : index
    %c0_258 = arith.constant 0 : index
    %364 = vector.load %arg20[%c0_256, %c0_257, %c0_258] : memref<2x64x128xf32, #tpu.memory_space<vmem>>, vector<1x64x128xf32>
    %365 = vector.shape_cast %364 : vector<1x64x128xf32> to vector<64x128xf32>
    %366 = arith.truncf %360 : vector<64x128xf32> to vector<64x128xbf16>
    %cst_259 = arith.constant dense<0.000000e+00> : vector<64x128xf32>
    %367 = tpu.matmul %366, %350, %cst_259 {dimension_numbers = #tpu.dot_dimension_numbers<[1], [0], [0], [1], [0, 0, 1, 1], [], []>} : vector<64x128xbf16>, vector<128x128xbf16>, vector<64x128xf32> -> vector<64x128xf32>
    %368 = arith.addf %365, %367 : vector<64x128xf32>
    %369 = arith.mulf %368, %354 : vector<64x128xf32>
    %c0_260 = arith.constant 0 : index
    %c0_261 = arith.constant 0 : index
    %c0_262 = arith.constant 0 : index
    %370 = vector.load %arg20[%c0_260, %c0_261, %c0_262] : memref<2x64x128xf32, #tpu.memory_space<vmem>>, vector<1x64x128xf32>
    %371 = vector.shape_cast %370 : vector<1x64x128xf32> to vector<64x128xf32>
    %372 = vector.shape_cast %369 : vector<64x128xf32> to vector<1x64x128xf32>
    tpu.vector_store %arg20[%c0_260, %c0_261, %c0_262], %372 {strides = array<i32>} : memref<2x64x128xf32, #tpu.memory_space<vmem>>, vector<1x64x128xf32>,
    %c1_263 = arith.constant 1 : index
    %c0_264 = arith.constant 0 : index
    %c0_265 = arith.constant 0 : index
    %373 = vector.load %arg2[%c1_263, %c0_264, %c0_265] : memref<2x64x1xf32, #tpu.memory_space<vmem>>, vector<1x64x1xf32>
    %374 = vector.shape_cast %373 : vector<1x64x1xf32> to vector<64x1xf32>
    %375 = vector.shape_cast %374 : vector<64x1xf32> to vector<64x1xf32>
    %376 = vector.broadcast %375 : vector<64x1xf32> to vector<64x128xf32>
    %c64_266 = arith.constant 64 : index
    %c0_267 = arith.constant 0 : index
    %377 = vector.load %arg23[%c64_266, %c0_267] : memref<128x32xf32, #tpu.memory_space<vmem>>, vector<64x32xf32>
    %378 = arith.truncf %377 : vector<64x32xf32> to vector<64x32xbf16>
    %cst_268 = arith.constant dense<0.000000e+00> : vector<64x128xf32>
    %379 = tpu.matmul %378, %348, %cst_268 {dimension_numbers = #tpu.dot_dimension_numbers<[1], [0], [0], [1], [0, 0, 1, 1], [], []>} : vector<64x32xbf16>, vector<32x128xbf16>, vector<64x128xf32> -> vector<64x128xf32>
    %380 = vector.broadcast %349 : vector<1x128xf32> to vector<64x128xf32>
    %381 = arith.addf %379, %380 : vector<64x128xf32>
    %382 = arith.mulf %381, %376 : vector<64x128xf32>
    %c1_269 = arith.constant 1 : index
    %c0_270 = arith.constant 0 : index
    %c0_271 = arith.constant 0 : index
    %383 = vector.load %arg21[%c1_269, %c0_270, %c0_271] : memref<2x64x128xf32, #tpu.memory_space<vmem>>, vector<1x64x128xf32>
    %384 = vector.shape_cast %383 : vector<1x64x128xf32> to vector<64x128xf32>
    %385 = vector.shape_cast %382 : vector<64x128xf32> to vector<1x64x128xf32>
    tpu.vector_store %arg21[%c1_269, %c0_270, %c0_271], %385 {strides = array<i32>} : memref<2x64x128xf32, #tpu.memory_space<vmem>>, vector<1x64x128xf32>,
    %c1_272 = arith.constant 1 : index
    %c0_273 = arith.constant 0 : index
    %c0_274 = arith.constant 0 : index
    %386 = vector.load %arg20[%c1_272, %c0_273, %c0_274] : memref<2x64x128xf32, #tpu.memory_space<vmem>>, vector<1x64x128xf32>
    %387 = vector.shape_cast %386 : vector<1x64x128xf32> to vector<64x128xf32>
    %388 = arith.truncf %382 : vector<64x128xf32> to vector<64x128xbf16>
    %cst_275 = arith.constant dense<0.000000e+00> : vector<64x128xf32>
    %389 = tpu.matmul %388, %350, %cst_275 {dimension_numbers = #tpu.dot_dimension_numbers<[1], [0], [0], [1], [0, 0, 1, 1], [], []>} : vector<64x128xbf16>, vector<128x128xbf16>, vector<64x128xf32> -> vector<64x128xf32>
    %390 = arith.addf %387, %389 : vector<64x128xf32>
    %391 = arith.mulf %390, %376 : vector<64x128xf32>
    %c1_276 = arith.constant 1 : index
    %c0_277 = arith.constant 0 : index
    %c0_278 = arith.constant 0 : index
    %392 = vector.load %arg20[%c1_276, %c0_277, %c0_278] : memref<2x64x128xf32, #tpu.memory_space<vmem>>, vector<1x64x128xf32>
    %393 = vector.shape_cast %392 : vector<1x64x128xf32> to vector<64x128xf32>
    %394 = vector.shape_cast %391 : vector<64x128xf32> to vector<1x64x128xf32>
    tpu.vector_store %arg20[%c1_276, %c0_277, %c0_278], %394 {strides = array<i32>} : memref<2x64x128xf32, #tpu.memory_space<vmem>>, vector<1x64x128xf32>,
    return
  }
  func.func @transform_0(%arg0: i32) -> (i32, i32, i32) {
    %c0_i32 = arith.constant 0 : i32
    %c0_i32_0 = arith.constant 0 : i32
    %c0_i32_1 = arith.constant 0 : i32
    return %arg0, %c0_i32, %c0_i32_0 : i32, i32, i32
  }
  func.func @transform_1(%arg0: i32) -> (i32, i32, i32) {
    %c0_i32 = arith.constant 0 : i32
    %c0_i32_0 = arith.constant 0 : i32
    %c0_i32_1 = arith.constant 0 : i32
    return %arg0, %c0_i32, %c0_i32_0 : i32, i32, i32
  }
  func.func @transform_2(%arg0: i32) -> (i32, i32) {
    %c0_i32 = arith.constant 0 : i32
    %c0_i32_0 = arith.constant 0 : i32
    %c0_i32_1 = arith.constant 0 : i32
    return %c0_i32, %c0_i32_0 : i32, i32
  }
  func.func @transform_3(%arg0: i32) -> (i32, i32) {
    %c0_i32 = arith.constant 0 : i32
    %c0_i32_0 = arith.constant 0 : i32
    %c0_i32_1 = arith.constant 0 : i32
    return %c0_i32, %c0_i32_0 : i32, i32
  }
  func.func @transform_4(%arg0: i32) -> (i32, i32, i32, i32) {
    %c0_i32 = arith.constant 0 : i32
    %c0_i32_0 = arith.constant 0 : i32
    %c0_i32_1 = arith.constant 0 : i32
    %c0_i32_2 = arith.constant 0 : i32
    %c0_i32_3 = arith.constant 0 : i32
    return %c0_i32, %c0_i32_0, %c0_i32_1, %c0_i32_2 : i32, i32, i32, i32
  }
  func.func @transform_5(%arg0: i32) -> (i32, i32, i32) {
    %c0_i32 = arith.constant 0 : i32
    %c0_i32_0 = arith.constant 0 : i32
    %c0_i32_1 = arith.constant 0 : i32
    %c0_i32_2 = arith.constant 0 : i32
    return %c0_i32, %c0_i32_0, %c0_i32_1 : i32, i32, i32
  }
  func.func @transform_6(%arg0: i32) -> (i32, i32, i32) {
    %c0_i32 = arith.constant 0 : i32
    %c0_i32_0 = arith.constant 0 : i32
    %c0_i32_1 = arith.constant 0 : i32
    %c0_i32_2 = arith.constant 0 : i32
    return %c0_i32, %c0_i32_0, %c0_i32_1 : i32, i32, i32
  }
  func.func @transform_7(%arg0: i32) -> (i32, i32, i32) {
    %c0_i32 = arith.constant 0 : i32
    %c0_i32_0 = arith.constant 0 : i32
    %c0_i32_1 = arith.constant 0 : i32
    %c0_i32_2 = arith.constant 0 : i32
    return %c0_i32, %c0_i32_0, %c0_i32_1 : i32, i32, i32
  }
  func.func @transform_8(%arg0: i32) -> (i32, i32) {
    %c0_i32 = arith.constant 0 : i32
    %c0_i32_0 = arith.constant 0 : i32
    %c0_i32_1 = arith.constant 0 : i32
    return %c0_i32, %c0_i32_0 : i32, i32
  }
  func.func @transform_9(%arg0: i32) -> (i32, i32) {
    %c0_i32 = arith.constant 0 : i32
    %c0_i32_0 = arith.constant 0 : i32
    %c0_i32_1 = arith.constant 0 : i32
    return %c0_i32, %c0_i32_0 : i32, i32
  }
  func.func @transform_10(%arg0: i32) -> (i32, i32) {
    %c0_i32 = arith.constant 0 : i32
    %c0_i32_0 = arith.constant 0 : i32
    %c0_i32_1 = arith.constant 0 : i32
    return %c0_i32, %c0_i32_0 : i32, i32
  }
  func.func @transform_11(%arg0: i32) -> (i32, i32) {
    %c0_i32 = arith.constant 0 : i32
    %c0_i32_0 = arith.constant 0 : i32
    %c0_i32_1 = arith.constant 0 : i32
    return %c0_i32, %c0_i32_0 : i32, i32
  }
  func.func @transform_12(%arg0: i32) -> (i32, i32) {
    %c0_i32 = arith.constant 0 : i32
    %c0_i32_0 = arith.constant 0 : i32
    %c0_i32_1 = arith.constant 0 : i32
    return %c0_i32, %c0_i32_0 : i32, i32
  }
  func.func @transform_13(%arg0: i32) -> (i32, i32) {
    %c0_i32 = arith.constant 0 : i32
    %c0_i32_0 = arith.constant 0 : i32
    %c0_i32_1 = arith.constant 0 : i32
    return %c0_i32, %c0_i32_0 : i32, i32
  }
  func.func @transform_14(%arg0: i32) -> (i32, i32) {
    %c0_i32 = arith.constant 0 : i32
    %c0_i32_0 = arith.constant 0 : i32
    %c0_i32_1 = arith.constant 0 : i32
    return %c0_i32, %c0_i32_0 : i32, i32
  }
  func.func @transform_15(%arg0: i32) -> (i32, i32) {
    %c0_i32 = arith.constant 0 : i32
    %c0_i32_0 = arith.constant 0 : i32
    %c0_i32_1 = arith.constant 0 : i32
    return %c0_i32, %c0_i32_0 : i32, i32
  }
  func.func @transform_16(%arg0: i32) -> (i32, i32) {
    %c0_i32 = arith.constant 0 : i32
    %c0_i32_0 = arith.constant 0 : i32
    %c0_i32_1 = arith.constant 0 : i32
    return %c0_i32, %c0_i32_0 : i32, i32
  }
  func.func @transform_17(%arg0: i32) -> (i32, i32) {
    %c0_i32 = arith.constant 0 : i32
    %c0_i32_0 = arith.constant 0 : i32
    %c0_i32_1 = arith.constant 0 : i32
    return %c0_i32, %c0_i32_0 : i32, i32
  }
  func.func @transform_18(%arg0: i32) -> (i32, i32) {
    %c0_i32 = arith.constant 0 : i32
    %c0_i32_0 = arith.constant 0 : i32
    %c0_i32_1 = arith.constant 0 : i32
    return %c0_i32, %c0_i32_0 : i32, i32
  }
  func.func @transform_19(%arg0: i32) -> (i32, i32, i32) {
    %c0_i32 = arith.constant 0 : i32
    %c0_i32_0 = arith.constant 0 : i32
    %c0_i32_1 = arith.constant 0 : i32
    return %arg0, %c0_i32, %c0_i32_0 : i32, i32, i32
  }
  func.func @transform_20(%arg0: i32) -> (i32, i32, i32) {
    %c0_i32 = arith.constant 0 : i32
    %c0_i32_0 = arith.constant 0 : i32
    %c0_i32_1 = arith.constant 0 : i32
    return %arg0, %c0_i32, %c0_i32_0 : i32, i32, i32
  }
}

</mosaic_0001>

<bundles_post_ra>
// kernel: tpu_custom_call.1
= control target key start
LH: loop header
LB: loop body
LE: loop exit
PB: predicated region body
PF: predicated region fallthrough
CT: control target
= control target key end

     0   :  { %s9050_s0 = inlined_call_operand.vmem [shape: f32[2,64,8], index: 0, kind: input, shape index: {}]   ;;  %s9051_s1 = inlined_call_operand.vmem [shape: f32[2,64,1], index: 1, kind: input, shape index: {}]   ;;  %s9052_s2 = inlined_call_operand.hbm [shape: bf16[8,32], index: 2, kind: input, shape index: {}]   ;;  %s9053_s3 = inlined_call_operand.hbm [shape: f32[1,32], index: 3, kind: input, shape index: {}]   ;;  %s9054_s4 = inlined_call_operand.vmem [shape: bf16[3,3,32,32], index: 4, kind: input, shape index: {}]   ;;  %s9055_s5 = inlined_call_operand.hbm [shape: f32[3,1,32], index: 5, kind: input, shape index: {}]   ;;  %s9056_s6 = inlined_call_operand.hbm [shape: bf16[3,32,32], index: 6, kind: input, shape index: {}]   ;;  %s9057_s7 = inlined_call_operand.hbm [shape: f32[3,1,32], index: 7, kind: input, shape index: {}]   ;;  %s9058_s8 = inlined_call_operand.vmem [shape: bf16[32,96], index: 8, kind: input, shape index: {}]   ;;  %s9059_s9 = inlined_call_operand.hbm [shape: f32[1,96], index: 9, kind: input, shape index: {}]   ;;  %s9060_s10 = inlined_call_operand.hbm [shape: f32[32,96], index: 10, kind: input, shape index: {}]   ;;  %s9061_s11 = inlined_call_operand.vmem [shape: f32[1,96], index: 11, kind: input, shape index: {}]   ;;  %s9062_s12 = inlined_call_operand.hbm [shape: bf16[32,128], index: 12, kind: input, shape index: {}]   ;;  %s9063_s13 = inlined_call_operand.vmem [shape: f32[1,128], index: 13, kind: input, shape index: {}]   ;;  %s9064_s14 = inlined_call_operand.hbm [shape: bf16[32,128], index: 14, kind: input, shape index: {}]   ;;  %s9065_s15 = inlined_call_operand.vmem [shape: f32[1,128], index: 15, kind: input, shape index: {}]   ;;  %s9066_s16 = inlined_call_operand.vmem [shape: bf16[128,128], index: 16, kind: input, shape index: {}]   ;;  %s9067_s17 = inlined_call_operand.vmem [shape: bf16[128,128], index: 17, kind: input, shape index: {}]   ;;  %s9068_s18 = inlined_call_operand.vmem [shape: f32[1,128], index: 18, kind: input, shape index: {}]   ;;  %s9069_s19 = inlined_call_operand.hbm [shape: f32[2,64,128], index: 19, kind: output, shape index: {0}]   ;;  %s9070_s20 = inlined_call_operand.hbm [shape: f32[2,64,128], index: 20, kind: output, shape index: {1}]  }
   0x1   :  { %9075 = sst [smem:[#allocation29_spill]] %s9050_s0 }
   0x2   :  { %9076 = sst [smem:[#allocation30_spill]] %s9051_s1 }
   0x3   :  { %9077 = sst [smem:[#allocation31_spill]] %s9052_s2 }
   0x4   :  { %9078 = sst [smem:[#allocation32_spill]] %s9053_s3 }
   0x5   :  { %9079 = sst [smem:[#allocation33_spill]] %s9054_s4 }
   0x6   :  { %26 = vsyncpa [#allocation5], 0 }
   0x7   :  { %27 = vsyncpa [#allocation8], 0 }
   0x8   :  { %28 = vsyncpa [#allocation11], 0 }
   0x9   :  { %29 = vsyncpa [#allocation14], 0 }
   0xa   :  { %30 = vsyncpa [#allocation17], 0 }
   0xb   :  { %31 = vsyncpa [#allocation6], 0 }
   0xc   :  { %32 = vsyncpa [#allocation21], 0  ;;  %s7438_s1 = smov [#allocation7]   ;;  %s7439_s23 = smov [#allocation10]  }
   0xd   :  { %s53_s22 = sshll.u32 %s7438_s1, 4  ;;  %s76_s24 = sshll.u32 %s7439_s23, 4  ;;  %s54_s22 = int_to_ptr.vmem [resolvable:$true] %s53_s22  ;;  %s77_s24 = int_to_ptr.vmem [resolvable:$true] %s76_s24 }
   0xe   :  { %s7196_s2 = scalar_lea.vmem %s54_s22, 16  ;;  %s7200_s25 = scalar_lea.vmem %s54_s22, 32 }
   0xf   :  { %p7197_p0 = scmp.ne.s32.totalorder %s54_s22, %s7196_s2  ;;  %p7201_p1 = scmp.lt.s32.totalorder %s54_s22, %s54_s22 }
  0x10   :  { %p7202_p2 = scmp.lt.s32.totalorder %s7200_s25, %s7196_s2 }
  0x12   :  { %p7203_p3 = por %p7202_p2, %p7201_p1 }
  0x14   :  { %p7204_p4 = pnand %p7203_p3, %p7197_p0 }
  0x16   :  { %7207 = shalt.err (!%p7204_p4)
}
  0x17   :  { %s9080_s27 = sld [smem:[#allocation32_spill]]  ;;  %s7216_s28 = scalar_lea.vmem %s77_s24, 768 }
  0x18   :  { %p7217_p5 = scmp.ne.s32.totalorder %s77_s24, %s7216_s28  ;;  %p7221_p6 = scmp.lt.s32.totalorder %s77_s24, %s77_s24 }
  0x19   :  { %p7222_p7 = scmp.lt.s32.totalorder %s7216_s28, %s7216_s28 }
  0x1b   :  { %p7223_p8 = por %p7222_p7, %p7221_p6 }
  0x1d   :  { %56 = dma.hbm_to_vmem [thread:$0]  %s9080_s27, 16, %s54_s22, [#allocation8]  }
  0x1e   :  { %p7224_p9 = pnand %p7223_p8, %p7217_p5 }
  0x20   :  { %7227 = shalt.err (!%p7224_p9)
}
  0x21   :  { %s7440_s4 = smov 64   ;;  %s7441_s29 = smov 4  }
  0x22   :  { %82 = dma.hbm_to_vmem [thread:$0]  %s9056_s6, 768, %s77_s24, [#allocation11], %s7440_s4, %s7440_s4, %s7441_s29  }
  0x23   :  { %s7442_s21 = smov [#allocation13]   ;;  %s7443_s23 = smov [#allocation16]  }
  0x24   :  { %s103_s1 = sshll.u32 %s7442_s21, 4  ;;  %s126_s22 = sshll.u32 %s7443_s23, 4  ;;  %s104_s1 = int_to_ptr.vmem [resolvable:$true] %s103_s1  ;;  %s127_s22 = int_to_ptr.vmem [resolvable:$true] %s126_s22 }
  0x25   :  { %s7236_s2 = scalar_lea.vmem %s104_s1, 16  ;;  %s7240_s25 = scalar_lea.vmem %s104_s1, 32 }
  0x26   :  { %p7237_p10 = scmp.ne.s32.totalorder %s104_s1, %s7236_s2  ;;  %p7241_p11 = scmp.lt.s32.totalorder %s104_s1, %s104_s1 }
  0x27   :  { %p7242_p12 = scmp.lt.s32.totalorder %s7240_s25, %s7236_s2 }
  0x29   :  { %p7243_p13 = por %p7242_p12, %p7241_p11 }
  0x2b   :  { %p7244_p0 = pnand %p7243_p13, %p7237_p10 }
  0x2d   :  { %7247 = shalt.err (!%p7244_p0)
}
  0x2e   :  { %106 = dma.hbm_to_vmem [thread:$0]  %s9059_s9, 16, %s104_s1, [#allocation14]  }
  0x2f   :  { %s7256_s27 = scalar_lea.vmem %s127_s22, 256  ;;  %p7261_p2 = scmp.lt.s32.totalorder %s127_s22, %s127_s22 }
  0x30   :  { %p7257_p1 = scmp.ne.s32.totalorder %s127_s22, %s7256_s27  ;;  %p7262_p3 = scmp.lt.s32.totalorder %s7256_s27, %s7256_s27 }
  0x32   :  { %p7263_p4 = por %p7262_p3, %p7261_p2 }
  0x34   :  { %p7264_p5 = pnand %p7263_p4, %p7257_p1 }
  0x36   :  { %7267 = shalt.err (!%p7264_p5)
}
  0x37   :  { %132 = dma.hbm_to_vmem [thread:$0]  %s9062_s12, 256, %s127_s22, [#allocation17], %s7440_s4, %s7440_s4, %s7441_s29  }
  0x38   :  { %s7444_s28 = smov [#allocation4]   ;;  %s7445_s0 = smov [#allocation9]  }
  0x39   :  { %s43_s30 = sshll.u32 %s7444_s28, 4  ;;  %s64_s21 = sshll.u32 %s7445_s0, 4  ;;  %s44_s30 = int_to_ptr.vmem [resolvable:$true] %s43_s30  ;;  %s65_s21 = int_to_ptr.vmem [resolvable:$true] %s64_s21 }
  0x3a   :  { %s7276_s9 = scalar_lea.vmem %s44_s30, 64  ;;  %p7281_p7 = scmp.lt.s32.totalorder %s44_s30, %s44_s30 }
  0x3b   :  { %p7277_p6 = scmp.ne.s32.totalorder %s44_s30, %s7276_s9  ;;  %p7282_p8 = scmp.lt.s32.totalorder %s7276_s9, %s7276_s9 }
  0x3d   :  { %p7283_p9 = por %p7282_p8, %p7281_p7 }
  0x3f   :  { %p7284_p10 = pnand %p7283_p9, %p7277_p6 }
  0x41   :  { %7287 = shalt.err (!%p7284_p10)
}
  0x42   :  { %s9081_s2 = sld [smem:[#allocation31_spill]]  ;;  %s7296_s25 = scalar_lea.vmem %s65_s21, 48 }
  0x43   :  { %p7297_p11 = scmp.ne.s32.totalorder %s65_s21, %s7296_s25  ;;  %s7300_s12 = scalar_lea.vmem %s65_s21, 64 }
  0x44   :  { %p7301_p12 = scmp.lt.s32.totalorder %s65_s21, %s65_s21  ;;  %p7302_p13 = scmp.lt.s32.totalorder %s7300_s12, %s7296_s25 }
  0x46   :  { %p7303_p0 = por %p7302_p13, %p7301_p12 }
  0x48   :  { %46 = dma.hbm_to_vmem [thread:$0]  %s9081_s2, 64, %s44_s30, [#allocation5]  }
  0x49   :  { %p7304_p1 = pnand %p7303_p0, %p7297_p11 }
  0x4b   :  { %7307 = shalt.err (!%p7304_p1)
}
  0x4c   :  { %s7446_s22 = smov 16   ;;  %s7447_s3 = smov 1  }
  0x4d   :  { %70 = dma.hbm_to_vmem [thread:$0]  %s9055_s5, 48, %s65_s21, [#allocation8], %s7446_s22, %s7446_s22, %s7447_s3  }
  0x4e   :  { %s7448_s6 = smov [#allocation12]   ;;  %s7449_s28 = smov [#allocation15]  }
  0x4f   :  { %s88_s24 = sshll.u32 %s7448_s6, 4  ;;  %s112_s0 = sshll.u32 %s7449_s28, 4  ;;  %s89_s24 = int_to_ptr.vmem [resolvable:$true] %s88_s24  ;;  %s113_s0 = int_to_ptr.vmem [resolvable:$true] %s112_s0 }
  0x50   :  { %s7316_s30 = scalar_lea.vmem %s89_s24, 48  ;;  %s7320_s9 = scalar_lea.vmem %s89_s24, 64 }
  0x51   :  { %p7317_p2 = scmp.ne.s32.totalorder %s89_s24, %s7316_s30  ;;  %p7321_p3 = scmp.lt.s32.totalorder %s89_s24, %s89_s24 }
  0x52   :  { %p7322_p4 = scmp.lt.s32.totalorder %s7320_s9, %s7316_s30 }
  0x54   :  { %p7323_p5 = por %p7322_p4, %p7321_p3 }
  0x56   :  { %p7324_p6 = pnand %p7323_p5, %p7317_p2 }
  0x58   :  { %7327 = shalt.err (!%p7324_p6)
}
  0x59   :  { %94 = dma.hbm_to_vmem [thread:$0]  %s9057_s7, 48, %s89_s24, [#allocation11], %s7446_s22, %s7446_s22, %s7447_s3  }
  0x5a   :  { %s7336_s2 = scalar_lea.vmem %s113_s0, 512  ;;  %p7341_p8 = scmp.lt.s32.totalorder %s113_s0, %s113_s0 }
  0x5b   :  { %p7337_p7 = scmp.ne.s32.totalorder %s113_s0, %s7336_s2  ;;  %p7342_p9 = scmp.lt.s32.totalorder %s7336_s2, %s7336_s2 }
  0x5d   :  { %p7343_p10 = por %p7342_p9, %p7341_p8 }
  0x5f   :  { %p7344_p11 = pnand %p7343_p10, %p7337_p7 }
  0x61   :  { %7347 = shalt.err (!%p7344_p11)
}
  0x62   :  { %s7450_s5 = smov 128   ;;  %s7451_s21 = smov 8  }
  0x63   :  { %118 = dma.hbm_to_vmem [thread:$0]  %s9060_s10, 512, %s113_s0, [#allocation14], %s7450_s5, %s7450_s5, %s7451_s21  }
  0x64   :  { %s7452_s26 = smov [#allocation18]  }
  0x65   :  { %s140_s27 = sshll.u32 %s7452_s26, 4  ;;  %s141_s27 = int_to_ptr.vmem [resolvable:$true] %s140_s27 }
  0x66   :  { %s7356_s7 = scalar_lea.vmem %s141_s27, 256  ;;  %p7361_p13 = scmp.lt.s32.totalorder %s141_s27, %s141_s27 }
  0x67   :  { %p7357_p12 = scmp.ne.s32.totalorder %s141_s27, %s7356_s7  ;;  %p7362_p0 = scmp.lt.s32.totalorder %s7356_s7, %s7356_s7 }
  0x69   :  { %p7363_p1 = por %p7362_p0, %p7361_p13 }
  0x6b   :  { %p7364_p2 = pnand %p7363_p1, %p7357_p12 }
  0x6d   :  { %7367 = shalt.err (!%p7364_p2)
}
  0x6e   :  { %146 = dma.hbm_to_vmem [thread:$0]  %s9064_s14, 256, %s141_s27, [#allocation17], %s7440_s4, %s7440_s4, %s7441_s29  }
  0x6f   :  { %7416 = dma.done.wait [#allocation5], 64  }
  0x70   :  { %7417 = vsyncadd [#allocation5], 4294967232 }
  0x71   :  { %7418 = dma.done.wait [#allocation8], 64  }
  0x72   :  { %7419 = vsyncadd [#allocation8], 4294967232 }
  0x73   :  { %7420 = dma.done.wait [#allocation11], 816  }
  0x74   :  { %7421 = vsyncadd [#allocation11], 4294966480 }
  0x75   :  { %7422 = dma.done.wait [#allocation14], 528  }
  0x76   :  { %7423 = vsyncadd [#allocation14], 4294966768 }
  0x77   :  { %7424 = dma.done.wait [#allocation17], 512  }
  0x78   :  { %7425 = vsyncadd [#allocation17], 4294966784  ;;  %vm273_vm0 = vcmask 1043456   ;;  %v7604_v0 = vld [vmem:[#allocation15] sm:$0xff]  ;;  %v7606_v1 = vld [vmem:[#allocation15 + $0x8] sm:$0xff]  ;;  %s9082_s6 = sld [smem:[#allocation29_spill]]  ;;  %v183_v25 = vlaneseq }
  0x79   :  { %v7608_v2 = vld [vmem:[#allocation15 + $0x10] sm:$0xff]  ;;  %v7610_v3 = vld [vmem:[#allocation15 + $0x18] sm:$0xff]  ;;  %v7615_v4 = vld [vmem:[%s9061_s11] ss:$0 sm:$0xff]  ;;  %vm260_vm1 = vcmask 64512   ;;  %s9083_s10 = sld [smem:[#allocation33_spill]] }
  0x7a   :  { %v252_v5 = vld [vmem:[#allocation4] sm:$0xf]  ;;  %v5831_v28 = vld [vmem:[#allocation7] ss:$0 sm:$0xff]  ;;  %v7665_v29 = vshrl.u32 %v183_v25, 7  ;;  %vm471_vm4 = vcmask 261120  }
  0x7b   :  { %7014 = vmatprep.subr.msk.bf16.mxu0 %vm273_vm0, %v252_v5  ;;  %v275_v6 = vsel %vm273_vm0, %v252_v5, 0  ;;  %s9084_s25 = sld [smem:[#allocation30_spill]]  ;;  %vm2267_vm6 = vcmask 785408  }
  0x7c   :  { %6451 = vmatpush3.bf16.msra.mxu0 %v275_v6  ;;  %v7676_v36 = vsub.s32 0, %v7665_v29  ;;  %vm402_vm2 = vcmp.lt.s32.totalorder %v7665_v29, 2  ;;  %vm354_vm3 = vcmp.lt.s32.totalorder %v7665_v29, 1  ;;  %vm923_vm5 = vcmp.lt.s32.totalorder %v7665_v29, 4 }
  0x7e   :  { %v192_v7 = vld [vmem:[%s9082_s6] sm:$0xff]  ;;  %v193_v8 = vld [vmem:[%s9082_s6 + $0x8] sm:$0xff]  ;;  %v194_v9 = vld [vmem:[%s9082_s6 + $0x10] sm:$0xff] }
  0x7f   :  { %v248_v10 = vpack.c.bf16 %v193_v8, %v192_v7  ;;  %v195_v11 = vld [vmem:[%s9082_s6 + $0x18] sm:$0xff]  ;;  %v196_v12 = vld [vmem:[%s9082_s6 + $0x20] sm:$0xff]  ;;  %v197_v13 = vld [vmem:[%s9082_s6 + $0x28] sm:$0xff] }
  0x80   :  { %v249_v14 = vpack.c.bf16 %v195_v11, %v194_v9  ;;  %v250_v15 = vpack.c.bf16 %v197_v13, %v196_v12  ;;  %v198_v16 = vld [vmem:[%s9082_s6 + $0x30] sm:$0xff]  ;;  %v199_v17 = vld [vmem:[%s9082_s6 + $0x38] sm:$0xff]  ;;  %v7057_v20 = vld [vmem:[%s9083_s10 + $0x8] sm:$0xff]  }
  0x81   :  { %6452 = vmatprep.mubr.msk.bf16.mxu0 %vm260_vm1, %v248_v10  ;;  %v251_v18 = vpack.c.bf16 %v199_v17, %v198_v16  ;;  %v7056_v19 = vld [vmem:[%s9083_s10 + $0x18] sm:$0xff]   ;;  %6472 = vmatprep.subr.bf16.mxu0 %v7057_v20  ;;  %v7058_v21 = vld [vmem:[%s9083_s10 + $0x10] sm:$0xff]   ;;  %v7059_v22 = vld [vmem:[%s9083_s10] sm:$0xff]  }
  0x82   :  { %6453 = vmatmul.mubr.msk.bf16.vlgmr.msra.gmra.mxu0 %vm260_vm1, %v249_v14  ;;  %6460 = vmatprep.subr.bf16.mxu1 %v7056_v19  ;;  %v7662_v23 = vld [vmem:[%s9083_s10 + $0x28] sm:$0xff]  }
  0x83   :  { %6456 = vmatprep.mubr.msk.bf16.mxu0 %vm260_vm1, %v250_v15  ;;  %6461 = vmatpush3.bf16.msra.mxu1 %v7056_v19 }
  0x84   :  { %6473 = vmatpush3.bf16.msra.mxu0 %v7057_v20  ;;  %6462 = vmatprep.subr.bf16.mxu1 %v7058_v21  ;;  %v7061_v20 = vld [vmem:[%s9083_s10 + $0x20] sm:$0xff]  }
  0x85   :  { %6474 = vmatprep.subr.bf16.mxu0 %v7059_v22 }
  0x87   :  { %6463 = vmatpush3.bf16.msra.mxu1 %v7058_v21 }
  0x88   :  { %6475 = vmatpush3.bf16.msra.mxu0 %v7059_v22  ;;  %6484 = vmatprep.subr.bf16.mxu1 %v7662_v23 }
  0x8a   :  { %6457 = vmatmul.mubr.msk.bf16.gmra.mxu0 %vm260_vm1, %v251_v18 }
 0x142   :  { %v6454_v24 = vpop.f32.mrf.mxu0 }
 0x143   :  { %v7669_v32 = vadd.f32 %v6454_v24, %v5831_v28 }
 0x144   :  { %v311_v26 = vpop.f32.mrf.mxu0 }
 0x145   :  { %v7673_v35 = vadd.f32 %v5831_v28, %v311_v26  ;;  %v348_v41 = vrot.slane %v7669_v32, 7  ;;  %v396_v42 = vrot.slane %v7669_v32, 6 }
 0x146   :  { %v6455_v27 = vpop.f32.mrf.mxu0 }
 0x147   :  { %v7667_v30 = vadd.f32 %v6455_v27, %v5831_v28  ;;  %v345_v47 = vrot.slane %v7673_v35, %v7676_v36  ;;  %v346_v48 = vrot.slane %v7673_v35, 7  ;;  %v394_v49 = vrot.slane %v7673_v35, 6 }
 0x148   :  { %v314_v31 = vpop.f32.mrf.mxu0 }
 0x149   :  { %v7671_v33 = vadd.f32 %v5831_v28, %v314_v31  ;;  %v397_v37 = vrot.slane %v7667_v30, 6  ;;  %v349_v39 = vrot.slane %v7667_v30, 7 }
 0x14a   :  { %v6458_v34 = vpop.f32.mrf.mxu0 }
 0x14b   :  { %v395_v43 = vrot.slane %v7671_v33, 6  ;;  %v347_v45 = vrot.slane %v7671_v33, 7  ;;  %v407_v50 = vsel %vm402_vm2, %v396_v42, %v397_v37  ;;  %v7696_v51 = vadd.f32 %v6458_v34, %v5831_v28 }
 0x14c   :  { %v327_v38 = vpop.f32.mrf.mxu0  ;;  %v359_v58 = vsel %vm354_vm3, %v348_v41, %v349_v39  ;;  %v638_v31 = vpack.c.bf16 %v7671_v33, %v7673_v35  ;;  %v639_v34 = vpack.c.bf16 %v7667_v30, %v7669_v32 }
 0x14d   :  { %v7681_v40 = vadd.f32 %v5831_v28, %v327_v38  ;;  %v408_v59 = vsel %vm402_vm2, %v395_v43, %v396_v42  ;;  %v361_v60 = vsel %vm354_vm3, %v346_v48, %v347_v45  ;;  %v409_v61 = vsel %vm402_vm2, %v394_v49, %v395_v43  ;;  %v200_v42 = vld [vmem:[%s9084_s25] sm:$0xff]  ;;  %v201_v43 = vld [vmem:[%s9084_s25 + $0x8] sm:$0xff] }
 0x14e   :  { %v6459_v44 = vpop.f32.mrf.mxu0  ;;  %v360_v62 = vsel %vm354_vm3, %v347_v45, %v348_v41  ;;  %v443_v16 = vpack.c.bf16 %v407_v50, %v408_v59  ;;  %v352_v21 = vrot.slane %v7696_v51, 7  ;;  %v400_v22 = vrot.slane %v7696_v51, 6  ;;  %v7063_v41 = vld [vmem:[#allocation10] sm:$0xff]   ;;  %v207_v45 = vld [vmem:[%s9084_s25 + $0x38] sm:$0xff]  ;;  %v5981_v59 = vld [vmem:[%s9084_s25 + $0x60] sm:$0xff] }
 0x14f   :  { %v7688_v46 = vadd.f32 %v6459_v44, %v5831_v28  ;;  %v350_v52 = vrot.slane %v7681_v40, 7  ;;  %v398_v53 = vrot.slane %v7681_v40, 6  ;;  %v451_v17 = vpack.c.bf16 %v359_v58, %v360_v62  ;;  %v205_v50 = vld [vmem:[%s9084_s25 + $0x28] sm:$0xff]  ;;  %v5980_v58 = vld [vmem:[%s9084_s25 + $0x58] sm:$0xff] }
 0x150   :  { %v330_v54 = vpop.f32.mrf.mxu0  ;;  %v7453_v44 = vmov 0  }
 0x151   :  { %v353_v55 = vrot.slane %v7688_v46, 7  ;;  %v401_v56 = vrot.slane %v7688_v46, 6  ;;  %v7702_v57 = vadd.f32 %v5831_v28, %v330_v54  ;;  %v358_v10 = vsel %vm354_vm3, %v349_v39, %v350_v52  ;;  %v7062_v39 = vld [vmem:[#allocation10 + $0x8] sm:$0xff]   ;;  %7054 = vset.pattern.permute.xlu0 %v7453_v44  ;;  %7055 = vset.pattern.permute.xlu1 %v7453_v44 }
 0x152   :  { %v406_v11 = vsel %vm402_vm2, %v397_v37, %v398_v53  ;;  %v641_v38 = vpack.c.bf16 %v7688_v46, %v7696_v51  ;;  %6496 = vmatprep.subr.bf16.mxu0 %v7062_v39  ;;  %210 = vperm.xlu0 %7054, %v200_v42   ;;  %v5984_v54 = vld [vmem:[%s9084_s25 + $0x78] sm:$0xff] }
 0x153   :  { %v351_v63 = vrot.slane %v7702_v57, 7  ;;  %v399_v5 = vrot.slane %v7702_v57, 6  ;;  %v362_v6 = vsel %vm354_vm3, %v353_v55, %v346_v48  ;;  %v410_v7 = vsel %vm402_vm2, %v401_v56, %v394_v49  ;;  %215 = vperm.xlu1 %7055, %v201_v43   ;;  %v203_v48 = vld [vmem:[%s9084_s25 + $0x18] sm:$0xff]  ;;  %v204_v49 = vld [vmem:[%s9084_s25 + $0x20] sm:$0xff] }
 0x154   :  { %v386_v8 = vsel %vm354_vm3, %v345_v47, %v362_v6  ;;  %v434_v9 = vsel %vm402_vm2, %v345_v47, %v410_v7  ;;  %v355_v26 = vsel %vm354_vm3, %v352_v21, %v353_v55  ;;  %v403_v27 = vsel %vm402_vm2, %v400_v22, %v401_v56  ;;  %v202_v47 = vld [vmem:[%s9084_s25 + $0x10] sm:$0xff]  ;;  %v5978_v55 = vld [vmem:[%s9084_s25 + $0x48] sm:$0xff] }
 0x155   :  { %v450_v12 = vpack.c.bf16 %v361_v60, %v386_v8  ;;  %v442_v13 = vpack.c.bf16 %v409_v61, %v434_v9  ;;  %v357_v14 = vsel %vm354_vm3, %v350_v52, %v351_v63  ;;  %v405_v15 = vsel %vm402_vm2, %v398_v53, %v399_v5  ;;  %v206_v52 = vld [vmem:[%s9084_s25 + $0x30] sm:$0xff]  ;;  %v5977_v53 = vld [vmem:[%s9084_s25 + $0x40] sm:$0xff]  ;;  %v5982_v60 = vld [vmem:[%s9084_s25 + $0x68] sm:$0xff] }
 0x156   :  { %v452_v18 = vpack.c.bf16 %v357_v14, %v358_v10  ;;  %v444_v19 = vpack.c.bf16 %v405_v15, %v406_v11  ;;  %v356_v24 = vsel %vm354_vm3, %v351_v63, %v352_v21  ;;  %v404_v25 = vsel %vm402_vm2, %v399_v5, %v400_v22  ;;  %245 = vperm.xlu0 %7054, %v207_v45   ;;  %v5979_v56 = vld [vmem:[%s9084_s25 + $0x50] sm:$0xff] }
 0x157   :  { %6464 = vmatprep.mubr.msk.bf16.mxu1 %vm471_vm4, %v450_v12  ;;  %6476 = vmatprep.mubr.msk.bf16.mxu0 %vm471_vm4, %v442_v13  ;;  %v453_v28 = vpack.c.bf16 %v355_v26, %v356_v24  ;;  %v640_v37 = vpack.c.bf16 %v7702_v57, %v7681_v40  ;;  %v5983_v61 = vld [vmem:[%s9084_s25 + $0x70] sm:$0xff] }
 0x158   :  { %6465 = vmatmul.mubr.msk.bf16.vlgmr.msra.gmra.mxu1 %vm471_vm4, %v451_v17  ;;  %6477 = vmatmul.mubr.msk.bf16.vlgmr.msra.gmra.mxu0 %vm471_vm4, %v443_v16 }
 0x159   :  { %6485 = vmatpush3.bf16.msra.mxu1 %v7662_v23  ;;  %6468 = vmatprep.mubr.msk.bf16.mxu1 %vm471_vm4, %v452_v18  ;;  %v445_v23 = vpack.c.bf16 %v403_v27, %v404_v25  ;;  %v5862_v27 = vld [vmem:[#allocation9] ss:$0 sm:$0xff] }
 0x15a   :  { %6480 = vmatprep.mubr.msk.bf16.mxu0 %vm471_vm4, %v444_v19  ;;  %6486 = vmatprep.subr.bf16.mxu1 %v7061_v20 }
 0x15b   :  { %6497 = vmatpush3.bf16.msra.mxu0 %v7062_v39  ;;  %220 = vperm.xlu1 %7055, %v202_v47  }
 0x15c   :  { %6498 = vmatprep.subr.bf16.mxu0 %v7063_v41  ;;  %225 = vperm.xlu0 %7054, %v203_v48  }
 0x15d   :  { %6487 = vmatpush3.bf16.msra.mxu1 %v7061_v20 }
 0x15f   :  { %6499 = vmatpush3.bf16.msra.mxu0 %v7063_v41  ;;  %230 = vperm.xlu1 %7055, %v204_v49  }
 0x160   :  { %6469 = vmatmul.mubr.msk.bf16.gmra.mxu1 %vm471_vm4, %v453_v28  ;;  %6481 = vmatmul.mubr.msk.bf16.gmra.mxu0 %vm471_vm4, %v445_v23 }
 0x161   :  { %6488 = vmatprep.mubr.msk.bf16.mxu1 %vm471_vm4, %v638_v31  ;;  %235 = vperm.xlu0 %7054, %v205_v50  }
 0x163   :  { %240 = vperm.xlu1 %7055, %v206_v52  }
 0x165   :  { %2296 = vperm.xlu0 %7054, %v5977_v53  }
 0x167   :  { %2331 = vperm.xlu1 %7055, %v5984_v54  }
 0x168   :  { %6489 = vmatmul.mubr.msk.bf16.vlgmr.msra.gmra.mxu1 %vm471_vm4, %v639_v34 }
 0x169   :  { %6492 = vmatprep.mubr.msk.bf16.mxu1 %vm471_vm4, %v640_v37  ;;  %2301 = vperm.xlu0 %7054, %v5978_v55  }
 0x16b   :  { %2306 = vperm.xlu1 %7055, %v5979_v56  }
 0x16d   :  { %2311 = vperm.xlu0 %7054, %v5980_v58  }
 0x16f   :  { %2316 = vperm.xlu1 %7055, %v5981_v59  }
 0x170   :  { %6493 = vmatmul.mubr.msk.bf16.gmra.mxu1 %vm471_vm4, %v641_v38 }
 0x171   :  { %2321 = vperm.xlu0 %7054, %v5982_v60  }
 0x173   :  { %2326 = vperm.xlu1 %7055, %v5983_v61  }
 0x218   :  { %v6466_v62 = vpop.f32.mrf.mxu1  ;;  %v6478_v63 = vpop.f32.mrf.mxu0 }
 0x219   :  { %v616_v18 = vadd.f32 %v6478_v63, %v6466_v62 }
 0x21a   :  { %v518_v5 = vpop.f32.mrf.mxu1  ;;  %v607_v6 = vpop.f32.mrf.mxu0 }
 0x21b   :  { %v608_v17 = vadd.f32 %v607_v6, %v518_v5 }
 0x21c   :  { %v6467_v7 = vpop.f32.mrf.mxu1  ;;  %v6479_v8 = vpop.f32.mrf.mxu0 }
 0x21d   :  { %v619_v21 = vadd.f32 %v6479_v8, %v6467_v7 }
 0x21e   :  { %v521_v9 = vpop.f32.mrf.mxu1  ;;  %v610_v11 = vpop.f32.mrf.mxu0 }
 0x21f   :  { %v611_v26 = vadd.f32 %v610_v11, %v521_v9 }
 0x220   :  { %v6470_v10 = vpop.f32.mrf.mxu1  ;;  %v6482_v14 = vpop.f32.mrf.mxu0 }
 0x221   :  { %v632_v45 = vadd.f32 %v6482_v14, %v6470_v10 }
 0x222   :  { %v534_v12 = vpop.f32.mrf.mxu1  ;;  %v623_v19 = vpop.f32.mrf.mxu0 }
 0x223   :  { %v624_v42 = vadd.f32 %v623_v19, %v534_v12  ;;  %v7067_v19 = vld [vmem:[%s9083_s10 + $0x30] sm:$0xff]  }
 0x224   :  { %v6471_v13 = vpop.f32.mrf.mxu1  ;;  %v6483_v23 = vpop.f32.mrf.mxu0 }
 0x225   :  { %v635_v50 = vadd.f32 %v6483_v23, %v6471_v13 }
 0x226   :  { %v537_v15 = vpop.f32.mrf.mxu1  ;;  %v626_v47 = vpop.f32.mrf.mxu0 }
 0x227   :  { %v627_v59 = vadd.f32 %v626_v47, %v537_v15  ;;  %v7064_v15 = vld [vmem:[%s9083_s10 + $0x48] sm:$0xff]  }
 0x228   :  { %v6490_v16 = vpop.f32.mrf.mxu1  ;;  %6508 = vmatprep.subr.bf16.mxu1 %v7064_v15 }
 0x229   :  { %v738_v24 = vadd.f32 %v6490_v16, %v616_v18  ;;  %6509 = vmatpush3.bf16.msra.mxu1 %v7064_v15  ;;  %v7065_v18 = vld [vmem:[%s9083_s10 + $0x40] sm:$0xff]  }
 0x22a   :  { %v705_v20 = vpop.f32.mrf.mxu1  ;;  %6510 = vmatprep.subr.bf16.mxu1 %v7065_v18 }
 0x22b   :  { %v736_v22 = vadd.f32 %v705_v20, %v608_v17  ;;  %v753_v39 = vadd.f32 %v5862_v27, %v738_v24  ;;  %v7066_v17 = vld [vmem:[%s9083_s10 + $0x38] sm:$0xff]   ;;  %v7840_v24 = vpop.permute.xlu1 %215 }
 0x22c   :  { %v6491_v25 = vpop.f32.mrf.mxu1  ;;  %6520 = vmatprep.subr.bf16.mxu0 %v7066_v17  ;;  %v7835_v20 = vld [vmem:[%s9083_s10 + $0x58] sm:$0xff]  }
 0x22d   :  { %v739_v28 = vadd.f32 %v6491_v25, %v619_v21  ;;  %v751_v34 = vadd.f32 %v5862_v27, %v736_v22  ;;  %v761_v55 = vmax.f32 %v753_v39, 0.0  ;;  %6511 = vmatpush3.bf16.msra.mxu1 %v7065_v18  ;;  %v7838_v21 = vpop.permute.xlu0 %210  ;;  %v5863_v22 = vld [vmem:[#allocation12] ss:$0 sm:$0xff] }
 0x22e   :  { %v708_v31 = vpop.f32.mrf.mxu1  ;;  %6532 = vmatprep.subr.bf16.mxu1 %v7835_v20 }
 0x22f   :  { %v754_v37 = vadd.f32 %v5862_v27, %v739_v28  ;;  %v737_v38 = vadd.f32 %v708_v31, %v611_v26  ;;  %v759_v52 = vmax.f32 %v751_v34, 0.0 }
 0x230   :  { %v6494_v41 = vpop.f32.mrf.mxu1 }
 0x231   :  { %v752_v43 = vadd.f32 %v5862_v27, %v737_v38  ;;  %v762_v48 = vmax.f32 %v754_v37, 0.0  ;;  %v742_v56 = vadd.f32 %v6494_v41, %v632_v45  ;;  %v7842_v28 = vpop.permute.xlu0 %245  ;;  %v7844_v37 = vpop.permute.xlu1 %220 }
 0x232   :  { %v721_v49 = vpop.f32.mrf.mxu1 }
 0x233   :  { %v760_v53 = vmax.f32 %v752_v43, 0.0  ;;  %v740_v54 = vadd.f32 %v721_v49, %v624_v42  ;;  %v768_v62 = vpack.c.bf16 %v762_v48, %v761_v55  ;;  %v757_v8 = vadd.f32 %v5862_v27, %v742_v56 }
 0x234   :  { %v6495_v58 = vpop.f32.mrf.mxu1 }
 0x235   :  { %v767_v60 = vpack.c.bf16 %v760_v53, %v759_v52  ;;  %v743_v61 = vadd.f32 %v6495_v58, %v635_v50  ;;  %v755_v5 = vadd.f32 %v5862_v27, %v740_v54  ;;  %v765_v13 = vmax.f32 %v757_v8, 0.0  ;;  %v7849_v47 = vpop.permute.xlu0 %225 }
 0x236   :  { %v724_v63 = vpop.f32.mrf.mxu1 }
 0x237   :  { %v758_v6 = vadd.f32 %v5862_v27, %v743_v61  ;;  %v741_v7 = vadd.f32 %v724_v63, %v627_v59  ;;  %6500 = vmatprep.mubr.msk.bf16.mxu0 %vm471_vm4, %v767_v60  ;;  %v763_v11 = vmax.f32 %v755_v5, 0.0 }
 0x238   :  { %6501 = vmatmul.mubr.msk.bf16.vlgmr.msra.gmra.mxu0 %vm471_vm4, %v768_v62 }
 0x239   :  { %v756_v9 = vadd.f32 %v5862_v27, %v741_v7  ;;  %v766_v10 = vmax.f32 %v758_v6, 0.0  ;;  %6521 = vmatpush3.bf16.msra.mxu0 %v7066_v17 }
 0x23a   :  { %6522 = vmatprep.subr.bf16.mxu0 %v7067_v19 }
 0x23b   :  { %v764_v12 = vmax.f32 %v756_v9, 0.0  ;;  %v770_v16 = vpack.c.bf16 %v766_v10, %v765_v13 }
 0x23d   :  { %v769_v14 = vpack.c.bf16 %v764_v12, %v763_v11  ;;  %6523 = vmatpush3.bf16.msra.mxu0 %v7067_v19  ;;  %v7887_v12 = vpop.permute.xlu0 %235 }
 0x23f   :  { %6504 = vmatprep.mubr.msk.bf16.mxu0 %vm471_vm4, %v769_v14 }
 0x240   :  { %6505 = vmatmul.mubr.msk.bf16.gmra.mxu0 %vm471_vm4, %v770_v16 }
 0x2f8   :  { %v6502_v25 = vpop.f32.mrf.mxu0 }
 0x2f9   :  { %v849_v26 = vadd.f32 %v6502_v25, %v5863_v22 }
 0x2fa   :  { %v840_v27 = vpop.f32.mrf.mxu0 }
 0x2fb   :  { %v841_v23 = vadd.f32 %v5863_v22, %v840_v27  ;;  %v873_v38 = vadd.f32 %v849_v26, %v7669_v32  ;;  %v7858_v32 = vpop.permute.xlu1 %230 }
 0x2fc   :  { %v6503_v31 = vpop.f32.mrf.mxu0 }
 0x2fd   :  { %v852_v34 = vadd.f32 %v6503_v31, %v5863_v22  ;;  %v871_v42 = vadd.f32 %v841_v23, %v7673_v35  ;;  %v7852_v48 = vmul.f32 %v873_v38, %v7844_v37 }
 0x2fe   :  { %v843_v39 = vpop.f32.mrf.mxu0 }
 0x2ff   :  { %v874_v41 = vadd.f32 %v852_v34, %v7667_v30  ;;  %v844_v43 = vadd.f32 %v5863_v22, %v843_v39  ;;  %v7861_v30 = vmul.f32 %v871_v42, %v7838_v21  ;;  %v893_v58 = vrot.slane %v7852_v48, 6  ;;  %v7889_v13 = vpop.permute.xlu1 %240 }
 0x300   :  { %v6506_v45 = vpop.f32.mrf.mxu0  ;;  %v917_v62 = vrot.slane %v7852_v48, 4 }
 0x301   :  { %v7855_v49 = vmul.f32 %v874_v41, %v7849_v47  ;;  %v872_v50 = vadd.f32 %v844_v43, %v7671_v33  ;;  %v865_v53 = vadd.f32 %v6506_v45, %v5863_v22  ;;  %v890_v10 = vrot.slane %v7861_v30, %v7676_v36 }
 0x302   :  { %v856_v52 = vpop.f32.mrf.mxu0 }
 0x303   :  { %v7864_v35 = vmul.f32 %v872_v50, %v7840_v24  ;;  %v857_v54 = vadd.f32 %v5863_v22, %v856_v52  ;;  %v894_v59 = vrot.slane %v7855_v49, 6  ;;  %v918_v33 = vrot.slane %v7855_v49, 4 }
 0x304   :  { %v6507_v55 = vpop.f32.mrf.mxu0  ;;  %v877_v63 = vadd.f32 %v865_v53, %v7696_v51  ;;  %v891_v51 = vrot.slane %v7861_v30, 6 }
 0x305   :  { %v868_v56 = vadd.f32 %v6507_v55, %v5863_v22  ;;  %v875_v60 = vadd.f32 %v857_v54, %v7681_v40  ;;  %v892_v7 = vrot.slane %v7864_v35, 6  ;;  %v916_v8 = vrot.slane %v7864_v35, 4 }
 0x306   :  { %v859_v61 = vpop.f32.mrf.mxu0  ;;  %v903_v14 = vsel %vm402_vm2, %v893_v58, %v894_v59  ;;  %v928_v16 = vsel %vm923_vm5, %v917_v62, %v918_v33 }
 0x307   :  { %v878_v5 = vadd.f32 %v868_v56, %v7688_v46  ;;  %v860_v6 = vadd.f32 %v5863_v22, %v859_v61  ;;  %v7877_v9 = vmul.f32 %v875_v60, %v7858_v32  ;;  %v915_v46 = vrot.slane %v7861_v30, 4  ;;  %v7069_v61 = vld [vmem:[%s9083_s10 + $0x50] sm:$0xff]  }
 0x308   :  { %v904_v25 = vsel %vm402_vm2, %v892_v7, %v893_v58  ;;  %v929_v26 = vsel %vm923_vm5, %v916_v8, %v917_v62  ;;  %v905_v27 = vsel %vm402_vm2, %v891_v51, %v892_v7 }
 0x309   :  { %v7882_v40 = vmul.f32 %v878_v5, %v7842_v28  ;;  %v876_v11 = vadd.f32 %v860_v6, %v7702_v57  ;;  %v895_v15 = vrot.slane %v7877_v9, 6  ;;  %v919_v17 = vrot.slane %v7877_v9, 4 }
 0x30a   :  { %v7898_v57 = vmul.f32 %v877_v63, %v7889_v13  ;;  %v930_v23 = vsel %vm923_vm5, %v915_v46, %v916_v8  ;;  %v973_v55 = vpack.c.bf16 %v903_v14, %v904_v25  ;;  %v964_v56 = vpack.c.bf16 %v928_v16, %v929_v26  ;;  %v7071_v14 = vld [vmem:[#allocation10 + $0x10] sm:$0xff]  }
 0x30b   :  { %v898_v18 = vrot.slane %v7882_v40, 6  ;;  %v922_v19 = vrot.slane %v7882_v40, 4  ;;  %v7903_v22 = vmul.f32 %v876_v11, %v7887_v12  ;;  %v902_v43 = vsel %vm402_vm2, %v894_v59, %v895_v15 }
 0x30c   :  { %v927_v45 = vsel %vm923_vm5, %v918_v33, %v919_v17  ;;  %v897_v59 = vrot.slane %v7898_v57, 6  ;;  %v921_v33 = vrot.slane %v7898_v57, 4  ;;  %v1159_v8 = vpack.c.bf16 %v7864_v35, %v7861_v30 }
 0x30d   :  { %v896_v31 = vrot.slane %v7903_v22, 6  ;;  %v920_v34 = vrot.slane %v7903_v22, 4  ;;  %v906_v38 = vsel %vm402_vm2, %v898_v18, %v891_v51  ;;  %v931_v39 = vsel %vm923_vm5, %v922_v19, %v915_v46  ;;  %v7070_v46 = vld [vmem:[#allocation10 + $0x18] sm:$0xff]  }
 0x30e   :  { %v907_v41 = vsel %vm402_vm2, %v890_v10, %v906_v38  ;;  %v955_v42 = vsel %vm923_vm5, %v890_v10, %v931_v39  ;;  %v899_v5 = vsel %vm402_vm2, %v897_v59, %v898_v18  ;;  %v924_v6 = vsel %vm923_vm5, %v921_v33, %v922_v19  ;;  %6544 = vmatprep.subr.bf16.mxu0 %v7070_v46 }
 0x30f   :  { %v972_v50 = vpack.c.bf16 %v905_v27, %v907_v41  ;;  %v963_v52 = vpack.c.bf16 %v930_v23, %v955_v42  ;;  %v901_v53 = vsel %vm402_vm2, %v895_v15, %v896_v31  ;;  %v926_v54 = vsel %vm923_vm5, %v919_v17, %v920_v34 }
 0x310   :  { %v974_v58 = vpack.c.bf16 %v901_v53, %v902_v43  ;;  %v965_v60 = vpack.c.bf16 %v926_v54, %v927_v45  ;;  %v900_v62 = vsel %vm402_vm2, %v896_v31, %v897_v59  ;;  %v925_v63 = vsel %vm923_vm5, %v920_v34, %v921_v33 }
 0x311   :  { %6512 = vmatprep.mubr.msk.bf16.mxu1 %vm471_vm4, %v972_v50  ;;  %6524 = vmatprep.mubr.msk.bf16.mxu0 %vm471_vm4, %v963_v52  ;;  %v975_v7 = vpack.c.bf16 %v899_v5, %v900_v62  ;;  %v1160_v10 = vpack.c.bf16 %v7855_v49, %v7852_v48  ;;  %v1161_v11 = vpack.c.bf16 %v7903_v22, %v7877_v9 }
 0x312   :  { %6513 = vmatmul.mubr.msk.bf16.vlgmr.msra.gmra.mxu1 %vm471_vm4, %v973_v55  ;;  %6525 = vmatmul.mubr.msk.bf16.vlgmr.msra.gmra.mxu0 %vm471_vm4, %v964_v56  ;;  %v1162_v51 = vpack.c.bf16 %v7882_v40, %v7898_v57 }
 0x313   :  { %6533 = vmatpush3.bf16.msra.mxu1 %v7835_v20  ;;  %6516 = vmatprep.mubr.msk.bf16.mxu1 %vm471_vm4, %v974_v58  ;;  %v966_v20 = vpack.c.bf16 %v924_v6, %v925_v63  ;;  %v5900_v58 = vld [vmem:[#allocation9 + $0x1] ss:$0 sm:$0xff] }
 0x314   :  { %6528 = vmatprep.mubr.msk.bf16.mxu0 %vm471_vm4, %v965_v60  ;;  %6534 = vmatprep.subr.bf16.mxu1 %v7069_v61 }
 0x315   :  { %6545 = vmatpush3.bf16.msra.mxu0 %v7070_v46 }
 0x316   :  { %6546 = vmatprep.subr.bf16.mxu0 %v7071_v14 }
 0x317   :  { %6535 = vmatpush3.bf16.msra.mxu1 %v7069_v61 }
 0x319   :  { %6547 = vmatpush3.bf16.msra.mxu0 %v7071_v14 }
 0x31a   :  { %6517 = vmatmul.mubr.msk.bf16.gmra.mxu1 %vm471_vm4, %v975_v7  ;;  %6529 = vmatmul.mubr.msk.bf16.gmra.mxu0 %vm471_vm4, %v966_v20 }
 0x31b   :  { %6536 = vmatprep.mubr.msk.bf16.mxu1 %vm471_vm4, %v1159_v8 }
 0x322   :  { %6537 = vmatmul.mubr.msk.bf16.vlgmr.msra.gmra.mxu1 %vm471_vm4, %v1160_v10 }
 0x323   :  { %6540 = vmatprep.mubr.msk.bf16.mxu1 %vm471_vm4, %v1161_v11 }
 0x32a   :  { %6541 = vmatmul.mubr.msk.bf16.gmra.mxu1 %vm471_vm4, %v1162_v51 }
 0x3d2   :  { %v6514_v16 = vpop.f32.mrf.mxu1  ;;  %v6526_v15 = vpop.f32.mrf.mxu0 }
 0x3d3   :  { %v1137_v43 = vadd.f32 %v6526_v15, %v6514_v16 }
 0x3d4   :  { %v1039_v17 = vpop.f32.mrf.mxu1  ;;  %v1128_v18 = vpop.f32.mrf.mxu0 }
 0x3d5   :  { %v1129_v42 = vadd.f32 %v1128_v18, %v1039_v17 }
 0x3d6   :  { %v6515_v19 = vpop.f32.mrf.mxu1  ;;  %v6527_v25 = vpop.f32.mrf.mxu0 }
 0x3d7   :  { %v1140_v52 = vadd.f32 %v6527_v25, %v6515_v19 }
 0x3d8   :  { %v1042_v26 = vpop.f32.mrf.mxu1  ;;  %v1131_v23 = vpop.f32.mrf.mxu0 }
 0x3d9   :  { %v1132_v56 = vadd.f32 %v1131_v23, %v1042_v26 }
 0x3da   :  { %v6518_v27 = vpop.f32.mrf.mxu1  ;;  %v6530_v38 = vpop.f32.mrf.mxu0 }
 0x3db   :  { %v1153_v8 = vadd.f32 %v6530_v38, %v6518_v27 }
 0x3dc   :  { %v1055_v31 = vpop.f32.mrf.mxu1  ;;  %v1144_v45 = vpop.f32.mrf.mxu0 }
 0x3dd   :  { %v1145_v7 = vadd.f32 %v1144_v45, %v1055_v31 }
 0x3de   :  { %v6519_v34 = vpop.f32.mrf.mxu1  ;;  %v6531_v61 = vpop.f32.mrf.mxu0 }
 0x3df   :  { %v1156_v46 = vadd.f32 %v6531_v61, %v6519_v34  ;;  %v7984_v61 = vld [vmem:[%s9083_s10 + $0x88] sm:$0xff]  }
 0x3e0   :  { %v1058_v39 = vpop.f32.mrf.mxu1  ;;  %v1147_v10 = vpop.f32.mrf.mxu0 }
 0x3e1   :  { %v1148_v25 = vadd.f32 %v1147_v10, %v1058_v39  ;;  %v7072_v39 = vld [vmem:[%s9083_s10 + $0x68] sm:$0xff]  }
 0x3e2   :  { %v6538_v41 = vpop.f32.mrf.mxu1  ;;  %6568 = vmatprep.subr.bf16.mxu0 %v7072_v39 }
 0x3e3   :  { %v1259_v54 = vadd.f32 %v6538_v41, %v1137_v43 }
 0x3e4   :  { %v1226_v50 = vpop.f32.mrf.mxu1 }
 0x3e5   :  { %v1257_v53 = vadd.f32 %v1226_v50, %v1129_v42  ;;  %v1275_v5 = vadd.f32 %v5900_v58, %v1259_v54 }
 0x3e6   :  { %v6539_v55 = vpop.f32.mrf.mxu1 }
 0x3e7   :  { %v1260_v60 = vadd.f32 %v6539_v55, %v1140_v52  ;;  %v1273_v33 = vadd.f32 %v5900_v58, %v1257_v53  ;;  %v1283_v17 = vmax.f32 %v1275_v5, 0.0 }
 0x3e8   :  { %v1229_v59 = vpop.f32.mrf.mxu1 }
 0x3e9   :  { %v1276_v62 = vadd.f32 %v5900_v58, %v1260_v60  ;;  %v1258_v63 = vadd.f32 %v1229_v59, %v1132_v56  ;;  %v1281_v14 = vmax.f32 %v1273_v33, 0.0  ;;  %v7074_v56 = vld [vmem:[%s9083_s10 + $0x60] sm:$0xff]   ;;  %v7075_v60 = vld [vmem:[%s9083_s10 + $0x70] sm:$0xff]   ;;  %v5901_v33 = vld [vmem:[#allocation12 + $0x1] ss:$0 sm:$0xff] }
 0x3ea   :  { %v6542_v6 = vpop.f32.mrf.mxu1 }
 0x3eb   :  { %v1274_v20 = vadd.f32 %v5900_v58, %v1258_v63  ;;  %v1284_v11 = vmax.f32 %v1276_v62, 0.0  ;;  %v1263_v18 = vadd.f32 %v6542_v6, %v1153_v8 }
 0x3ec   :  { %v1242_v51 = vpop.f32.mrf.mxu1 }
 0x3ed   :  { %v1282_v16 = vmax.f32 %v1274_v20, 0.0  ;;  %v1261_v15 = vadd.f32 %v1242_v51, %v1145_v7  ;;  %v1290_v41 = vpack.c.bf16 %v1284_v11, %v1283_v17  ;;  %v1279_v27 = vadd.f32 %v5900_v58, %v1263_v18 }
 0x3ee   :  { %v6543_v19 = vpop.f32.mrf.mxu1 }
 0x3ef   :  { %v1289_v26 = vpack.c.bf16 %v1282_v16, %v1281_v14  ;;  %v1264_v23 = vadd.f32 %v6543_v19, %v1156_v46  ;;  %v1277_v43 = vadd.f32 %v5900_v58, %v1261_v15  ;;  %v1287_v53 = vmax.f32 %v1279_v27, 0.0 }
 0x3f0   :  { %v1245_v42 = vpop.f32.mrf.mxu1 }
 0x3f1   :  { %v1280_v50 = vadd.f32 %v5900_v58, %v1264_v23  ;;  %v1262_v31 = vadd.f32 %v1245_v42, %v1148_v25  ;;  %6548 = vmatprep.mubr.msk.bf16.mxu0 %vm471_vm4, %v1289_v26  ;;  %v1285_v45 = vmax.f32 %v1277_v43, 0.0 }
 0x3f2   :  { %6549 = vmatmul.mubr.msk.bf16.vlgmr.msra.gmra.mxu0 %vm471_vm4, %v1290_v41 }
 0x3f3   :  { %v1278_v34 = vadd.f32 %v5900_v58, %v1262_v31  ;;  %v1288_v38 = vmax.f32 %v1280_v50, 0.0  ;;  %6569 = vmatpush3.bf16.msra.mxu0 %v7072_v39  ;;  %v7073_v58 = vld [vmem:[%s9083_s10 + $0x78] sm:$0xff]  }
 0x3f4   :  { %6570 = vmatprep.subr.bf16.mxu0 %v7074_v56  ;;  %6556 = vmatprep.subr.bf16.mxu1 %v7073_v58 }
 0x3f5   :  { %v1286_v52 = vmax.f32 %v1278_v34, 0.0  ;;  %v1292_v55 = vpack.c.bf16 %v1288_v38, %v1287_v53  ;;  %6557 = vmatpush3.bf16.msra.mxu1 %v7073_v58 }
 0x3f6   :  { %6558 = vmatprep.subr.bf16.mxu1 %v7075_v60 }
 0x3f7   :  { %v1291_v54 = vpack.c.bf16 %v1286_v52, %v1285_v45  ;;  %6571 = vmatpush3.bf16.msra.mxu0 %v7074_v56 }
 0x3f9   :  { %6552 = vmatprep.mubr.msk.bf16.mxu0 %vm471_vm4, %v1291_v54  ;;  %6559 = vmatpush3.bf16.msra.mxu1 %v7075_v60 }
 0x3fa   :  { %6553 = vmatmul.mubr.msk.bf16.gmra.mxu0 %vm471_vm4, %v1292_v55  ;;  %6580 = vmatprep.subr.bf16.mxu1 %v7984_v61 }
 0x4b2   :  { %v6550_v59 = vpop.f32.mrf.mxu0 }
 0x4b3   :  { %v1373_v63 = vadd.f32 %v6550_v59, %v5901_v33 }
 0x4b4   :  { %v1364_v62 = vpop.f32.mrf.mxu0 }
 0x4b5   :  { %v1365_v5 = vadd.f32 %v5901_v33, %v1364_v62  ;;  %v1397_v8 = vadd.f32 %v1373_v63, %v7852_v48 }
 0x4b6   :  { %v6551_v6 = vpop.f32.mrf.mxu0 }
 0x4b7   :  { %v1395_v7 = vadd.f32 %v1365_v5, %v7861_v30  ;;  %v1376_v51 = vadd.f32 %v6551_v6, %v5901_v33  ;;  %v7996_v17 = vmul.f32 %v1397_v8, %v7844_v37  ;;  %v7077_v8 = vld [vmem:[%s9083_s10 + $0x80] sm:$0xff]  }
 0x4b8   :  { %v1367_v20 = vpop.f32.mrf.mxu0 }
 0x4b9   :  { %v7990_v10 = vmul.f32 %v1395_v7, %v7838_v21  ;;  %v1368_v11 = vadd.f32 %v5901_v33, %v1367_v20  ;;  %v1398_v48 = vadd.f32 %v1376_v51, %v7855_v49 }
 0x4ba   :  { %v6554_v46 = vpop.f32.mrf.mxu0 }
 0x4bb   :  { %v1396_v14 = vadd.f32 %v1368_v11, %v7864_v35  ;;  %v1414_v16 = vrot.slane %v7990_v10, %v7676_v36  ;;  %v1389_v18 = vadd.f32 %v6554_v46, %v5901_v33  ;;  %v8010_v49 = vmul.f32 %v1398_v48, %v7849_v47  ;;  %v7078_v48 = vld [vmem:[#allocation10 + $0x28] sm:$0xff]  }
 0x4bc   :  { %v1380_v15 = vpop.f32.mrf.mxu0  ;;  %v1415_v55 = vrot.slane %v7990_v10, 4  ;;  %6592 = vmatprep.subr.bf16.mxu0 %v7078_v48 }
 0x4bd   :  { %v7999_v30 = vmul.f32 %v1396_v14, %v7840_v24  ;;  %v1381_v19 = vadd.f32 %v5901_v33, %v1380_v15  ;;  %v1471_v26 = vpack.c.bf16 %v7990_v10, %v1414_v16  ;;  %v1401_v43 = vadd.f32 %v1389_v18, %v7898_v57 }
 0x4be   :  { %v6555_v25 = vpop.f32.mrf.mxu0 }
 0x4bf   :  { %v1472_v35 = vpack.c.bf16 %v7996_v17, %v7999_v30  ;;  %v1399_v23 = vadd.f32 %v1381_v19, %v7877_v9  ;;  %v1392_v41 = vadd.f32 %v6555_v25, %v5901_v33  ;;  %6572 = vmatprep.mubr.msk.bf16.mxu0 %vm471_vm4, %v1471_v26  ;;  %v1416_v9 = vrot.slane %v7999_v30, 4  ;;  %v7079_v19 = vld [vmem:[#allocation10 + $0x20] sm:$0xff]  }
 0x4c0   :  { %v1383_v42 = vpop.f32.mrf.mxu0  ;;  %v8024_v45 = vmul.f32 %v1401_v43, %v7889_v13  ;;  %v7080_v25 = vld [vmem:[#allocation16 + $0x8] sm:$0xff]  }
 0x4c1   :  { %v1384_v50 = vadd.f32 %v5901_v33, %v1383_v42  ;;  %6573 = vmatmul.mubr.msk.bf16.vlgmr.msra.gmra.mxu0 %vm471_vm4, %v1472_v35  ;;  %v8013_v31 = vmul.f32 %v1399_v23, %v7858_v32  ;;  %v1402_v27 = vadd.f32 %v1392_v41, %v7882_v40  ;;  %v1417_v40 = vrot.slane %v7996_v17, 4 }
 0x4c2   :  { %v1429_v59 = vsel %vm923_vm5, %v1415_v55, %v1416_v9  ;;  %v1421_v11 = vrot.slane %v8024_v45, 4  ;;  %6593 = vmatpush3.bf16.msra.mxu0 %v7078_v48 }
 0x4c3   :  { %v1400_v34 = vadd.f32 %v1384_v50, %v7903_v22  ;;  %v8019_v38 = vmul.f32 %v1402_v27, %v7842_v28  ;;  %v1473_v57 = vpack.c.bf16 %v8013_v31, %v8010_v49  ;;  %v1419_v52 = vrot.slane %v8013_v31, 4  ;;  %6594 = vmatprep.subr.bf16.mxu0 %v7079_v19 }
 0x4c4   :  { %v1418_v22 = vrot.slane %v8010_v49, 4  ;;  %v1428_v58 = vsel %vm923_vm5, %v1416_v9, %v1417_v40 }
 0x4c5   :  { %v8028_v53 = vmul.f32 %v1400_v34, %v7887_v12  ;;  %v1422_v54 = vrot.slane %v8019_v38, 4  ;;  %6576 = vmatprep.mubr.msk.bf16.mxu0 %vm471_vm4, %v1473_v57  ;;  %v1670_v18 = vpack.c.bf16 %v8019_v38, %v8024_v45 }
 0x4c6   :  { %v1426_v63 = vsel %vm923_vm5, %v1418_v22, %v1419_v52  ;;  %v1427_v5 = vsel %vm923_vm5, %v1417_v40, %v1418_v22  ;;  %6595 = vmatpush3.bf16.msra.mxu0 %v7079_v19 }
 0x4c7   :  { %v1420_v39 = vrot.slane %v8028_v53, 4  ;;  %v1474_v56 = vpack.c.bf16 %v8024_v45, %v8028_v53  ;;  %v1430_v60 = vsel %vm923_vm5, %v1422_v54, %v1415_v55  ;;  %v1481_v20 = vpack.c.bf16 %v1427_v5, %v1428_v58 }
 0x4c8   :  { %v1431_v33 = vsel %vm923_vm5, %v1414_v16, %v1430_v60  ;;  %v1423_v46 = vsel %vm923_vm5, %v1421_v11, %v1422_v54  ;;  %v1667_v16 = vpack.c.bf16 %v7999_v30, %v7990_v10  ;;  %v1669_v15 = vpack.c.bf16 %v8028_v53, %v8013_v31 }
 0x4c9   :  { %6577 = vmatmul.mubr.msk.bf16.gmra.mxu0 %vm471_vm4, %v1474_v56  ;;  %v1425_v62 = vsel %vm923_vm5, %v1419_v52, %v1420_v39  ;;  %v1480_v6 = vpack.c.bf16 %v1429_v59, %v1431_v33  ;;  %v1424_v51 = vsel %vm923_vm5, %v1420_v39, %v1421_v11 }
 0x4ca   :  { %v1482_v7 = vpack.c.bf16 %v1425_v62, %v1426_v63  ;;  %v1483_v14 = vpack.c.bf16 %v1423_v46, %v1424_v51  ;;  %v5938_v63 = vld [vmem:[#allocation9 + $0x2] ss:$0 sm:$0xff] }
 0x4cb   :  { %6560 = vmatprep.mubr.msk.bf16.mxu1 %vm471_vm4, %v1480_v6 }
 0x4cc   :  { %6561 = vmatmul.mubr.msk.bf16.vlgmr.msra.gmra.mxu1 %vm471_vm4, %v1481_v20 }
 0x4cd   :  { %6581 = vmatpush3.bf16.msra.mxu1 %v7984_v61  ;;  %6564 = vmatprep.mubr.msk.bf16.mxu1 %vm471_vm4, %v1482_v7  ;;  %v1668_v61 = vpack.c.bf16 %v8010_v49, %v7996_v17 }
 0x4ce   :  { %6582 = vmatprep.subr.bf16.mxu1 %v7077_v8 }
 0x4d1   :  { %6583 = vmatpush3.bf16.msra.mxu1 %v7077_v8 }
 0x4d2   :  { %6604 = vmatprep.subr.bf16.mxu1 %v7080_v25 }
 0x4d4   :  { %6565 = vmatmul.mubr.msk.bf16.gmra.mxu1 %vm471_vm4, %v1483_v14 }
 0x4d5   :  { %6584 = vmatprep.mubr.msk.bf16.mxu1 %vm471_vm4, %v1667_v16 }
 0x4dc   :  { %6585 = vmatmul.mubr.msk.bf16.vlgmr.msra.gmra.mxu1 %vm471_vm4, %v1668_v61 }
 0x4dd   :  { %6588 = vmatprep.mubr.msk.bf16.mxu1 %vm471_vm4, %v1669_v15  ;;  %6605 = vmatpush3.bf16.msra.mxu1 %v7080_v25 }
 0x4e4   :  { %6589 = vmatmul.mubr.msk.bf16.gmra.mxu1 %vm471_vm4, %v1670_v18 }
 0x581   :  { %v6574_v26 = vpop.f32.mrf.mxu0 }
 0x583   :  { %v1636_v41 = vpop.f32.mrf.mxu0 }
 0x585   :  { %v6575_v50 = vpop.f32.mrf.mxu0 }
 0x587   :  { %v1639_v9 = vpop.f32.mrf.mxu0 }
 0x589   :  { %v6578_v40 = vpop.f32.mrf.mxu0 }
 0x58b   :  { %v1652_v60 = vpop.f32.mrf.mxu0 }
 0x58c   :  { %v6562_v35 = vpop.f32.mrf.mxu1 }
 0x58d   :  { %v1645_v55 = vadd.f32 %v6574_v26, %v6562_v35  ;;  %v6579_v11 = vpop.f32.mrf.mxu0 }
 0x58e   :  { %v1547_v23 = vpop.f32.mrf.mxu1 }
 0x58f   :  { %v1637_v54 = vadd.f32 %v1636_v41, %v1547_v23  ;;  %v1655_v35 = vpop.f32.mrf.mxu0 }
 0x590   :  { %v6563_v42 = vpop.f32.mrf.mxu1 }
 0x591   :  { %v1648_v56 = vadd.f32 %v6575_v50, %v6563_v42 }
 0x592   :  { %v1550_v43 = vpop.f32.mrf.mxu1 }
 0x593   :  { %v1640_v62 = vadd.f32 %v1639_v9, %v1550_v43 }
 0x594   :  { %v6566_v27 = vpop.f32.mrf.mxu1 }
 0x595   :  { %v1661_v61 = vadd.f32 %v6578_v40, %v6566_v27 }
 0x596   :  { %v1563_v34 = vpop.f32.mrf.mxu1 }
 0x597   :  { %v1653_v14 = vadd.f32 %v1652_v60, %v1563_v34 }
 0x598   :  { %v6567_v57 = vpop.f32.mrf.mxu1 }
 0x599   :  { %v1664_v48 = vadd.f32 %v6579_v11, %v6567_v57  ;;  %v5939_v11 = vld [vmem:[#allocation12 + $0x2] ss:$0 sm:$0xff] }
 0x59a   :  { %v1566_v52 = vpop.f32.mrf.mxu1 }
 0x59b   :  { %v1656_v43 = vadd.f32 %v1655_v35, %v1566_v52  ;;  %v7081_v52 = vld [vmem:[#allocation16] sm:$0xff]  }
 0x59c   :  { %v6586_v22 = vpop.f32.mrf.mxu1  ;;  %6606 = vmatprep.subr.bf16.mxu1 %v7081_v52 }
 0x59d   :  { %v1767_v59 = vadd.f32 %v6586_v22, %v1645_v55  ;;  %6607 = vmatpush3.bf16.msra.mxu1 %v7081_v52  ;;  %v5970_v52 = vld [vmem:[%s9082_s6 + $0x48] sm:$0xff] }
 0x59e   :  { %v1734_v39 = vpop.f32.mrf.mxu1 }
 0x59f   :  { %v1765_v58 = vadd.f32 %v1734_v39, %v1637_v54  ;;  %v1783_v51 = vadd.f32 %v5938_v63, %v1767_v59 }
 0x5a0   :  { %v6587_v33 = vpop.f32.mrf.mxu1 }
 0x5a1   :  { %v1768_v5 = vadd.f32 %v6587_v33, %v1648_v56  ;;  %v1781_v7 = vadd.f32 %v5938_v63, %v1765_v58  ;;  %v1791_v23 = vmax.f32 %v1783_v51, 0.0 }
 0x5a2   :  { %v1737_v6 = vpop.f32.mrf.mxu1 }
 0x5a3   :  { %v1784_v20 = vadd.f32 %v5938_v63, %v1768_v5  ;;  %v1766_v8 = vadd.f32 %v1737_v6, %v1640_v62  ;;  %v1789_v19 = vmax.f32 %v1781_v7, 0.0  ;;  %v7082_v62 = vld [vmem:[%s9058_s8 + $0x8] sm:$0xff]   ;;  %v7085_v5 = vld [vmem:[%s9066_s16 + $0x30] sm:$0xff]   ;;  %v7087_v7 = vld [vmem:[%s9066_s16 + $0x20] sm:$0xff]  }
 0x5a4   :  { %v6590_v46 = vpop.f32.mrf.mxu1  ;;  %6640 = vmatprep.subr.bf16.mxu1 %v7082_v62  ;;  %v7086_v6 = vld [vmem:[%s9066_s16 + $0x28] sm:$0xff]  }
 0x5a5   :  { %v1782_v16 = vadd.f32 %v5938_v63, %v1766_v8  ;;  %v1792_v15 = vmax.f32 %v1784_v20, 0.0  ;;  %v1771_v41 = vadd.f32 %v6590_v46, %v1661_v61  ;;  %v7088_v20 = vld [vmem:[%s9066_s16 + $0x18] sm:$0xff]  }
 0x5a6   :  { %v1750_v18 = vpop.f32.mrf.mxu1 }
 0x5a7   :  { %v1790_v25 = vmax.f32 %v1782_v16, 0.0  ;;  %v1769_v26 = vadd.f32 %v1750_v18, %v1653_v14  ;;  %v1798_v22 = vpack.c.bf16 %v1792_v15, %v1791_v23  ;;  %v1787_v27 = vadd.f32 %v5938_v63, %v1771_v41 }
 0x5a8   :  { %v6591_v42 = vpop.f32.mrf.mxu1 }
 0x5a9   :  { %v1797_v50 = vpack.c.bf16 %v1790_v25, %v1789_v19  ;;  %v1772_v9 = vadd.f32 %v6591_v42, %v1664_v48  ;;  %v1785_v55 = vadd.f32 %v5938_v63, %v1769_v26  ;;  %v1795_v60 = vmax.f32 %v1787_v27, 0.0 }
 0x5aa   :  { %v1753_v54 = vpop.f32.mrf.mxu1 }
 0x5ab   :  { %v1788_v39 = vadd.f32 %v5938_v63, %v1772_v9  ;;  %v1770_v34 = vadd.f32 %v1753_v54, %v1656_v43  ;;  %6596 = vmatprep.mubr.msk.bf16.mxu0 %vm471_vm4, %v1797_v50  ;;  %v1793_v56 = vmax.f32 %v1785_v55, 0.0 }
 0x5ac   :  { %6597 = vmatmul.mubr.msk.bf16.vlgmr.msra.gmra.mxu0 %vm471_vm4, %v1798_v22 }
 0x5ad   :  { %v1786_v57 = vadd.f32 %v5938_v63, %v1770_v34  ;;  %v1796_v40 = vmax.f32 %v1788_v39, 0.0  ;;  %v7084_v63 = vld [vmem:[%s9066_s16 + $0x38] sm:$0xff]  }
 0x5ae   :  { %6616 = vmatprep.subr.bf16.mxu0 %v7084_v63 }
 0x5af   :  { %v1794_v58 = vmax.f32 %v1786_v57, 0.0  ;;  %v1800_v33 = vpack.c.bf16 %v1796_v40, %v1795_v60  ;;  %6617 = vmatpush3.bf16.msra.mxu0 %v7084_v63  ;;  %v5971_v63 = vld [vmem:[%s9082_s6 + $0x50] sm:$0xff] }
 0x5b0   :  { %6618 = vmatprep.subr.bf16.mxu0 %v7085_v5 }
 0x5b1   :  { %v1799_v59 = vpack.c.bf16 %v1794_v58, %v1793_v56 }
 0x5b3   :  { %6600 = vmatprep.mubr.msk.bf16.mxu0 %vm471_vm4, %v1799_v59  ;;  %6619 = vmatpush3.bf16.msra.mxu0 %v7085_v5  ;;  %v5972_v5 = vld [vmem:[%s9082_s6 + $0x58] sm:$0xff] }
 0x5b4   :  { %6601 = vmatmul.mubr.msk.bf16.gmra.mxu0 %vm471_vm4, %v1800_v33  ;;  %6620 = vmatprep.subr.bf16.mxu0 %v7086_v6 }
 0x5b7   :  { %6621 = vmatpush3.bf16.msra.mxu0 %v7086_v6  ;;  %v5973_v6 = vld [vmem:[%s9082_s6 + $0x60] sm:$0xff] }
 0x5b8   :  { %6622 = vmatprep.subr.bf16.mxu0 %v7087_v7 }
 0x5bb   :  { %6623 = vmatpush3.bf16.msra.mxu0 %v7087_v7  ;;  %v5974_v7 = vld [vmem:[%s9082_s6 + $0x68] sm:$0xff] }
 0x5bc   :  { %6624 = vmatprep.subr.bf16.mxu0 %v7088_v20 }
 0x5bf   :  { %6625 = vmatpush3.bf16.msra.mxu0 %v7088_v20  ;;  %v2335_v20 = vpack.c.bf16 %v5972_v5, %v5971_v63 }
 0x66c   :  { %v6598_v8 = vpop.f32.mrf.mxu0 }
 0x66d   :  { %v1881_v14 = vadd.f32 %v6598_v8, %v5939_v11  ;;  %v2336_v8 = vpack.c.bf16 %v5974_v7, %v5973_v6 }
 0x66e   :  { %v1872_v51 = vpop.f32.mrf.mxu0 }
 0x66f   :  { %v1873_v46 = vadd.f32 %v5939_v11, %v1872_v51  ;;  %v1905_v25 = vadd.f32 %v1881_v14, %v7996_v17  ;;  %v7083_v17 = vld [vmem:[%s9058_s8] sm:$0xff]   ;;  %v5976_v51 = vld [vmem:[%s9082_s6 + $0x78] sm:$0xff]  ;;  %v7089_v14 = vld [vmem:[%s9066_s16 + $0x10] sm:$0xff]  }
 0x670   :  { %v6599_v16 = vpop.f32.mrf.mxu0  ;;  %6626 = vmatprep.subr.bf16.mxu0 %v7089_v14 }
 0x671   :  { %v1884_v61 = vadd.f32 %v6599_v16, %v5939_v11  ;;  %v1903_v18 = vadd.f32 %v1873_v46, %v7990_v10  ;;  %v1913_v9 = vmul.f32 %v1905_v25, %v7844_v37  ;;  %6627 = vmatpush3.bf16.msra.mxu0 %v7089_v14  ;;  %v7090_v16 = vld [vmem:[%s9066_s16 + $0x8] sm:$0xff]  }
 0x672   :  { %v1875_v15 = vpop.f32.mrf.mxu0  ;;  %6628 = vmatprep.subr.bf16.mxu0 %v7090_v16 }
 0x673   :  { %v1906_v48 = vadd.f32 %v1884_v61, %v8010_v49  ;;  %v1876_v19 = vadd.f32 %v5939_v11, %v1875_v15  ;;  %v1911_v42 = vmul.f32 %v1903_v18, %v7838_v21  ;;  %v7091_v61 = vld [vmem:[%s9066_s16] sm:$0xff]   ;;  %v7092_v15 = vld [vmem:[%s9083_s10 + $0x18] sm:$0xff]   ;;  %v7094_v18 = vld [vmem:[%s9083_s10 + $0x8] sm:$0xff]  }
 0x674   :  { %v6602_v26 = vpop.f32.mrf.mxu0 }
 0x675   :  { %v1904_v35 = vadd.f32 %v1876_v19, %v7999_v30  ;;  %v1914_v23 = vmul.f32 %v1906_v48, %v7849_v47  ;;  %v1897_v22 = vadd.f32 %v6602_v26, %v5939_v11  ;;  %6629 = vmatpush3.bf16.msra.mxu0 %v7090_v16  ;;  %v7095_v48 = vld [vmem:[%s9083_s10] sm:$0xff]  }
 0x676   :  { %v1888_v41 = vpop.f32.mrf.mxu0  ;;  %6630 = vmatprep.subr.bf16.mxu0 %v7091_v61  ;;  %v5946_v26 = vld [vmem:[%s9063_s13] ss:$0 sm:$0xff]  ;;  %v5985_v16 = vld [vmem:[#allocation7] ss:$0 sm:$0xff] }
 0x677   :  { %v1912_v43 = vmul.f32 %v1904_v35, %v7840_v24  ;;  %v1889_v50 = vadd.f32 %v5939_v11, %v1888_v41  ;;  %v1920_v55 = vpack.c.bf16 %v1914_v23, %v1913_v9  ;;  %v1909_v57 = vadd.f32 %v1897_v22, %v8024_v45 }
 0x678   :  { %v6603_v10 = vpop.f32.mrf.mxu0 }
 0x679   :  { %v1919_v54 = vpack.c.bf16 %v1912_v43, %v1911_v42  ;;  %v1900_v49 = vadd.f32 %v6603_v10, %v5939_v11  ;;  %v1907_v30 = vadd.f32 %v1889_v50, %v8013_v31  ;;  %v2338_v31 = vld [vmem:[#allocation4] sm:$0xf]  ;;  %6631 = vmatpush3.bf16.msra.mxu0 %v7091_v61 }
 0x67a   :  { %v1891_v39 = vpop.f32.mrf.mxu0  ;;  %v2359_v45 = vsel %vm273_vm0, %v2338_v31, 0  ;;  %6662 = vmatprep.subr.bf16.mxu0 %v7092_v15 }
 0x67b   :  { %v1910_v34 = vadd.f32 %v1900_v49, %v8019_v38  ;;  %v1892_v27 = vadd.f32 %v5939_v11, %v1891_v39  ;;  %6608 = vmatprep.mubr.msk.bf16.mxu1 %vm471_vm4, %v1919_v54  ;;  %v1915_v58 = vmul.f32 %v1907_v30, %v7858_v32  ;;  %v1917_v38 = vmul.f32 %v1909_v57, %v7889_v13  ;;  %v5975_v11 = vld [vmem:[%s9082_s6 + $0x70] sm:$0xff] }
 0x67c   :  { %6609 = vmatmul.mubr.msk.bf16.vlgmr.msra.gmra.mxu1 %vm471_vm4, %v1920_v55  ;;  %v2337_v46 = vpack.c.bf16 %v5976_v51, %v5975_v11 }
 0x67d   :  { %v1908_v40 = vadd.f32 %v1892_v27, %v8028_v53  ;;  %6641 = vmatpush3.bf16.msra.mxu1 %v7082_v62  ;;  %v1918_v56 = vmul.f32 %v1910_v34, %v7842_v28  ;;  %v5969_v53 = vld [vmem:[%s9082_s6 + $0x40] sm:$0xff]  ;;  %v7093_v34 = vld [vmem:[%s9083_s10 + $0x10] sm:$0xff]  }
 0x67e   :  { %6642 = vmatprep.subr.bf16.mxu1 %v7083_v17  ;;  %v2334_v62 = vpack.c.bf16 %v5970_v52, %v5969_v53 }
 0x67f   :  { %v1916_v60 = vmul.f32 %v1908_v40, %v7887_v12  ;;  %v1922_v33 = vpack.c.bf16 %v1918_v56, %v1917_v38  ;;  %v5962_v56 = vld [vmem:[#allocation13] ss:$0 sm:$0xff] }
 0x681   :  { %v1921_v59 = vpack.c.bf16 %v1916_v60, %v1915_v58  ;;  %6643 = vmatpush3.bf16.msra.mxu1 %v7083_v17  ;;  %v8189_v58 = vld [vmem:[%s9083_s10 + $0x28] sm:$0xff]  }
 0x682   :  { %7015 = vmatprep.subr.msk.bf16.mxu1 %vm273_vm0, %v2338_v31 }
 0x683   :  { %6612 = vmatprep.mubr.msk.bf16.mxu1 %vm471_vm4, %v1921_v59 }
 0x684   :  { %6613 = vmatmul.mubr.msk.bf16.gmra.mxu1 %vm471_vm4, %v1922_v33 }
 0x685   :  { %6644 = vmatprep.mubr.msk.bf16.mxu1 %vm471_vm4, %v1919_v54 }
 0x68c   :  { %6645 = vmatmul.mubr.msk.bf16.vlgmr.msra.gmra.mxu1 %vm471_vm4, %v1920_v55 }
 0x68d   :  { %6653 = vmatpush3.bf16.msra.mxu1 %v2359_v45  ;;  %6648 = vmatprep.mubr.msk.bf16.mxu1 %vm471_vm4, %v1921_v59 }
 0x68e   :  { %6674 = vmatprep.subr.bf16.mxu1 %v7094_v18 }
 0x694   :  { %6649 = vmatmul.mubr.msk.bf16.gmra.mxu1 %vm471_vm4, %v1922_v33 }
 0x695   :  { %6654 = vmatprep.mubr.msk.bf16.mxu1 %vm260_vm1, %v2334_v62 }
 0x69c   :  { %6655 = vmatmul.mubr.msk.bf16.vlgmr.msra.gmra.mxu1 %vm260_vm1, %v2335_v20 }
 0x69d   :  { %6658 = vmatprep.mubr.msk.bf16.mxu1 %vm260_vm1, %v2336_v8  ;;  %6675 = vmatpush3.bf16.msra.mxu1 %v7094_v18 }
 0x69e   :  { %6676 = vmatprep.subr.bf16.mxu1 %v7095_v48 }
 0x6a1   :  { %6677 = vmatpush3.bf16.msra.mxu1 %v7095_v48 }
 0x6a4   :  { %6659 = vmatmul.mubr.msk.bf16.gmra.mxu1 %vm260_vm1, %v2337_v46 }
 0x73c   :  { %v6610_v19 = vpop.f32.mrf.mxu1 }
 0x73d   :  { %v2001_v42 = vadd.f32 %v6610_v19, %v5946_v26 }
 0x73e   :  { %v1992_v25 = vpop.f32.mrf.mxu1 }
 0x73f   :  { %v1993_v23 = vadd.f32 %v5946_v26, %v1992_v25  ;;  %v2025_v49 = vmul.f32 %v2001_v42, %v7844_v37 }
 0x740   :  { %v6611_v35 = vpop.f32.mrf.mxu1 }
 0x741   :  { %v2004_v41 = vadd.f32 %v6611_v35, %v5946_v26  ;;  %v2023_v10 = vmul.f32 %v1993_v23, %v7838_v21 }
 0x742   :  { %v1995_v43 = vpop.f32.mrf.mxu1 }
 0x743   :  { %v1996_v50 = vadd.f32 %v5946_v26, %v1995_v43  ;;  %v2026_v9 = vmul.f32 %v2004_v41, %v7849_v47 }
 0x744   :  { %v6614_v22 = vpop.f32.mrf.mxu1 }
 0x745   :  { %v2024_v54 = vmul.f32 %v1996_v50, %v7840_v24  ;;  %v2032_v17 = vpack.c.bf16 %v2026_v9, %v2025_v49  ;;  %v2017_v40 = vadd.f32 %v6614_v22, %v5946_v26 }
 0x746   :  { %v2008_v55 = vpop.f32.mrf.mxu1 }
 0x747   :  { %v2031_v39 = vpack.c.bf16 %v2024_v54, %v2023_v10  ;;  %v2009_v27 = vadd.f32 %v5946_v26, %v2008_v55  ;;  %v2029_v59 = vmul.f32 %v2017_v40, %v7889_v13 }
 0x748   :  { %v6615_v30 = vpop.f32.mrf.mxu1 }
 0x749   :  { %v2020_v57 = vadd.f32 %v6615_v30, %v5946_v26  ;;  %6632 = vmatprep.mubr.bf16.mxu0 %v2031_v39  ;;  %v2027_v60 = vmul.f32 %v2009_v27, %v7858_v32 }
 0x74a   :  { %v2011_v47 = vpop.f32.mrf.mxu1  ;;  %6633 = vmatmul.mubr.bf16.vlgmr.msra.gmra.mxu0 %v2032_v17 }
 0x74b   :  { %v2012_v21 = vadd.f32 %v5946_v26, %v2011_v47  ;;  %6663 = vmatpush3.bf16.msra.mxu0 %v7092_v15  ;;  %v2030_v24 = vmul.f32 %v2020_v57, %v7842_v28 }
 0x74c   :  { %v6646_v37 = vpop.f32.mrf.mxu1  ;;  %6664 = vmatprep.subr.bf16.mxu0 %v7093_v34 }
 0x74d   :  { %v2028_v31 = vmul.f32 %v2012_v21, %v7887_v12  ;;  %v2245_v38 = vadd.f32 %v6646_v37, %v5962_v56  ;;  %v2034_v52 = vpack.c.bf16 %v2030_v24, %v2029_v59 }
 0x74e   :  { %v2236_v33 = vpop.f32.mrf.mxu1 }
 0x74f   :  { %2270 = vst.msk [vmem:[#allocation2 + $0x10] sm:$0xff] %vm2267_vm6, %v2245_v38  ;;  %v2237_v45 = vadd.f32 %v5962_v56, %v2236_v33  ;;  %v2033_v28 = vpack.c.bf16 %v2028_v31, %v2027_v60  ;;  %6665 = vmatpush3.bf16.msra.mxu0 %v7093_v34 }
 0x750   :  { %v6647_v53 = vpop.f32.mrf.mxu1  ;;  %6686 = vmatprep.subr.bf16.mxu0 %v8189_v58 }
 0x751   :  { %2268 = vst.msk [vmem:[#allocation2] sm:$0xff] %vm2267_vm6, %v2237_v45  ;;  %v2248_v62 = vadd.f32 %v6647_v53, %v5962_v56  ;;  %6636 = vmatprep.mubr.bf16.mxu0 %v2033_v28 }
 0x752   :  { %6637 = vmatmul.mubr.bf16.gmra.mxu0 %v2034_v52  ;;  %v2239_v32 = vpop.f32.mrf.mxu1 }
 0x753   :  { %2271 = vst.msk [vmem:[#allocation2 + $0x18] sm:$0xff] %vm2267_vm6, %v2248_v62  ;;  %v2240_v12 = vadd.f32 %v5962_v56, %v2239_v32 }
 0x754   :  { %v6650_v13 = vpop.f32.mrf.mxu1 }
 0x755   :  { %2269 = vst.msk [vmem:[#allocation2 + $0x8] sm:$0xff] %vm2267_vm6, %v2240_v12  ;;  %v2261_v63 = vadd.f32 %v6650_v13, %v5962_v56 }
 0x756   :  { %v2252_v5 = vpop.f32.mrf.mxu1 }
 0x757   :  { %2274 = vst.msk [vmem:[#allocation2 + $0x30] sm:$0xff] %vm2267_vm6, %v2261_v63  ;;  %v2253_v6 = vadd.f32 %v5962_v56, %v2252_v5 }
 0x758   :  { %v6651_v7 = vpop.f32.mrf.mxu1 }
 0x759   :  { %2272 = vst.msk [vmem:[#allocation2 + $0x20] sm:$0xff] %vm2267_vm6, %v2253_v6  ;;  %v2264_v20 = vadd.f32 %v6651_v7, %v5962_v56 }
 0x75a   :  { %v2255_v8 = vpop.f32.mrf.mxu1 }
 0x75b   :  { %2275 = vst.msk [vmem:[#allocation2 + $0x38] sm:$0xff] %vm2267_vm6, %v2264_v20  ;;  %v2256_v11 = vadd.f32 %v5962_v56, %v2255_v8  ;;  %v7097_v20 = vld [vmem:[%s9083_s10 + $0x20] sm:$0xff]  }
 0x75c   :  { %v6656_v51 = vpop.f32.mrf.mxu1 }
 0x75d   :  { %2273 = vst.msk [vmem:[#allocation2 + $0x28] sm:$0xff] %vm2267_vm6, %v2256_v11  ;;  %v8205_v18 = vadd.f32 %v6656_v51, %v5985_v16 }
 0x75e   :  { %v2395_v46 = vpop.f32.mrf.mxu1 }
 0x75f   :  { %v8209_v25 = vadd.f32 %v5985_v16, %v2395_v46  ;;  %v2432_v42 = vrot.slane %v8205_v18, 7  ;;  %v2456_v43 = vrot.slane %v8205_v18, 6 }
 0x760   :  { %v6657_v14 = vpop.f32.mrf.mxu1 }
 0x761   :  { %v8203_v61 = vadd.f32 %v6657_v14, %v5985_v16  ;;  %v2429_v54 = vrot.slane %v8209_v25, %v7676_v36  ;;  %v2430_v49 = vrot.slane %v8209_v25, 7  ;;  %v2454_v55 = vrot.slane %v8209_v25, 6 }
 0x762   :  { %v2398_v15 = vpop.f32.mrf.mxu1 }
 0x763   :  { %v8207_v48 = vadd.f32 %v5985_v16, %v2398_v15  ;;  %v2433_v26 = vrot.slane %v8203_v61, 7  ;;  %v2457_v35 = vrot.slane %v8203_v61, 6 }
 0x764   :  { %v6660_v19 = vpop.f32.mrf.mxu1 }
 0x765   :  { %v2431_v50 = vrot.slane %v8207_v48, 7  ;;  %v2455_v9 = vrot.slane %v8207_v48, 6  ;;  %v2442_v39 = vsel %vm354_vm3, %v2432_v42, %v2433_v26  ;;  %v2466_v17 = vsel %vm402_vm2, %v2456_v43, %v2457_v35 }
 0x766   :  { %v2411_v23 = vpop.f32.mrf.mxu1  ;;  %v8231_v57 = vadd.f32 %v6660_v19, %v5985_v16  ;;  %v2672_v19 = vpack.c.bf16 %v8207_v48, %v8209_v25 }
 0x767   :  { %v8213_v41 = vadd.f32 %v5985_v16, %v2411_v23  ;;  %v2443_v21 = vsel %vm354_vm3, %v2431_v50, %v2432_v42  ;;  %v2467_v24 = vsel %vm402_vm2, %v2455_v9, %v2456_v43  ;;  %v2444_v37 = vsel %vm354_vm3, %v2430_v49, %v2431_v50  ;;  %v7098_v42 = vld [vmem:[#allocation10 + $0x8] sm:$0xff]   ;;  %v7099_v43 = vld [vmem:[#allocation10] sm:$0xff]   ;;  %v5953_v50 = vld [vmem:[%s9068_s18] ss:$0 sm:$0xff] }
 0x768   :  { %v6661_v22 = vpop.f32.mrf.mxu1  ;;  %v2468_v60 = vsel %vm402_vm2, %v2454_v55, %v2455_v9  ;;  %v2479_v63 = vpack.c.bf16 %v2466_v17, %v2467_v24  ;;  %v2487_v5 = vpack.c.bf16 %v2442_v39, %v2443_v21  ;;  %v2436_v8 = vrot.slane %v8231_v57, 7  ;;  %6698 = vmatprep.subr.bf16.mxu1 %v7098_v42 }
 0x769   :  { %v8219_v10 = vadd.f32 %v6661_v22, %v5985_v16  ;;  %v2434_v30 = vrot.slane %v8213_v41, 7  ;;  %v2458_v34 = vrot.slane %v8213_v41, 6  ;;  %v2460_v11 = vrot.slane %v8231_v57, 6 }
 0x76a   :  { %v2414_v27 = vpop.f32.mrf.mxu1 }
 0x76b   :  { %v2437_v40 = vrot.slane %v8219_v10, 7  ;;  %v2461_v47 = vrot.slane %v8219_v10, 6  ;;  %v8235_v56 = vadd.f32 %v5985_v16, %v2414_v27  ;;  %v2441_v53 = vsel %vm354_vm3, %v2433_v26, %v2434_v30 }
 0x76c   :  { %v2465_v52 = vsel %vm402_vm2, %v2457_v35, %v2458_v34  ;;  %v2673_v26 = vpack.c.bf16 %v8203_v61, %v8205_v18  ;;  %v2675_v23 = vpack.c.bf16 %v8219_v10, %v8231_v57 }
 0x76d   :  { %v2435_v31 = vrot.slane %v8235_v56, 7  ;;  %v2459_v38 = vrot.slane %v8235_v56, 6  ;;  %v2445_v59 = vsel %vm354_vm3, %v2437_v40, %v2430_v49  ;;  %v2469_v33 = vsel %vm402_vm2, %v2461_v47, %v2454_v55 }
 0x76e   :  { %v2446_v45 = vsel %vm354_vm3, %v2429_v54, %v2445_v59  ;;  %v2470_v28 = vsel %vm402_vm2, %v2429_v54, %v2469_v33  ;;  %v2438_v14 = vsel %vm354_vm3, %v2436_v8, %v2437_v40  ;;  %v2462_v16 = vsel %vm402_vm2, %v2460_v11, %v2461_v47 }
 0x76f   :  { %v2486_v62 = vpack.c.bf16 %v2444_v37, %v2446_v45  ;;  %v2478_v32 = vpack.c.bf16 %v2468_v60, %v2470_v28  ;;  %v2440_v12 = vsel %vm354_vm3, %v2434_v30, %v2435_v31  ;;  %v2464_v13 = vsel %vm402_vm2, %v2458_v34, %v2459_v38 }
 0x770   :  { %v2488_v6 = vpack.c.bf16 %v2440_v12, %v2441_v53  ;;  %v2480_v7 = vpack.c.bf16 %v2464_v13, %v2465_v52  ;;  %v2439_v51 = vsel %vm354_vm3, %v2435_v31, %v2436_v8  ;;  %v2463_v46 = vsel %vm402_vm2, %v2459_v38, %v2460_v11 }
 0x771   :  { %6666 = vmatprep.mubr.msk.bf16.mxu0 %vm471_vm4, %v2486_v62  ;;  %6678 = vmatprep.mubr.msk.bf16.mxu1 %vm471_vm4, %v2478_v32  ;;  %v2489_v15 = vpack.c.bf16 %v2438_v14, %v2439_v51  ;;  %v2674_v35 = vpack.c.bf16 %v8235_v56, %v8213_v41 }
 0x772   :  { %6667 = vmatmul.mubr.msk.bf16.vlgmr.msra.gmra.mxu0 %vm471_vm4, %v2487_v5  ;;  %6679 = vmatmul.mubr.msk.bf16.vlgmr.msra.gmra.mxu1 %vm471_vm4, %v2479_v63 }
 0x773   :  { %6687 = vmatpush3.bf16.msra.mxu0 %v8189_v58  ;;  %6670 = vmatprep.mubr.msk.bf16.mxu0 %vm471_vm4, %v2488_v6  ;;  %v2481_v58 = vpack.c.bf16 %v2462_v16, %v2463_v46 }
 0x774   :  { %6682 = vmatprep.mubr.msk.bf16.mxu1 %vm471_vm4, %v2480_v7  ;;  %6688 = vmatprep.subr.bf16.mxu0 %v7097_v20 }
 0x775   :  { %6699 = vmatpush3.bf16.msra.mxu1 %v7098_v42 }
 0x776   :  { %6700 = vmatprep.subr.bf16.mxu1 %v7099_v43 }
 0x777   :  { %6689 = vmatpush3.bf16.msra.mxu0 %v7097_v20 }
 0x779   :  { %6701 = vmatpush3.bf16.msra.mxu1 %v7099_v43 }
 0x77a   :  { %6671 = vmatmul.mubr.msk.bf16.gmra.mxu0 %vm471_vm4, %v2489_v15  ;;  %6683 = vmatmul.mubr.msk.bf16.gmra.mxu1 %vm471_vm4, %v2481_v58  ;;  %v6016_v15 = vld [vmem:[#allocation9] ss:$0 sm:$0xff] }
 0x77b   :  { %6690 = vmatprep.mubr.msk.bf16.mxu0 %vm471_vm4, %v2672_v19 }
 0x782   :  { %6691 = vmatmul.mubr.msk.bf16.vlgmr.msra.gmra.mxu0 %vm471_vm4, %v2673_v26 }
 0x783   :  { %6694 = vmatprep.mubr.msk.bf16.mxu0 %vm471_vm4, %v2674_v35 }
 0x78a   :  { %6695 = vmatmul.mubr.msk.bf16.gmra.mxu0 %vm471_vm4, %v2675_v23 }
 0x80a   :  { %v6634_v9 = vpop.f32.mrf.mxu0 }
 0x80b   :  { %v2149_v22 = vadd.f32 %v6634_v9, %v5953_v50 }
 0x80c   :  { %v2140_v54 = vpop.f32.mrf.mxu0 }
 0x80d   :  { %2173 = vst [vmem:[#allocation19 + $0x10] sm:$0xff] %v2149_v22  ;;  %v2141_v49 = vadd.f32 %v5953_v50, %v2140_v54 }
 0x80e   :  { %v6635_v55 = vpop.f32.mrf.mxu0 }
 0x80f   :  { %2171 = vst [vmem:[#allocation19] sm:$0xff] %v2141_v49  ;;  %v2152_v39 = vadd.f32 %v6635_v55, %v5953_v50 }
 0x810   :  { %v2143_v17 = vpop.f32.mrf.mxu0 }
 0x811   :  { %2174 = vst [vmem:[#allocation19 + $0x18] sm:$0xff] %v2152_v39  ;;  %v2144_v30 = vadd.f32 %v5953_v50, %v2143_v17 }
 0x812   :  { %v6638_v34 = vpop.f32.mrf.mxu0 }
 0x813   :  { %2172 = vst [vmem:[#allocation19 + $0x8] sm:$0xff] %v2144_v30  ;;  %v2165_v27 = vadd.f32 %v6638_v34, %v5953_v50 }
 0x814   :  { %v2156_v40 = vpop.f32.mrf.mxu0 }
 0x815   :  { %2177 = vst [vmem:[#allocation19 + $0x30] sm:$0xff] %v2165_v27  ;;  %v2157_v47 = vadd.f32 %v5953_v50, %v2156_v40 }
 0x816   :  { %v6639_v21 = vpop.f32.mrf.mxu0 }
 0x817   :  { %2175 = vst [vmem:[#allocation19 + $0x20] sm:$0xff] %v2157_v47  ;;  %v2168_v24 = vadd.f32 %v6639_v21, %v5953_v50 }
 0x818   :  { %v2159_v37 = vpop.f32.mrf.mxu0 }
 0x819   :  { %2178 = vst [vmem:[#allocation19 + $0x38] sm:$0xff] %v2168_v24  ;;  %v2160_v60 = vadd.f32 %v5953_v50, %v2159_v37 }
 0x81b   :  { %2176 = vst [vmem:[#allocation19 + $0x28] sm:$0xff] %v2160_v60 }
 0x832   :  { %v6668_v31 = vpop.f32.mrf.mxu0  ;;  %v6680_v38 = vpop.f32.mrf.mxu1 }
 0x833   :  { %v2650_v7 = vadd.f32 %v6680_v38, %v6668_v31 }
 0x834   :  { %v2552_v59 = vpop.f32.mrf.mxu0  ;;  %v2641_v33 = vpop.f32.mrf.mxu1 }
 0x835   :  { %v2642_v6 = vadd.f32 %v2641_v33, %v2552_v59 }
 0x836   :  { %v6669_v45 = vpop.f32.mrf.mxu0  ;;  %v6681_v28 = vpop.f32.mrf.mxu1 }
 0x837   :  { %v2653_v11 = vadd.f32 %v6681_v28, %v6669_v45 }
 0x838   :  { %v2555_v53 = vpop.f32.mrf.mxu0  ;;  %v2644_v62 = vpop.f32.mrf.mxu1 }
 0x839   :  { %v2645_v16 = vadd.f32 %v2644_v62, %v2555_v53 }
 0x83a   :  { %v6672_v52 = vpop.f32.mrf.mxu0  ;;  %v6684_v13 = vpop.f32.mrf.mxu1 }
 0x83b   :  { %v2666_v54 = vadd.f32 %v6684_v13, %v6672_v52 }
 0x83c   :  { %v2568_v32 = vpop.f32.mrf.mxu0  ;;  %v2657_v20 = vpop.f32.mrf.mxu1 }
 0x83d   :  { %v2658_v9 = vadd.f32 %v2657_v20, %v2568_v32  ;;  %v7103_v20 = vld [vmem:[%s9083_s10 + $0x30] sm:$0xff]  }
 0x83e   :  { %v6673_v12 = vpop.f32.mrf.mxu0  ;;  %v6685_v19 = vpop.f32.mrf.mxu1 }
 0x83f   :  { %v2669_v17 = vadd.f32 %v6685_v19, %v6673_v12 }
 0x840   :  { %v2571_v63 = vpop.f32.mrf.mxu0  ;;  %v2660_v49 = vpop.f32.mrf.mxu1 }
 0x841   :  { %v2661_v24 = vadd.f32 %v2660_v49, %v2571_v63  ;;  %v7100_v63 = vld [vmem:[%s9083_s10 + $0x48] sm:$0xff]  }
 0x842   :  { %v6692_v5 = vpop.f32.mrf.mxu0  ;;  %6710 = vmatprep.subr.bf16.mxu0 %v7100_v63 }
 0x843   :  { %v2771_v46 = vadd.f32 %v6692_v5, %v2650_v7  ;;  %6711 = vmatpush3.bf16.msra.mxu0 %v7100_v63  ;;  %v7101_v7 = vld [vmem:[%s9083_s10 + $0x40] sm:$0xff]  }
 0x844   :  { %v2738_v8 = vpop.f32.mrf.mxu0  ;;  %6712 = vmatprep.subr.bf16.mxu0 %v7101_v7 }
 0x845   :  { %v2769_v51 = vadd.f32 %v2738_v8, %v2642_v6  ;;  %v2786_v43 = vadd.f32 %v6016_v15, %v2771_v46  ;;  %v7102_v6 = vld [vmem:[%s9083_s10 + $0x38] sm:$0xff]   ;;  %v8324_v46 = vpop.permute.xlu1 %2331 }
 0x846   :  { %v6693_v14 = vpop.f32.mrf.mxu0  ;;  %6722 = vmatprep.subr.bf16.mxu1 %v7102_v6  ;;  %v8319_v8 = vld [vmem:[%s9083_s10 + $0x58] sm:$0xff]  }
 0x847   :  { %v2772_v58 = vadd.f32 %v6693_v14, %v2653_v11  ;;  %v2784_v35 = vadd.f32 %v6016_v15, %v2769_v51  ;;  %v2794_v40 = vmax.f32 %v2786_v43, 0.0  ;;  %6713 = vmatpush3.bf16.msra.mxu0 %v7101_v7  ;;  %v8322_v11 = vpop.permute.xlu0 %2296  ;;  %v6017_v51 = vld [vmem:[#allocation12] ss:$0 sm:$0xff] }
 0x848   :  { %v2741_v26 = vpop.f32.mrf.mxu0  ;;  %6734 = vmatprep.subr.bf16.mxu0 %v8319_v8 }
 0x849   :  { %v2787_v23 = vadd.f32 %v6016_v15, %v2772_v58  ;;  %v2770_v42 = vadd.f32 %v2741_v26, %v2645_v16  ;;  %v2792_v30 = vmax.f32 %v2784_v35, 0.0 }
 0x84a   :  { %v6696_v50 = vpop.f32.mrf.mxu0 }
 0x84b   :  { %v2785_v22 = vadd.f32 %v6016_v15, %v2770_v42  ;;  %v2795_v55 = vmax.f32 %v2787_v23, 0.0  ;;  %v2775_v47 = vadd.f32 %v6696_v50, %v2666_v54  ;;  %v8326_v58 = vpop.permute.xlu0 %2301  ;;  %v8328_v23 = vpop.permute.xlu1 %2306 }
 0x84c   :  { %v2754_v39 = vpop.f32.mrf.mxu0 }
 0x84d   :  { %v2793_v34 = vmax.f32 %v2785_v22, 0.0  ;;  %v2773_v27 = vadd.f32 %v2754_v39, %v2658_v9  ;;  %v2801_v31 = vpack.c.bf16 %v2795_v55, %v2794_v40  ;;  %v2790_v28 = vadd.f32 %v6016_v15, %v2775_v47 }
 0x84e   :  { %v6697_v21 = vpop.f32.mrf.mxu0 }
 0x84f   :  { %v2800_v37 = vpack.c.bf16 %v2793_v34, %v2792_v30  ;;  %v2776_v60 = vadd.f32 %v6697_v21, %v2669_v17  ;;  %v2788_v59 = vadd.f32 %v6016_v15, %v2773_v27  ;;  %v2798_v12 = vmax.f32 %v2790_v28, 0.0  ;;  %v8333_v49 = vpop.permute.xlu0 %2311 }
 0x850   :  { %v2757_v38 = vpop.f32.mrf.mxu0 }
 0x851   :  { %v2791_v33 = vadd.f32 %v6016_v15, %v2776_v60  ;;  %v2774_v45 = vadd.f32 %v2757_v38, %v2661_v24  ;;  %6702 = vmatprep.mubr.msk.bf16.mxu1 %vm471_vm4, %v2800_v37  ;;  %v2796_v62 = vmax.f32 %v2788_v59, 0.0 }
 0x852   :  { %6703 = vmatmul.mubr.msk.bf16.vlgmr.msra.gmra.mxu1 %vm471_vm4, %v2801_v31 }
 0x853   :  { %v2789_v53 = vadd.f32 %v6016_v15, %v2774_v45  ;;  %v2799_v52 = vmax.f32 %v2791_v33, 0.0  ;;  %6723 = vmatpush3.bf16.msra.mxu1 %v7102_v6 }
 0x854   :  { %6724 = vmatprep.subr.bf16.mxu1 %v7103_v20 }
 0x855   :  { %v2797_v32 = vmax.f32 %v2789_v53, 0.0  ;;  %v2803_v5 = vpack.c.bf16 %v2799_v52, %v2798_v12 }
 0x857   :  { %v2802_v13 = vpack.c.bf16 %v2797_v32, %v2796_v62  ;;  %6725 = vmatpush3.bf16.msra.mxu1 %v7103_v20  ;;  %v8370_v32 = vpop.permute.xlu0 %2321 }
 0x859   :  { %6706 = vmatprep.mubr.msk.bf16.mxu1 %vm471_vm4, %v2802_v13 }
 0x85a   :  { %6707 = vmatmul.mubr.msk.bf16.gmra.mxu1 %vm471_vm4, %v2803_v5 }
 0x912   :  { %v6704_v14 = vpop.f32.mrf.mxu1 }
 0x913   :  { %v2882_v16 = vadd.f32 %v6704_v14, %v6017_v51 }
 0x914   :  { %v2873_v15 = vpop.f32.mrf.mxu1 }
 0x915   :  { %v2874_v19 = vadd.f32 %v6017_v51, %v2873_v15  ;;  %v2906_v42 = vadd.f32 %v2882_v16, %v8205_v18  ;;  %v8342_v18 = vpop.permute.xlu1 %2316 }
 0x916   :  { %v6705_v26 = vpop.f32.mrf.mxu1 }
 0x917   :  { %v2885_v35 = vadd.f32 %v6705_v26, %v6017_v51  ;;  %v2904_v9 = vadd.f32 %v2874_v19, %v8209_v25  ;;  %v8336_v55 = vmul.f32 %v2906_v42, %v8328_v23 }
 0x918   :  { %v2876_v43 = vpop.f32.mrf.mxu1 }
 0x919   :  { %v2907_v50 = vadd.f32 %v2885_v35, %v8203_v61  ;;  %v2877_v22 = vadd.f32 %v6017_v51, %v2876_v43  ;;  %v8345_v61 = vmul.f32 %v2904_v9, %v8322_v11  ;;  %v2926_v21 = vrot.slane %v8336_v55, 6  ;;  %v8372_v12 = vpop.permute.xlu1 %2326 }
 0x91a   :  { %v6708_v54 = vpop.f32.mrf.mxu1  ;;  %v2950_v31 = vrot.slane %v8336_v55, 4 }
 0x91b   :  { %v8339_v39 = vmul.f32 %v2907_v50, %v8333_v49  ;;  %v2905_v17 = vadd.f32 %v2877_v22, %v8207_v48  ;;  %v2898_v34 = vadd.f32 %v6708_v54, %v6017_v51  ;;  %v2923_v52 = vrot.slane %v8345_v61, %v7676_v36 }
 0x91c   :  { %v2889_v30 = vpop.f32.mrf.mxu1 }
 0x91d   :  { %v8348_v25 = vmul.f32 %v2905_v17, %v8326_v58  ;;  %v2890_v27 = vadd.f32 %v6017_v51, %v2889_v30  ;;  %v2927_v24 = vrot.slane %v8339_v39, 6  ;;  %v2951_v37 = vrot.slane %v8339_v39, 4 }
 0x91e   :  { %v6709_v40 = vpop.f32.mrf.mxu1  ;;  %v2910_v38 = vadd.f32 %v2898_v34, %v8231_v57  ;;  %v2924_v57 = vrot.slane %v8345_v61, 6 }
 0x91f   :  { %v2901_v47 = vadd.f32 %v6709_v40, %v6017_v51  ;;  %v2908_v48 = vadd.f32 %v2890_v27, %v8213_v41  ;;  %v2925_v45 = vrot.slane %v8348_v25, 6  ;;  %v2949_v28 = vrot.slane %v8348_v25, 4 }
 0x920   :  { %v2892_v60 = vpop.f32.mrf.mxu1  ;;  %v2936_v13 = vsel %vm402_vm2, %v2926_v21, %v2927_v24  ;;  %v2960_v5 = vsel %vm923_vm5, %v2950_v31, %v2951_v37 }
 0x921   :  { %v2911_v59 = vadd.f32 %v2901_v47, %v8219_v10  ;;  %v2893_v33 = vadd.f32 %v6017_v51, %v2892_v60  ;;  %v8360_v53 = vmul.f32 %v2908_v48, %v8342_v18  ;;  %v2948_v10 = vrot.slane %v8345_v61, 4  ;;  %v7105_v60 = vld [vmem:[%s9083_s10 + $0x50] sm:$0xff]  }
 0x922   :  { %v2937_v14 = vsel %vm402_vm2, %v2925_v45, %v2926_v21  ;;  %v2961_v16 = vsel %vm923_vm5, %v2949_v28, %v2950_v31  ;;  %v2938_v15 = vsel %vm402_vm2, %v2924_v57, %v2925_v45 }
 0x923   :  { %v8365_v41 = vmul.f32 %v2911_v59, %v8324_v46  ;;  %v2909_v62 = vadd.f32 %v2893_v33, %v8235_v56  ;;  %v2928_v63 = vrot.slane %v8360_v53, 6  ;;  %v2952_v6 = vrot.slane %v8360_v53, 4 }
 0x924   :  { %v8381_v56 = vmul.f32 %v2910_v38, %v8372_v12  ;;  %v2962_v19 = vsel %vm923_vm5, %v2948_v10, %v2949_v28  ;;  %v2981_v40 = vpack.c.bf16 %v2936_v13, %v2937_v14  ;;  %v2973_v47 = vpack.c.bf16 %v2960_v5, %v2961_v16  ;;  %v7107_v13 = vld [vmem:[#allocation10 + $0x10] sm:$0xff]  }
 0x925   :  { %v2931_v7 = vrot.slane %v8365_v41, 6  ;;  %v2955_v20 = vrot.slane %v8365_v41, 4  ;;  %v8386_v51 = vmul.f32 %v2909_v62, %v8370_v32  ;;  %v2935_v22 = vsel %vm402_vm2, %v2927_v24, %v2928_v63 }
 0x926   :  { %v2959_v54 = vsel %vm923_vm5, %v2951_v37, %v2952_v6  ;;  %v2930_v24 = vrot.slane %v8381_v56, 6  ;;  %v2954_v37 = vrot.slane %v8381_v56, 4  ;;  %v3166_v28 = vpack.c.bf16 %v8348_v25, %v8345_v61 }
 0x927   :  { %v2929_v26 = vrot.slane %v8386_v51, 6  ;;  %v2953_v35 = vrot.slane %v8386_v51, 4  ;;  %v2939_v42 = vsel %vm402_vm2, %v2931_v7, %v2924_v57  ;;  %v2963_v43 = vsel %vm923_vm5, %v2955_v20, %v2948_v10  ;;  %v7106_v10 = vld [vmem:[#allocation10 + $0x18] sm:$0xff]  }
 0x928   :  { %v2940_v50 = vsel %vm402_vm2, %v2923_v52, %v2939_v42  ;;  %v2964_v9 = vsel %vm923_vm5, %v2923_v52, %v2963_v43  ;;  %v2932_v59 = vsel %vm402_vm2, %v2930_v24, %v2931_v7  ;;  %v2956_v33 = vsel %vm923_vm5, %v2954_v37, %v2955_v20  ;;  %6746 = vmatprep.subr.bf16.mxu1 %v7106_v10 }
 0x929   :  { %v2980_v17 = vpack.c.bf16 %v2938_v15, %v2940_v50  ;;  %v2972_v30 = vpack.c.bf16 %v2962_v19, %v2964_v9  ;;  %v2934_v34 = vsel %vm402_vm2, %v2928_v63, %v2929_v26  ;;  %v2958_v27 = vsel %vm923_vm5, %v2952_v6, %v2953_v35 }
 0x92a   :  { %v2982_v21 = vpack.c.bf16 %v2934_v34, %v2935_v22  ;;  %v2974_v48 = vpack.c.bf16 %v2958_v27, %v2959_v54  ;;  %v2933_v31 = vsel %vm402_vm2, %v2929_v26, %v2930_v24  ;;  %v2957_v38 = vsel %vm923_vm5, %v2953_v35, %v2954_v37 }
 0x92b   :  { %6714 = vmatprep.mubr.msk.bf16.mxu0 %vm471_vm4, %v2980_v17  ;;  %6726 = vmatprep.mubr.msk.bf16.mxu1 %vm471_vm4, %v2972_v30  ;;  %v2983_v45 = vpack.c.bf16 %v2932_v59, %v2933_v31  ;;  %v3167_v52 = vpack.c.bf16 %v8339_v39, %v8336_v55  ;;  %v3168_v62 = vpack.c.bf16 %v8386_v51, %v8360_v53 }
 0x92c   :  { %6715 = vmatmul.mubr.msk.bf16.vlgmr.msra.gmra.mxu0 %vm471_vm4, %v2981_v40  ;;  %6727 = vmatmul.mubr.msk.bf16.vlgmr.msra.gmra.mxu1 %vm471_vm4, %v2973_v47  ;;  %v3169_v57 = vpack.c.bf16 %v8365_v41, %v8381_v56 }
 0x92d   :  { %6735 = vmatpush3.bf16.msra.mxu0 %v8319_v8  ;;  %6718 = vmatprep.mubr.msk.bf16.mxu0 %vm471_vm4, %v2982_v21  ;;  %v2975_v8 = vpack.c.bf16 %v2956_v33, %v2957_v38  ;;  %v6054_v21 = vld [vmem:[#allocation9 + $0x1] ss:$0 sm:$0xff] }
 0x92e   :  { %6730 = vmatprep.mubr.msk.bf16.mxu1 %vm471_vm4, %v2974_v48  ;;  %6736 = vmatprep.subr.bf16.mxu0 %v7105_v60 }
 0x92f   :  { %6747 = vmatpush3.bf16.msra.mxu1 %v7106_v10 }
 0x930   :  { %6748 = vmatprep.subr.bf16.mxu1 %v7107_v13 }
 0x931   :  { %6737 = vmatpush3.bf16.msra.mxu0 %v7105_v60 }
 0x933   :  { %6749 = vmatpush3.bf16.msra.mxu1 %v7107_v13 }
 0x934   :  { %6719 = vmatmul.mubr.msk.bf16.gmra.mxu0 %vm471_vm4, %v2983_v45  ;;  %6731 = vmatmul.mubr.msk.bf16.gmra.mxu1 %vm471_vm4, %v2975_v8 }
 0x935   :  { %6738 = vmatprep.mubr.msk.bf16.mxu0 %vm471_vm4, %v3166_v28 }
 0x93c   :  { %6739 = vmatmul.mubr.msk.bf16.vlgmr.msra.gmra.mxu0 %vm471_vm4, %v3167_v52 }
 0x93d   :  { %6742 = vmatprep.mubr.msk.bf16.mxu0 %vm471_vm4, %v3168_v62 }
 0x944   :  { %6743 = vmatmul.mubr.msk.bf16.gmra.mxu0 %vm471_vm4, %v3169_v57 }
 0x9ec   :  { %v6716_v5 = vpop.f32.mrf.mxu0  ;;  %v6728_v63 = vpop.f32.mrf.mxu1 }
 0x9ed   :  { %v3144_v22 = vadd.f32 %v6728_v63, %v6716_v5 }
 0x9ee   :  { %v3046_v6 = vpop.f32.mrf.mxu0  ;;  %v3135_v7 = vpop.f32.mrf.mxu1 }
 0x9ef   :  { %v3136_v9 = vadd.f32 %v3135_v7, %v3046_v6 }
 0x9f0   :  { %v6717_v20 = vpop.f32.mrf.mxu0  ;;  %v6729_v14 = vpop.f32.mrf.mxu1 }
 0x9f1   :  { %v3147_v30 = vadd.f32 %v6729_v14, %v6717_v20 }
 0x9f2   :  { %v3049_v16 = vpop.f32.mrf.mxu0  ;;  %v3138_v19 = vpop.f32.mrf.mxu1 }
 0x9f3   :  { %v3139_v47 = vadd.f32 %v3138_v19, %v3049_v16 }
 0x9f4   :  { %v6720_v15 = vpop.f32.mrf.mxu0  ;;  %v6732_v42 = vpop.f32.mrf.mxu1 }
 0x9f5   :  { %v3160_v28 = vadd.f32 %v6732_v42, %v6720_v15 }
 0x9f6   :  { %v3062_v26 = vpop.f32.mrf.mxu0  ;;  %v3151_v54 = vpop.f32.mrf.mxu1 }
 0x9f7   :  { %v3152_v45 = vadd.f32 %v3151_v54, %v3062_v26 }
 0x9f8   :  { %v6721_v35 = vpop.f32.mrf.mxu0  ;;  %v6733_v60 = vpop.f32.mrf.mxu1 }
 0x9f9   :  { %v3163_v10 = vadd.f32 %v6733_v60, %v6721_v35  ;;  %v8467_v60 = vld [vmem:[%s9083_s10 + $0x88] sm:$0xff]  }
 0x9fa   :  { %v3065_v43 = vpop.f32.mrf.mxu0  ;;  %v3154_v52 = vpop.f32.mrf.mxu1 }
 0x9fb   :  { %v3155_v14 = vadd.f32 %v3154_v52, %v3065_v43  ;;  %v7108_v43 = vld [vmem:[%s9083_s10 + $0x68] sm:$0xff]  }
 0x9fc   :  { %v6740_v50 = vpop.f32.mrf.mxu0  ;;  %6770 = vmatprep.subr.bf16.mxu1 %v7108_v43 }
 0x9fd   :  { %v3265_v27 = vadd.f32 %v6740_v50, %v3144_v22 }
 0x9fe   :  { %v3232_v17 = vpop.f32.mrf.mxu0 }
 0x9ff   :  { %v3263_v34 = vadd.f32 %v3232_v17, %v3136_v9  ;;  %v3280_v59 = vadd.f32 %v6054_v21, %v3265_v27 }
 0xa00   :  { %v6741_v40 = vpop.f32.mrf.mxu0 }
 0xa01   :  { %v3266_v48 = vadd.f32 %v6741_v40, %v3147_v30  ;;  %v3278_v37 = vadd.f32 %v6054_v21, %v3263_v34  ;;  %v3288_v6 = vmax.f32 %v3280_v59, 0.0 }
 0xa02   :  { %v3235_v24 = vpop.f32.mrf.mxu0 }
 0xa03   :  { %v3281_v31 = vadd.f32 %v6054_v21, %v3266_v48  ;;  %v3264_v38 = vadd.f32 %v3235_v24, %v3139_v47  ;;  %v3286_v13 = vmax.f32 %v3278_v37, 0.0  ;;  %v7110_v47 = vld [vmem:[%s9083_s10 + $0x60] sm:$0xff]   ;;  %v7111_v48 = vld [vmem:[%s9083_s10 + $0x70] sm:$0xff]   ;;  %v6055_v37 = vld [vmem:[#allocation12 + $0x1] ss:$0 sm:$0xff] }
 0xa04   :  { %v6744_v33 = vpop.f32.mrf.mxu0 }
 0xa05   :  { %v3279_v8 = vadd.f32 %v6054_v21, %v3264_v38  ;;  %v3289_v62 = vmax.f32 %v3281_v31, 0.0  ;;  %v3269_v7 = vadd.f32 %v6744_v33, %v3160_v28 }
 0xa06   :  { %v3248_v57 = vpop.f32.mrf.mxu0 }
 0xa07   :  { %v3287_v5 = vmax.f32 %v3279_v8, 0.0  ;;  %v3267_v63 = vadd.f32 %v3248_v57, %v3152_v45  ;;  %v3295_v50 = vpack.c.bf16 %v3289_v62, %v3288_v6  ;;  %v3284_v15 = vadd.f32 %v6054_v21, %v3269_v7 }
 0xa08   :  { %v6745_v20 = vpop.f32.mrf.mxu0 }
 0xa09   :  { %v3294_v16 = vpack.c.bf16 %v3287_v5, %v3286_v13  ;;  %v3270_v19 = vadd.f32 %v6745_v20, %v3163_v10  ;;  %v3282_v22 = vadd.f32 %v6054_v21, %v3267_v63  ;;  %v3292_v34 = vmax.f32 %v3284_v15, 0.0 }
 0xa0a   :  { %v3251_v9 = vpop.f32.mrf.mxu0 }
 0xa0b   :  { %v3285_v17 = vadd.f32 %v6054_v21, %v3270_v19  ;;  %v3268_v26 = vadd.f32 %v3251_v9, %v3155_v14  ;;  %6750 = vmatprep.mubr.msk.bf16.mxu1 %vm471_vm4, %v3294_v16  ;;  %v3290_v54 = vmax.f32 %v3282_v22, 0.0 }
 0xa0c   :  { %6751 = vmatmul.mubr.msk.bf16.vlgmr.msra.gmra.mxu1 %vm471_vm4, %v3295_v50 }
 0xa0d   :  { %v3283_v35 = vadd.f32 %v6054_v21, %v3268_v26  ;;  %v3293_v42 = vmax.f32 %v3285_v17, 0.0  ;;  %6771 = vmatpush3.bf16.msra.mxu1 %v7108_v43  ;;  %v7109_v21 = vld [vmem:[%s9083_s10 + $0x78] sm:$0xff]  }
 0xa0e   :  { %6772 = vmatprep.subr.bf16.mxu1 %v7110_v47  ;;  %6758 = vmatprep.subr.bf16.mxu0 %v7109_v21 }
 0xa0f   :  { %v3291_v30 = vmax.f32 %v3283_v35, 0.0  ;;  %v3297_v40 = vpack.c.bf16 %v3293_v42, %v3292_v34  ;;  %6759 = vmatpush3.bf16.msra.mxu0 %v7109_v21 }
 0xa10   :  { %6760 = vmatprep.subr.bf16.mxu0 %v7111_v48 }
 0xa11   :  { %v3296_v27 = vpack.c.bf16 %v3291_v30, %v3290_v54  ;;  %6773 = vmatpush3.bf16.msra.mxu1 %v7110_v47 }
 0xa13   :  { %6754 = vmatprep.mubr.msk.bf16.mxu1 %vm471_vm4, %v3296_v27  ;;  %6761 = vmatpush3.bf16.msra.mxu0 %v7111_v48 }
 0xa14   :  { %6755 = vmatmul.mubr.msk.bf16.gmra.mxu1 %vm471_vm4, %v3297_v40  ;;  %6782 = vmatprep.subr.bf16.mxu0 %v8467_v60 }
 0xacc   :  { %v6752_v24 = vpop.f32.mrf.mxu1 }
 0xacd   :  { %v3376_v38 = vadd.f32 %v6752_v24, %v6055_v37 }
 0xace   :  { %v3367_v31 = vpop.f32.mrf.mxu1 }
 0xacf   :  { %v3368_v59 = vadd.f32 %v6055_v37, %v3367_v31  ;;  %v3400_v28 = vadd.f32 %v3376_v38, %v8336_v55 }
 0xad0   :  { %v6753_v33 = vpop.f32.mrf.mxu1 }
 0xad1   :  { %v3398_v45 = vadd.f32 %v3368_v59, %v8345_v61  ;;  %v3379_v57 = vadd.f32 %v6753_v33, %v6055_v37  ;;  %v8479_v6 = vmul.f32 %v3400_v28, %v8328_v23 }
 0xad2   :  { %v3370_v8 = vpop.f32.mrf.mxu1 }
 0xad3   :  { %v8473_v52 = vmul.f32 %v3398_v45, %v8322_v11  ;;  %v3371_v62 = vadd.f32 %v6055_v37, %v3370_v8  ;;  %v3401_v55 = vadd.f32 %v3379_v57, %v8339_v39  ;;  %v7113_v8 = vld [vmem:[%s9083_s10 + $0x80] sm:$0xff]  }
 0xad4   :  { %v6756_v10 = vpop.f32.mrf.mxu1 }
 0xad5   :  { %v3399_v13 = vadd.f32 %v3371_v62, %v8348_v25  ;;  %v3417_v5 = vrot.slane %v8473_v52, %v7676_v36  ;;  %v3392_v7 = vadd.f32 %v6756_v10, %v6055_v37  ;;  %v8493_v39 = vmul.f32 %v3401_v55, %v8333_v49  ;;  %v7116_v55 = vld [vmem:[#allocation16 + $0x8] sm:$0xff]  }
 0xad6   :  { %v3383_v63 = vpop.f32.mrf.mxu1  ;;  %v3418_v27 = vrot.slane %v8473_v52, 4 }
 0xad7   :  { %v8482_v61 = vmul.f32 %v3399_v13, %v8326_v58  ;;  %v3384_v20 = vadd.f32 %v6055_v37, %v3383_v63  ;;  %v3450_v16 = vpack.c.bf16 %v8473_v52, %v3417_v5  ;;  %v3404_v9 = vadd.f32 %v3392_v7, %v8381_v56  ;;  %v7114_v63 = vld [vmem:[#allocation10 + $0x28] sm:$0xff]   ;;  %v7115_v7 = vld [vmem:[#allocation10 + $0x20] sm:$0xff]  }
 0xad8   :  { %v6757_v14 = vpop.f32.mrf.mxu1  ;;  %6794 = vmatprep.subr.bf16.mxu1 %v7114_v63 }
 0xad9   :  { %v3451_v25 = vpack.c.bf16 %v8479_v6, %v8482_v61  ;;  %v3402_v19 = vadd.f32 %v3384_v20, %v8360_v53  ;;  %v3395_v36 = vadd.f32 %v6757_v14, %v6055_v37  ;;  %6774 = vmatprep.mubr.msk.bf16.mxu1 %vm471_vm4, %v3450_v16  ;;  %v3419_v53 = vrot.slane %v8482_v61, 4 }
 0xada   :  { %v3386_v50 = vpop.f32.mrf.mxu1  ;;  %v8507_v42 = vmul.f32 %v3404_v9, %v8372_v12  ;;  %v3644_v13 = vpack.c.bf16 %v8482_v61, %v8473_v52 }
 0xadb   :  { %v3387_v22 = vadd.f32 %v6055_v37, %v3386_v50  ;;  %6775 = vmatmul.mubr.msk.bf16.vlgmr.msra.gmra.mxu1 %vm471_vm4, %v3451_v25  ;;  %v8496_v17 = vmul.f32 %v3402_v19, %v8342_v18  ;;  %v3405_v26 = vadd.f32 %v3395_v36, %v8365_v41  ;;  %v3420_v41 = vrot.slane %v8479_v6, 4 }
 0xadc   :  { %v3432_v48 = vsel %vm923_vm5, %v3418_v27, %v3419_v53  ;;  %v3424_v28 = vrot.slane %v8507_v42, 4  ;;  %6795 = vmatpush3.bf16.msra.mxu1 %v7114_v63 }
 0xadd   :  { %v3403_v15 = vadd.f32 %v3387_v22, %v8386_v51  ;;  %v8502_v35 = vmul.f32 %v3405_v26, %v8324_v46  ;;  %v3452_v56 = vpack.c.bf16 %v8496_v17, %v8493_v39  ;;  %v3422_v54 = vrot.slane %v8496_v17, 4  ;;  %6796 = vmatprep.subr.bf16.mxu1 %v7115_v7 }
 0xade   :  { %v3421_v51 = vrot.slane %v8493_v39, 4  ;;  %v3431_v47 = vsel %vm923_vm5, %v3419_v53, %v3420_v41 }
 0xadf   :  { %v8511_v30 = vmul.f32 %v3403_v15, %v8370_v32  ;;  %v3425_v34 = vrot.slane %v8502_v35, 4  ;;  %6778 = vmatprep.mubr.msk.bf16.mxu1 %vm471_vm4, %v3452_v56  ;;  %v3647_v29 = vpack.c.bf16 %v8502_v35, %v8507_v42 }
 0xae0   :  { %v3429_v31 = vsel %vm923_vm5, %v3421_v51, %v3422_v54  ;;  %v3430_v38 = vsel %vm923_vm5, %v3420_v41, %v3421_v51  ;;  %6797 = vmatpush3.bf16.msra.mxu1 %v7115_v7 }
 0xae1   :  { %v3423_v40 = vrot.slane %v8511_v30, 4  ;;  %v3453_v43 = vpack.c.bf16 %v8507_v42, %v8511_v30  ;;  %v3433_v21 = vsel %vm923_vm5, %v3425_v34, %v3418_v27  ;;  %v3459_v45 = vpack.c.bf16 %v3430_v38, %v3431_v47 }
 0xae2   :  { %v3434_v24 = vsel %vm923_vm5, %v3417_v5, %v3433_v21  ;;  %v3426_v57 = vsel %vm923_vm5, %v3424_v28, %v3425_v34  ;;  %v3646_v5 = vpack.c.bf16 %v8511_v30, %v8496_v17 }
 0xae3   :  { %6779 = vmatmul.mubr.msk.bf16.gmra.mxu1 %vm471_vm4, %v3453_v43  ;;  %v3428_v37 = vsel %vm923_vm5, %v3422_v54, %v3423_v40  ;;  %v3458_v59 = vpack.c.bf16 %v3432_v48, %v3434_v24  ;;  %v3427_v62 = vsel %vm923_vm5, %v3423_v40, %v3424_v28  ;;  %v6092_v24 = vld [vmem:[#allocation9 + $0x2] ss:$0 sm:$0xff] }
 0xae4   :  { %v3460_v33 = vpack.c.bf16 %v3428_v37, %v3429_v31  ;;  %v3461_v10 = vpack.c.bf16 %v3426_v57, %v3427_v62 }
 0xae5   :  { %6762 = vmatprep.mubr.msk.bf16.mxu0 %vm471_vm4, %v3458_v59 }
 0xae6   :  { %6763 = vmatmul.mubr.msk.bf16.vlgmr.msra.gmra.mxu0 %vm471_vm4, %v3459_v45 }
 0xae7   :  { %6783 = vmatpush3.bf16.msra.mxu0 %v8467_v60  ;;  %6766 = vmatprep.mubr.msk.bf16.mxu0 %vm471_vm4, %v3460_v33  ;;  %v3645_v60 = vpack.c.bf16 %v8493_v39, %v8479_v6 }
 0xae8   :  { %6784 = vmatprep.subr.bf16.mxu0 %v7113_v8 }
 0xaeb   :  { %6785 = vmatpush3.bf16.msra.mxu0 %v7113_v8 }
 0xaec   :  { %6806 = vmatprep.subr.bf16.mxu0 %v7116_v55 }
 0xaee   :  { %6767 = vmatmul.mubr.msk.bf16.gmra.mxu0 %vm471_vm4, %v3461_v10 }
 0xaef   :  { %6786 = vmatprep.mubr.msk.bf16.mxu0 %vm471_vm4, %v3644_v13 }
 0xaf6   :  { %6787 = vmatmul.mubr.msk.bf16.vlgmr.msra.gmra.mxu0 %vm471_vm4, %v3645_v60 }
 0xaf7   :  { %6790 = vmatprep.mubr.msk.bf16.mxu0 %vm471_vm4, %v3646_v5  ;;  %6807 = vmatpush3.bf16.msra.mxu0 %v7116_v55 }
 0xafe   :  { %6791 = vmatmul.mubr.msk.bf16.gmra.mxu0 %vm471_vm4, %v3647_v29 }
 0xb9b   :  { %v6776_v20 = vpop.f32.mrf.mxu1 }
 0xb9d   :  { %v3613_v25 = vpop.f32.mrf.mxu1 }
 0xb9f   :  { %v6777_v50 = vpop.f32.mrf.mxu1 }
 0xba1   :  { %v3616_v26 = vpop.f32.mrf.mxu1 }
 0xba3   :  { %v6780_v56 = vpop.f32.mrf.mxu1 }
 0xba5   :  { %v3629_v43 = vpop.f32.mrf.mxu1 }
 0xba6   :  { %v6764_v14 = vpop.f32.mrf.mxu0 }
 0xba7   :  { %v3622_v51 = vadd.f32 %v6776_v20, %v6764_v14  ;;  %v6781_v45 = vpop.f32.mrf.mxu1 }
 0xba8   :  { %v3524_v16 = vpop.f32.mrf.mxu0 }
 0xba9   :  { %v3614_v41 = vadd.f32 %v3613_v25, %v3524_v16  ;;  %v3632_v55 = vpop.f32.mrf.mxu1 }
 0xbaa   :  { %v6765_v19 = vpop.f32.mrf.mxu0 }
 0xbab   :  { %v3625_v27 = vadd.f32 %v6777_v50, %v6765_v19 }
 0xbac   :  { %v3527_v36 = vpop.f32.mrf.mxu0 }
 0xbad   :  { %v3617_v48 = vadd.f32 %v3616_v26, %v3527_v36 }
 0xbae   :  { %v6768_v9 = vpop.f32.mrf.mxu0 }
 0xbaf   :  { %v3638_v10 = vadd.f32 %v6780_v56, %v6768_v9 }
 0xbb0   :  { %v3540_v22 = vpop.f32.mrf.mxu0 }
 0xbb1   :  { %v3630_v62 = vadd.f32 %v3629_v43, %v3540_v22 }
 0xbb2   :  { %v6769_v15 = vpop.f32.mrf.mxu0 }
 0xbb3   :  { %v3641_v5 = vadd.f32 %v6781_v45, %v6769_v15 }
 0xbb4   :  { %v3543_v53 = vpop.f32.mrf.mxu0 }
 0xbb5   :  { %v3633_v25 = vadd.f32 %v3632_v55, %v3543_v53  ;;  %v7117_v53 = vld [vmem:[#allocation16] sm:$0xff]  }
 0xbb6   :  { %v6788_v54 = vpop.f32.mrf.mxu0  ;;  %6808 = vmatprep.subr.bf16.mxu0 %v7117_v53 }
 0xbb7   :  { %v3743_v47 = vadd.f32 %v6788_v54, %v3622_v51  ;;  %6809 = vmatpush3.bf16.msra.mxu0 %v7117_v53  ;;  %v6100_v53 = vld [vmem:[%s9063_s13] ss:$0 sm:$0xff] }
 0xbb8   :  { %v3710_v34 = vpop.f32.mrf.mxu0 }
 0xbb9   :  { %v3741_v40 = vadd.f32 %v3710_v34, %v3614_v41  ;;  %v3758_v8 = vadd.f32 %v6092_v24, %v3743_v47  ;;  %v7118_v47 = vld [vmem:[%s9058_s8 + $0x8] sm:$0xff]  }
 0xbba   :  { %v6789_v21 = vpop.f32.mrf.mxu0  ;;  %6842 = vmatprep.subr.bf16.mxu0 %v7118_v47 }
 0xbbb   :  { %v3744_v37 = vadd.f32 %v6789_v21, %v3625_v27  ;;  %v3756_v38 = vadd.f32 %v6092_v24, %v3741_v40  ;;  %v3766_v20 = vmax.f32 %v3758_v8, 0.0  ;;  %v7120_v21 = vld [vmem:[%s9066_s16 + $0x38] sm:$0xff]  }
 0xbbc   :  { %v3713_v31 = vpop.f32.mrf.mxu0  ;;  %6818 = vmatprep.subr.bf16.mxu1 %v7120_v21 }
 0xbbd   :  { %v3759_v59 = vadd.f32 %v6092_v24, %v3744_v37  ;;  %v3742_v33 = vadd.f32 %v3713_v31, %v3617_v48  ;;  %v3764_v29 = vmax.f32 %v3756_v38, 0.0  ;;  %v7121_v48 = vld [vmem:[%s9066_s16 + $0x30] sm:$0xff]   ;;  %v7123_v37 = vld [vmem:[%s9066_s16 + $0x20] sm:$0xff]   ;;  %v7124_v31 = vld [vmem:[%s9066_s16 + $0x18] sm:$0xff]  }
 0xbbe   :  { %v6792_v28 = vpop.f32.mrf.mxu0 }
 0xbbf   :  { %v3757_v57 = vadd.f32 %v6092_v24, %v3742_v33  ;;  %v3767_v13 = vmax.f32 %v3759_v59, 0.0  ;;  %v3747_v14 = vadd.f32 %v6792_v28, %v3638_v10  ;;  %v6093_v59 = vld [vmem:[#allocation12 + $0x2] ss:$0 sm:$0xff] }
 0xbc0   :  { %v3726_v60 = vpop.f32.mrf.mxu0 }
 0xbc1   :  { %v3765_v63 = vmax.f32 %v3757_v57, 0.0  ;;  %v3745_v7 = vadd.f32 %v3726_v60, %v3630_v62  ;;  %v3773_v50 = vpack.c.bf16 %v3767_v13, %v3766_v20  ;;  %v3762_v9 = vadd.f32 %v6092_v24, %v3747_v14 }
 0xbc2   :  { %v6793_v16 = vpop.f32.mrf.mxu0 }
 0xbc3   :  { %v3772_v19 = vpack.c.bf16 %v3765_v63, %v3764_v29  ;;  %v3748_v36 = vadd.f32 %v6793_v16, %v3641_v5  ;;  %v3760_v54 = vadd.f32 %v6092_v24, %v3745_v7  ;;  %v3770_v27 = vmax.f32 %v3762_v9, 0.0 }
 0xbc4   :  { %v3729_v26 = vpop.f32.mrf.mxu0 }
 0xbc5   :  { %v3763_v41 = vadd.f32 %v6092_v24, %v3748_v36  ;;  %v3746_v22 = vadd.f32 %v3729_v26, %v3633_v25  ;;  %6798 = vmatprep.mubr.msk.bf16.mxu1 %vm471_vm4, %v3772_v19  ;;  %v3768_v51 = vmax.f32 %v3760_v54, 0.0 }
 0xbc6   :  { %6799 = vmatmul.mubr.msk.bf16.vlgmr.msra.gmra.mxu1 %vm471_vm4, %v3773_v50 }
 0xbc7   :  { %v3761_v15 = vadd.f32 %v6092_v24, %v3746_v22  ;;  %v3771_v56 = vmax.f32 %v3763_v41, 0.0  ;;  %6819 = vmatpush3.bf16.msra.mxu1 %v7120_v21  ;;  %v7122_v24 = vld [vmem:[%s9066_s16 + $0x28] sm:$0xff]  }
 0xbc8   :  { %6820 = vmatprep.subr.bf16.mxu1 %v7121_v48 }
 0xbc9   :  { %v3769_v34 = vmax.f32 %v3761_v15, 0.0  ;;  %v3775_v43 = vpack.c.bf16 %v3771_v56, %v3770_v27  ;;  %v7127_v27 = vld [vmem:[%s9066_s16] sm:$0xff]  }
 0xbcb   :  { %v3774_v40 = vpack.c.bf16 %v3769_v34, %v3768_v51  ;;  %6821 = vmatpush3.bf16.msra.mxu1 %v7121_v48 }
 0xbcc   :  { %6822 = vmatprep.subr.bf16.mxu1 %v7122_v24 }
 0xbcd   :  { %6802 = vmatprep.mubr.msk.bf16.mxu1 %vm471_vm4, %v3774_v40 }
 0xbce   :  { %6803 = vmatmul.mubr.msk.bf16.gmra.mxu1 %vm471_vm4, %v3775_v43 }
 0xbcf   :  { %6823 = vmatpush3.bf16.msra.mxu1 %v7122_v24 }
 0xbd0   :  { %6824 = vmatprep.subr.bf16.mxu1 %v7123_v37 }
 0xbd3   :  { %6825 = vmatpush3.bf16.msra.mxu1 %v7123_v37 }
 0xbd4   :  { %6826 = vmatprep.subr.bf16.mxu1 %v7124_v31 }
 0xbd7   :  { %6827 = vmatpush3.bf16.msra.mxu1 %v7124_v31 }
 0xc86   :  { %v6800_v38 = vpop.f32.mrf.mxu1 }
 0xc87   :  { %v3854_v8 = vadd.f32 %v6800_v38, %v6093_v59 }
 0xc88   :  { %v3845_v33 = vpop.f32.mrf.mxu1 }
 0xc89   :  { %v3846_v45 = vadd.f32 %v6093_v59, %v3845_v33  ;;  %v3878_v5 = vadd.f32 %v3854_v8, %v8479_v6  ;;  %v7119_v6 = vld [vmem:[%s9058_s8] sm:$0xff]  }
 0xc8a   :  { %v6801_v28 = vpop.f32.mrf.mxu1 }
 0xc8b   :  { %v3857_v62 = vadd.f32 %v6801_v28, %v6093_v59  ;;  %v3876_v10 = vadd.f32 %v3846_v45, %v8473_v52  ;;  %v3886_v25 = vmul.f32 %v3878_v5, %v8328_v23 }
 0xc8c   :  { %v3848_v57 = vpop.f32.mrf.mxu1 }
 0xc8d   :  { %v3879_v13 = vadd.f32 %v3857_v62, %v8493_v39  ;;  %v3849_v60 = vadd.f32 %v6093_v59, %v3848_v57  ;;  %v3884_v20 = vmul.f32 %v3876_v10, %v8322_v11 }
 0xc8e   :  { %v6804_v29 = vpop.f32.mrf.mxu1 }
 0xc8f   :  { %v3877_v63 = vadd.f32 %v3849_v60, %v8482_v61  ;;  %v3887_v7 = vmul.f32 %v3879_v13, %v8333_v49  ;;  %v3870_v19 = vadd.f32 %v6804_v29, %v6093_v59 }
 0xc90   :  { %v3861_v55 = vpop.f32.mrf.mxu1 }
 0xc91   :  { %v3885_v14 = vmul.f32 %v3877_v63, %v8326_v58  ;;  %v3862_v16 = vadd.f32 %v6093_v59, %v3861_v55  ;;  %v3893_v50 = vpack.c.bf16 %v3887_v7, %v3886_v25  ;;  %v3882_v22 = vadd.f32 %v3870_v19, %v8507_v42  ;;  %v7125_v42 = vld [vmem:[%s9066_s16 + $0x10] sm:$0xff]   ;;  %v6116_v63 = vld [vmem:[#allocation13] ss:$0 sm:$0xff] }
 0xc92   :  { %v6805_v52 = vpop.f32.mrf.mxu1  ;;  %6828 = vmatprep.subr.bf16.mxu1 %v7125_v42 }
 0xc93   :  { %v3892_v36 = vpack.c.bf16 %v3885_v14, %v3884_v20  ;;  %v3873_v39 = vadd.f32 %v6805_v52, %v6093_v59  ;;  %v3880_v61 = vadd.f32 %v3862_v16, %v8496_v17  ;;  %v3890_v17 = vmul.f32 %v3882_v22, %v8372_v12  ;;  %6829 = vmatpush3.bf16.msra.mxu1 %v7125_v42 }
 0xc94   :  { %v3864_v26 = vpop.f32.mrf.mxu1 }
 0xc95   :  { %v3883_v54 = vadd.f32 %v3873_v39, %v8502_v35  ;;  %v3865_v41 = vadd.f32 %v6093_v59, %v3864_v26  ;;  %6810 = vmatprep.mubr.msk.bf16.mxu0 %vm471_vm4, %v3892_v36  ;;  %v3888_v56 = vmul.f32 %v3880_v61, %v8342_v18 }
 0xc96   :  { %6811 = vmatmul.mubr.msk.bf16.vlgmr.msra.gmra.mxu0 %vm471_vm4, %v3893_v50 }
 0xc97   :  { %v3881_v9 = vadd.f32 %v3865_v41, %v8511_v30  ;;  %6843 = vmatpush3.bf16.msra.mxu0 %v7118_v47  ;;  %v3891_v15 = vmul.f32 %v3883_v54, %v8324_v46  ;;  %v7126_v30 = vld [vmem:[%s9066_s16 + $0x8] sm:$0xff]   ;;  %v6107_v41 = vld [vmem:[%s9068_s18] ss:$0 sm:$0xff]  ;;  %s8643_s18 = smov 0  }
 0xc98   :  { %6844 = vmatprep.subr.bf16.mxu0 %v7119_v6  ;;  %6830 = vmatprep.subr.bf16.mxu1 %v7126_v30 }
 0xc99   :  { %v3889_v51 = vmul.f32 %v3881_v9, %v8370_v32  ;;  %v3895_v34 = vpack.c.bf16 %v3891_v15, %v3890_v17  ;;  %6831 = vmatpush3.bf16.msra.mxu1 %v7126_v30 }
 0xc9a   :  { %6832 = vmatprep.subr.bf16.mxu1 %v7127_v27 }
 0xc9b   :  { %v3894_v35 = vpack.c.bf16 %v3889_v51, %v3888_v56  ;;  %6845 = vmatpush3.bf16.msra.mxu0 %v7119_v6 }
 0xc9d   :  { %6814 = vmatprep.mubr.msk.bf16.mxu0 %vm471_vm4, %v3894_v35  ;;  %6833 = vmatpush3.bf16.msra.mxu1 %v7127_v27 }
 0xc9e   :  { %6815 = vmatmul.mubr.msk.bf16.gmra.mxu0 %vm471_vm4, %v3895_v34 }
 0xc9f   :  { %6846 = vmatprep.mubr.msk.bf16.mxu0 %vm471_vm4, %v3892_v36 }
 0xca6   :  { %6847 = vmatmul.mubr.msk.bf16.vlgmr.msra.gmra.mxu0 %vm471_vm4, %v3893_v50 }
 0xca7   :  { %6850 = vmatprep.mubr.msk.bf16.mxu0 %vm471_vm4, %v3894_v35 }
 0xcae   :  { %6851 = vmatmul.mubr.msk.bf16.gmra.mxu0 %vm471_vm4, %v3895_v34 }
 0xd56   :  { %v6812_v40 = vpop.f32.mrf.mxu0 }
 0xd57   :  { %v3974_v24 = vadd.f32 %v6812_v40, %v6100_v53 }
 0xd58   :  { %v3965_v43 = vpop.f32.mrf.mxu0 }
 0xd59   :  { %v3966_v21 = vadd.f32 %v6100_v53, %v3965_v43  ;;  %v3998_v8 = vmul.f32 %v3974_v24, %v8328_v23 }
 0xd5a   :  { %v6813_v47 = vpop.f32.mrf.mxu0 }
 0xd5b   :  { %v3977_v48 = vadd.f32 %v6813_v47, %v6100_v53  ;;  %v3996_v33 = vmul.f32 %v3966_v21, %v8322_v11 }
 0xd5c   :  { %v3968_v37 = vpop.f32.mrf.mxu0 }
 0xd5d   :  { %v3969_v31 = vadd.f32 %v6100_v53, %v3968_v37  ;;  %v3999_v38 = vmul.f32 %v3977_v48, %v8333_v49  ;;  %v8641_v48 = vmov 0.0  }
 0xd5e   :  { %v6816_v59 = vpop.f32.mrf.mxu0 }
 0xd5f   :  { %v3997_v45 = vmul.f32 %v3969_v31, %v8326_v58  ;;  %v4005_v57 = vpack.c.bf16 %v3999_v38, %v3998_v8  ;;  %v3990_v5 = vadd.f32 %v6816_v59, %v6100_v53 }
 0xd60   :  { %v3981_v28 = vpop.f32.mrf.mxu0 }
 0xd61   :  { %v4004_v62 = vpack.c.bf16 %v3997_v45, %v3996_v33  ;;  %v3982_v13 = vadd.f32 %v6100_v53, %v3981_v28  ;;  %v4002_v20 = vmul.f32 %v3990_v5, %v8372_v12 }
 0xd62   :  { %v6817_v10 = vpop.f32.mrf.mxu0 }
 0xd63   :  { %v3993_v60 = vadd.f32 %v6817_v10, %v6100_v53  ;;  %6834 = vmatprep.mubr.bf16.mxu1 %v4004_v62  ;;  %v4000_v11 = vmul.f32 %v3982_v13, %v8342_v18 }
 0xd64   :  { %v3984_v29 = vpop.f32.mrf.mxu0  ;;  %6835 = vmatmul.mubr.bf16.vlgmr.msra.gmra.mxu1 %v4005_v57 }
 0xd65   :  { %v3985_v7 = vadd.f32 %v6100_v53, %v3984_v29  ;;  %v4003_v49 = vmul.f32 %v3993_v60, %v8324_v46 }
 0xd66   :  { %v6848_v55 = vpop.f32.mrf.mxu0 }
 0xd67   :  { %v4001_v58 = vmul.f32 %v3985_v7, %v8370_v32  ;;  %v4219_v23 = vadd.f32 %v6848_v55, %v6116_v63  ;;  %v4007_v19 = vpack.c.bf16 %v4003_v49, %v4002_v20 }
 0xd68   :  { %v4210_v14 = vpop.f32.mrf.mxu0 }
 0xd69   :  { %4243 = vst.msk [vmem:[#allocation2 + $0x50] sm:$0xff] %vm2267_vm6, %v4219_v23  ;;  %v4211_v16 = vadd.f32 %v6116_v63, %v4210_v14  ;;  %v4006_v25 = vpack.c.bf16 %v4001_v58, %v4000_v11 }
 0xd6a   :  { %v6849_v52 = vpop.f32.mrf.mxu0 }
 0xd6b   :  { %4241 = vst.msk [vmem:[#allocation2 + $0x40] sm:$0xff] %vm2267_vm6, %v4211_v16  ;;  %v4222_v36 = vadd.f32 %v6849_v52, %v6116_v63  ;;  %6838 = vmatprep.mubr.bf16.mxu1 %v4006_v25 }
 0xd6c   :  { %6839 = vmatmul.mubr.bf16.gmra.mxu1 %v4007_v19  ;;  %v4213_v46 = vpop.f32.mrf.mxu0 }
 0xd6d   :  { %4244 = vst.msk [vmem:[#allocation2 + $0x58] sm:$0xff] %vm2267_vm6, %v4222_v36  ;;  %v4214_v18 = vadd.f32 %v6116_v63, %v4213_v46 }
 0xd6e   :  { %v6852_v32 = vpop.f32.mrf.mxu0 }
 0xd6f   :  { %4242 = vst.msk [vmem:[#allocation2 + $0x48] sm:$0xff] %vm2267_vm6, %v4214_v18  ;;  %v4235_v12 = vadd.f32 %v6852_v32, %v6116_v63 }
 0xd70   :  { %v4226_v39 = vpop.f32.mrf.mxu0 }
 0xd71   :  { %4247 = vst.msk [vmem:[#allocation2 + $0x70] sm:$0xff] %vm2267_vm6, %v4235_v12  ;;  %v4227_v50 = vadd.f32 %v6116_v63, %v4226_v39 }
 0xd72   :  { %v6853_v26 = vpop.f32.mrf.mxu0 }
 0xd73   :  { %4245 = vst.msk [vmem:[#allocation2 + $0x60] sm:$0xff] %vm2267_vm6, %v4227_v50  ;;  %v4238_v6 = vadd.f32 %v6853_v26, %v6116_v63 }
 0xd74   :  { %v4229_v61 = vpop.f32.mrf.mxu0 }
 0xd75   :  { %4248 = vst.msk [vmem:[#allocation2 + $0x78] sm:$0xff] %vm2267_vm6, %v4238_v6  ;;  %v4230_v54 = vadd.f32 %v6116_v63, %v4229_v61 }
 0xd77   :  { %4246 = vst.msk [vmem:[#allocation2 + $0x68] sm:$0xff] %vm2267_vm6, %v4230_v54 }
 0xe24   :  { %v6836_v22 = vpop.f32.mrf.mxu1 }
 0xe25   :  { %v4122_v9 = vadd.f32 %v6836_v22, %v6107_v41 }
 0xe26   :  { %v4113_v15 = vpop.f32.mrf.mxu1 }
 0xe27   :  { %4147 = vst [vmem:[#allocation19 + $0x50] sm:$0xff] %v4122_v9  ;;  %v4114_v56 = vadd.f32 %v6107_v41, %v4113_v15 }
 0xe28   :  { %v6837_v51 = vpop.f32.mrf.mxu1 }
 0xe29   :  { %4145 = vst [vmem:[#allocation19 + $0x40] sm:$0xff] %v4114_v56  ;;  %v4125_v17 = vadd.f32 %v6837_v51, %v6107_v41 }
 0xe2a   :  { %v4116_v35 = vpop.f32.mrf.mxu1 }
 0xe2b   :  { %4148 = vst [vmem:[#allocation19 + $0x58] sm:$0xff] %v4125_v17  ;;  %v4117_v34 = vadd.f32 %v6107_v41, %v4116_v35 }
 0xe2c   :  { %v6840_v42 = vpop.f32.mrf.mxu1 }
 0xe2d   :  { %4146 = vst [vmem:[#allocation19 + $0x48] sm:$0xff] %v4117_v34  ;;  %v4138_v30 = vadd.f32 %v6840_v42, %v6107_v41 }
 0xe2e   :  { %v4129_v27 = vpop.f32.mrf.mxu1 }
 0xe2f   :  { %4151 = vst [vmem:[#allocation19 + $0x70] sm:$0xff] %v4138_v30  ;;  %v4130_v40 = vadd.f32 %v6107_v41, %v4129_v27 }
 0xe30   :  { %v6841_v43 = vpop.f32.mrf.mxu1 }
 0xe31   :  { %4149 = vst [vmem:[#allocation19 + $0x60] sm:$0xff] %v4130_v40  ;;  %v4141_v53 = vadd.f32 %v6841_v43, %v6107_v41 }
 0xe32   :  { %v4132_v47 = vpop.f32.mrf.mxu1 }
 0xe33   :  { %4152 = vst [vmem:[#allocation19 + $0x78] sm:$0xff] %v4141_v53  ;;  %v4133_v21 = vadd.f32 %v6107_v41, %v4132_v47 }
 0xe35   :  { %4150 = vst [vmem:[#allocation19 + $0x68] sm:$0xff] %v4133_v21 }
 0xe36 LB: > { %v7454_v24 = vmov 0.0   ;;  %vm7455_vm7 = vmmov 0   ;;  %s7456_s10 = smov 96   ;;  %s7457_s6 = smov 64   ;;  %vm4270_vm8 = vcmask 1040384   ;;  %vm5136_vm9 = vcmask 1041408   ;;  %s7436_s18 = sphi %s8643_s18, %s4259_s18   ;;  %v7432_v48 = vphi %v8641_v48, %v5119_v48  }
 0xe37   : > { %6854 = vmatprep.subr.mxu0 %v7454_v24  ;;  %6862 = vmatprep.mubr.msk.f32.mxu0 %vm7455_vm7, %v7454_v24  ;;  %s6123_s9 = sshll.u32 %s7436_s18, 3  ;;  %vm5138_vm10 = vcmask 1042432   ;;  %vm5141_vm11 = vcmask 1044480   ;;  %vm5143_vm12 = vcmask 1045504   ;;  %vm5145_vm13 = vcmask 1046528   ;;  %s4259_s18 = sadd.s32 1, %s7436_s18  }
 0xe38   : > { %4279 = vrot.lane.b32.xlu0 %v7432_v48, %s7456_s10  ;;  %6855 = vmatpush3.msra.mxu0 %v7610_v3  ;;  %s4262_s1 = scalar_lea.vmem [#allocation2], %s6123_s9  ;;  %s5151_s23 = scalar_lea.vmem [#allocation3], %s6123_s9 }
 0xe39   : > { %6856 = vmatprep.subr.mxu0 %v7454_v24  ;;  %6865 = vmatprep.subr.mxu1 %v7454_v24  ;;  %v8691_v33 = vld [vmem:[%s4262_s1 + $0x40] sm:$0xff]  ;;  %p4256_p3 = scmp.ge.s32.totalorder %s4259_s18, 8  }
 0xe3a   : > { %6857 = vmatpush3.msra.mxu0 %v7608_v2  ;;  %6866 = vmatpush3.msra.mxu1 %v7610_v3  ;;  %v4268_v45 = vrot.slane %v8691_v33, 7  ;;  %v8694_v8 = vld [vmem:[%s4262_s1] sm:$0xff]  ;;  %v4486_v30 = vrot.slane %v8691_v33, 1  ;;  %s9085_s26 = sld [smem:[#allocation30_spill]] (%p4256_p3) }
 0xe3b   : > { %6858 = vmatprep.subr.mxu0 %v7454_v24  ;;  %6867 = vmatprep.subr.mxu1 %v7454_v24  ;;  %v4380_v52 = vrot.slane %v8694_v8, 1  ;;  %v4484_v42 = vrot.slane %v8694_v8, 2 }
 0xe3c   : > { %6859 = vmatpush3.msra.mxu0 %v7606_v1  ;;  %6868 = vmatpush3.msra.mxu1 %v7608_v2  ;;  %v4271_v28 = vsel %vm4270_vm8, %v8694_v8, %v4268_v45 }
 0xe3d   : > { %6860 = vmatprep.subr.mxu0 %v7454_v24  ;;  %6869 = vmatprep.subr.mxu1 %v7454_v24  ;;  %v4382_v36 = vsel %vm4270_vm8, %v4380_v52, %v8691_v33  ;;  %v4488_v27 = vsel %vm4270_vm8, %v4484_v42, %v4486_v30 }
 0xe3e   : > { %6861 = vmatpush3.msra.mxu0 %v7604_v0  ;;  %6870 = vmatpush3.msra.mxu1 %v7606_v1 }
 0xe3f   : > { %6871 = vmatprep.subr.mxu1 %v7454_v24  ;;  %6873 = vmatprep.mubr.msk.f32.mxu1 %vm7455_vm7, %v7454_v24 }
 0xe40   : > { %6872 = vmatpush3.msra.mxu1 %v7604_v0  ;;  %6876 = vmatprep.subr.mxu0 %v7454_v24 }
 0xe41   : > { %6887 = vmatprep.subr.mxu1 %v7454_v24  ;;  %7177 = vset.pattern.permute.xlu1 (%p4256_p3), %v7453_v44 }
 0xe42   :  { %7176 = vset.pattern.permute.xlu0 (%p4256_p3), %v7453_v44 }
 0xeaa   : > { %v4280_v37 = vpop.permute.xlu0 %4279 }
 0xeab   : > { %6863 = vmatmul.mubr.msk.f32.vlgmr.msra.gmra.mxu0 %vm471_vm4, %v4280_v37 }
 0xeac   : > { %6877 = vmatpush3.msra.mxu0 %v7610_v3  ;;  %6884 = vmatprep.mubr.msk.f32.mxu0 %vm7455_vm7, %v7454_v24 }
 0xead   : > { %6878 = vmatprep.subr.mxu0 %v7454_v24 }
 0xeae   : > { %6879 = vmatpush3.msra.mxu0 %v7608_v2 }
 0xeaf   : > { %6880 = vmatprep.subr.mxu0 %v7454_v24 }
 0xeb0   : > { %6881 = vmatpush3.msra.mxu0 %v7606_v1 }
 0xeb1   : > { %6882 = vmatprep.subr.mxu0 %v7454_v24 }
 0xeb2   : > { %6883 = vmatpush3.msra.mxu0 %v7604_v0 }
 0xeb3   : > { %6898 = vmatprep.subr.mxu0 %v7454_v24 }
 0xf6b   : > { %v4349_v31 = vpop.f32.mrf.mxu0 }
 0xf6c   : > { %v4350_v38 = vadd.f32 %v7615_v4, %v4349_v31 }
 0xf6d   : > { %v6864_v59 = vpop.f32.mrf.mxu0 }
 0xf6e   : > { %4361 = vrot.lane.b32.xlu0 %v4350_v38, %s7457_s6  ;;  %v4353_v62 = vadd.f32 %v4350_v38, %v4271_v28 }
 0xf70   : > { %v6128_v57 = vmul.f32 -1.442695, %v4353_v62 }
 0xf72   : > { %7128 = vpow2.f32 %v6128_v57 }
 0xf7f   : > { %v7129_v10 = vpop.eup %7128 }
 0xf80   : > { %v4357_v13 = vadd.f32 1.0, %v7129_v10 }
 0xf82   : > { %7130 = vrcp.f32 %v4357_v13 }
 0xf8f   : > { %v7131_v60 = vpop.eup %7130 }
 0xf90   : > { %v4371_v55 = vsub.f32 1.0, %v7131_v60  ;;  %v4377_v58 = vmul.f32 %v7432_v48, %v7131_v60 }
 0xfe0   : > { %v4362_v5 = vpop.permute.xlu0 %4361 }
 0xfe1   : > { %v4364_v29 = vmul.f32 %v7131_v60, %v4362_v5 }
 0xfe3   : > { %4366 = vrot.lane.b32.xlu1 %v4364_v29, %s7457_s6 }
0x1055   : > { %v4367_v63 = vpop.permute.xlu1 %4366 }
0x1056   : > { %v4369_v7 = vadd.f32 %v4367_v63, %v4271_v28  ;;  %v4590_v63 = vrot.slane %v8694_v8, 3 }
0x1058   : > { %7132 = vtanh.f32 %v4369_v7  ;;  %v4592_v7 = vrot.slane %v8691_v33, 2 }
0x1065   : > { %v7133_v49 = vpop.eup %7132 }
0x1066   : > { %4373 = vrot.lane.b32.xlu1 %v7133_v49, %s7456_s10  ;;  %v4594_v49 = vsel %vm4270_vm8, %v4590_v63, %v4592_v7 }
0x10d8   : > { %v4374_v11 = vpop.permute.xlu1 %4373 }
0x10d9   : > { %v4376_v23 = vmul.f32 %v4374_v11, %v4371_v55 }
0x10db   : > { %v8701_v20 = vadd.f32 %v4377_v58, %v4376_v23 }
0x10dd   : > { %4384 = vrot.lane.b32.xlu0 %v8701_v20, %s7456_s10 }
0x114f   : > { %v4385_v14 = vpop.permute.xlu0 %4384 }
0x1150   : > { %6874 = vmatmul.mubr.msk.f32.vlgmr.msra.gmra.mxu1 %vm471_vm4, %v4385_v14 }
0x1151   : > { %6888 = vmatpush3.msra.mxu1 %v7610_v3  ;;  %6895 = vmatprep.mubr.msk.f32.mxu1 %vm7455_vm7, %v7454_v24 }
0x1152   : > { %6889 = vmatprep.subr.mxu1 %v7454_v24 }
0x1153   : > { %6890 = vmatpush3.msra.mxu1 %v7608_v2 }
0x1154   : > { %6891 = vmatprep.subr.mxu1 %v7454_v24 }
0x1155   : > { %6892 = vmatpush3.msra.mxu1 %v7606_v1 }
0x1156   : > { %6893 = vmatprep.subr.mxu1 %v7454_v24 }
0x1157   : > { %6894 = vmatpush3.msra.mxu1 %v7604_v0 }
0x1158   : > { %6909 = vmatprep.subr.mxu1 %v7454_v24 }
0x1210   : > { %v4454_v16 = vpop.f32.mrf.mxu1 }
0x1211   : > { %v4455_v25 = vadd.f32 %v7615_v4, %v4454_v16 }
0x1212   : > { %v6875_v19 = vpop.f32.mrf.mxu1 }
0x1213   : > { %4466 = vrot.lane.b32.xlu1 %v4455_v25, %s7457_s6  ;;  %v4458_v46 = vadd.f32 %v4455_v25, %v4382_v36 }
0x1215   : > { %v6130_v18 = vmul.f32 -1.442695, %v4458_v46 }
0x1217   : > { %7134 = vpow2.f32 %v6130_v18 }
0x1224   : > { %v7135_v32 = vpop.eup %7134 }
0x1225   : > { %v4462_v12 = vadd.f32 1.0, %v7135_v32 }
0x1227   : > { %7136 = vrcp.f32 %v4462_v12 }
0x1234   : > { %v7137_v39 = vpop.eup %7136 }
0x1235   : > { %v4476_v41 = vsub.f32 1.0, %v7137_v39  ;;  %v4482_v9 = vmul.f32 %v7137_v39, %v8701_v20 }
0x1285   : > { %v4467_v50 = vpop.permute.xlu1 %4466 }
0x1286   : > { %v4469_v26 = vmul.f32 %v7137_v39, %v4467_v50 }
0x1288   : > { %4471 = vrot.lane.b32.xlu0 %v4469_v26, %s7457_s6 }
0x12fa   : > { %v4472_v6 = vpop.permute.xlu0 %4471 }
0x12fb   : > { %v4474_v61 = vadd.f32 %v4472_v6, %v4382_v36 }
0x12fd   : > { %7138 = vtanh.f32 %v4474_v61 }
0x130a   : > { %v7139_v54 = vpop.eup %7138 }
0x130b   : > { %4478 = vrot.lane.b32.xlu1 %v7139_v54, %s7456_s10  ;;  %v4696_v54 = vrot.slane %v8694_v8, 4 }
0x137d   : > { %v4479_v22 = vpop.permute.xlu1 %4478 }
0x137e   : > { %v4481_v15 = vmul.f32 %v4479_v22, %v4476_v41  ;;  %v4698_v41 = vrot.slane %v8691_v33, 3 }
0x1380   : > { %v8724_v56 = vadd.f32 %v4482_v9, %v4481_v15  ;;  %v4700_v22 = vsel %vm4270_vm8, %v4696_v54, %v4698_v41 }
0x1382   : > { %4490 = vrot.lane.b32.xlu0 %v8724_v56, %s7456_s10 }
0x13f4   : > { %v4491_v51 = vpop.permute.xlu0 %4490 }
0x13f5   : > { %6885 = vmatmul.mubr.msk.f32.vlgmr.msra.gmra.mxu0 %vm471_vm4, %v4491_v51 }
0x13f6   : > { %6899 = vmatpush3.msra.mxu0 %v7610_v3  ;;  %6906 = vmatprep.mubr.msk.f32.mxu0 %vm7455_vm7, %v7454_v24 }
0x13f7   : > { %6900 = vmatprep.subr.mxu0 %v7454_v24 }
0x13f8   : > { %6901 = vmatpush3.msra.mxu0 %v7608_v2 }
0x13f9   : > { %6902 = vmatprep.subr.mxu0 %v7454_v24 }
0x13fa   : > { %6903 = vmatpush3.msra.mxu0 %v7606_v1 }
0x13fb   : > { %6904 = vmatprep.subr.mxu0 %v7454_v24 }
0x13fc   : > { %6905 = vmatpush3.msra.mxu0 %v7604_v0 }
0x13fd   : > { %6920 = vmatprep.subr.mxu0 %v7454_v24 }
0x14b5   : > { %v4560_v17 = vpop.f32.mrf.mxu0 }
0x14b6   : > { %v4561_v35 = vadd.f32 %v7615_v4, %v4560_v17 }
0x14b7   : > { %v6886_v34 = vpop.f32.mrf.mxu0 }
0x14b8   : > { %4572 = vrot.lane.b32.xlu1 %v4561_v35, %s7457_s6  ;;  %v4564_v40 = vadd.f32 %v4561_v35, %v4488_v27 }
0x14ba   : > { %v6132_v43 = vmul.f32 -1.442695, %v4564_v40 }
0x14bc   : > { %7140 = vpow2.f32 %v6132_v43 }
0x14c9   : > { %v7141_v53 = vpop.eup %7140 }
0x14ca   : > { %v4568_v47 = vadd.f32 1.0, %v7141_v53 }
0x14cc   : > { %7142 = vrcp.f32 %v4568_v47 }
0x14d9   : > { %v7143_v21 = vpop.eup %7142 }
0x14da   : > { %v4582_v45 = vsub.f32 1.0, %v7143_v21  ;;  %v4588_v62 = vmul.f32 %v7143_v21, %v8724_v56 }
0x152a   : > { %v4573_v48 = vpop.permute.xlu1 %4572 }
0x152b   : > { %v4575_v37 = vmul.f32 %v7143_v21, %v4573_v48 }
0x152d   : > { %4577 = vrot.lane.b32.xlu0 %v4575_v37, %s7457_s6 }
0x159f   : > { %v4578_v31 = vpop.permute.xlu0 %4577 }
0x15a0   : > { %v4580_v38 = vadd.f32 %v4578_v31, %v4488_v27 }
0x15a2   : > { %7144 = vtanh.f32 %v4580_v38 }
0x15af   : > { %v7145_v59 = vpop.eup %7144 }
0x15b0   : > { %4584 = vrot.lane.b32.xlu1 %v7145_v59, %s7456_s10 }
0x1622   : > { %v4585_v28 = vpop.permute.xlu1 %4584 }
0x1623   : > { %v4587_v57 = vmul.f32 %v4585_v28, %v4582_v45  ;;  %v4802_v45 = vrot.slane %v8694_v8, 5  ;;  %v4804_v28 = vrot.slane %v8691_v33, 4 }
0x1625   : > { %v8747_v10 = vadd.f32 %v4588_v62, %v4587_v57  ;;  %v4806_v62 = vsel %vm4270_vm8, %v4802_v45, %v4804_v28 }
0x1627   : > { %4596 = vrot.lane.b32.xlu0 %v8747_v10, %s7456_s10 }
0x1699   : > { %v4597_v13 = vpop.permute.xlu0 %4596 }
0x169a   : > { %6896 = vmatmul.mubr.msk.f32.vlgmr.msra.gmra.mxu1 %vm471_vm4, %v4597_v13 }
0x169b   : > { %6910 = vmatpush3.msra.mxu1 %v7610_v3  ;;  %6917 = vmatprep.mubr.msk.f32.mxu1 %vm7455_vm7, %v7454_v24 }
0x169c   : > { %6911 = vmatprep.subr.mxu1 %v7454_v24 }
0x169d   : > { %6912 = vmatpush3.msra.mxu1 %v7608_v2 }
0x169e   : > { %6913 = vmatprep.subr.mxu1 %v7454_v24 }
0x169f   : > { %6914 = vmatpush3.msra.mxu1 %v7606_v1 }
0x16a0   : > { %6915 = vmatprep.subr.mxu1 %v7454_v24 }
0x16a1   : > { %6916 = vmatpush3.msra.mxu1 %v7604_v0 }
0x16a2   : > { %6931 = vmatprep.subr.mxu1 %v7454_v24 }
0x175a   : > { %v4666_v60 = vpop.f32.mrf.mxu1 }
0x175b   : > { %v4667_v5 = vadd.f32 %v7615_v4, %v4666_v60 }
0x175c   : > { %v6897_v29 = vpop.f32.mrf.mxu1 }
0x175d   : > { %4678 = vrot.lane.b32.xlu1 %v4667_v5, %s7457_s6  ;;  %v4670_v55 = vadd.f32 %v4667_v5, %v4594_v49 }
0x175f   : > { %v6134_v11 = vmul.f32 -1.442695, %v4670_v55 }
0x1761   : > { %7146 = vpow2.f32 %v6134_v11 }
0x176e   : > { %v7147_v58 = vpop.eup %7146 }
0x176f   : > { %v4674_v23 = vadd.f32 1.0, %v7147_v58 }
0x1771   : > { %7148 = vrcp.f32 %v4674_v23 }
0x177e   : > { %v7149_v14 = vpop.eup %7148 }
0x177f   : > { %v4688_v46 = vsub.f32 1.0, %v7149_v14  ;;  %v4694_v32 = vmul.f32 %v7149_v14, %v8747_v10 }
0x17cf   : > { %v4679_v16 = vpop.permute.xlu1 %4678 }
0x17d0   : > { %v4681_v25 = vmul.f32 %v7149_v14, %v4679_v16 }
0x17d2   : > { %4683 = vrot.lane.b32.xlu0 %v4681_v25, %s7457_s6 }
0x1844   : > { %v4684_v19 = vpop.permute.xlu0 %4683 }
0x1845   : > { %v4686_v52 = vadd.f32 %v4684_v19, %v4594_v49 }
0x1847   : > { %7150 = vtanh.f32 %v4686_v52 }
0x1854   : > { %v7151_v36 = vpop.eup %7150 }
0x1855   : > { %4690 = vrot.lane.b32.xlu1 %v7151_v36, %s7456_s10 }
0x18c7   : > { %v4691_v18 = vpop.permute.xlu1 %4690 }
0x18c8   : > { %v4693_v12 = vmul.f32 %v4691_v18, %v4688_v46  ;;  %v4908_v46 = vrot.slane %v8694_v8, 6  ;;  %v4910_v18 = vrot.slane %v8691_v33, 5 }
0x18ca   : > { %v8770_v39 = vadd.f32 %v4694_v32, %v4693_v12  ;;  %v4912_v32 = vsel %vm4270_vm8, %v4908_v46, %v4910_v18 }
0x18cc   : > { %4702 = vrot.lane.b32.xlu0 %v8770_v39, %s7456_s10 }
0x193e   : > { %v4703_v50 = vpop.permute.xlu0 %4702 }
0x193f   : > { %6907 = vmatmul.mubr.msk.f32.vlgmr.msra.gmra.mxu0 %vm471_vm4, %v4703_v50 }
0x1940   : > { %6921 = vmatpush3.msra.mxu0 %v7610_v3  ;;  %6928 = vmatprep.mubr.msk.f32.mxu0 %vm7455_vm7, %v7454_v24 }
0x1941   : > { %6922 = vmatprep.subr.mxu0 %v7454_v24 }
0x1942   : > { %6923 = vmatpush3.msra.mxu0 %v7608_v2 }
0x1943   : > { %6924 = vmatprep.subr.mxu0 %v7454_v24 }
0x1944   : > { %6925 = vmatpush3.msra.mxu0 %v7606_v1 }
0x1945   : > { %6926 = vmatprep.subr.mxu0 %v7454_v24 }
0x1946   : > { %6927 = vmatpush3.msra.mxu0 %v7604_v0 }
0x19ff   : > { %v4772_v26 = vpop.f32.mrf.mxu0 }
0x1a00   : > { %v4773_v6 = vadd.f32 %v7615_v4, %v4772_v26 }
0x1a01   : > { %v6908_v61 = vpop.f32.mrf.mxu0 }
0x1a02   : > { %4784 = vrot.lane.b32.xlu1 %v4773_v6, %s7457_s6  ;;  %v4776_v9 = vadd.f32 %v4773_v6, %v4700_v22 }
0x1a04   : > { %v6136_v15 = vmul.f32 -1.442695, %v4776_v9 }
0x1a06   : > { %7152 = vpow2.f32 %v6136_v15 }
0x1a13   : > { %v7153_v51 = vpop.eup %7152 }
0x1a14   : > { %v4780_v17 = vadd.f32 1.0, %v7153_v51 }
0x1a16   : > { %7154 = vrcp.f32 %v4780_v17 }
0x1a23   : > { %v7155_v35 = vpop.eup %7154 }
0x1a24   : > { %v4794_v43 = vsub.f32 1.0, %v7155_v35  ;;  %v4800_v47 = vmul.f32 %v7155_v35, %v8770_v39 }
0x1a74   : > { %v4785_v34 = vpop.permute.xlu1 %4784 }
0x1a75   : > { %v4787_v42 = vmul.f32 %v7155_v35, %v4785_v34 }
0x1a77   : > { %4789 = vrot.lane.b32.xlu0 %v4787_v42, %s7457_s6 }
0x1ae9   : > { %v4790_v30 = vpop.permute.xlu0 %4789 }
0x1aea   : > { %v4792_v27 = vadd.f32 %v4790_v30, %v4700_v22 }
0x1aec   : > { %7156 = vtanh.f32 %v4792_v27 }
0x1af9   : > { %v7157_v40 = vpop.eup %7156 }
0x1afa   : > { %4796 = vrot.lane.b32.xlu1 %v7157_v40, %s7456_s10 }
0x1b6c   : > { %v4797_v53 = vpop.permute.xlu1 %4796 }
0x1b6d   : > { %v4799_v21 = vmul.f32 %v4797_v53, %v4794_v43  ;;  %v5014_v53 = vrot.slane %v8694_v8, 7  ;;  %v5153_v8 = vrot.slane %v8701_v20, 1 }
0x1b6f   : > { %v8792_v48 = vadd.f32 %v4800_v47, %v4799_v21  ;;  %v5016_v47 = vrot.slane %v8691_v33, 6  ;;  %v5120_v33 = vrot.slane %v8724_v56, 7 }
0x1b71   : > { %4808 = vrot.lane.b32.xlu0 %v8792_v48, %s7456_s10  ;;  %v5018_v21 = vsel %vm4270_vm8, %v5014_v53, %v5016_v47 }
0x1be3   : > { %v4809_v37 = vpop.permute.xlu0 %4808 }
0x1be4   : > { %6918 = vmatmul.mubr.msk.f32.vlgmr.msra.gmra.mxu1 %vm471_vm4, %v4809_v37 }
0x1be5   : > { %6932 = vmatpush3.msra.mxu1 %v7610_v3  ;;  %6939 = vmatprep.mubr.msk.f32.mxu1 %vm7455_vm7, %v7454_v24 }
0x1be6   : > { %6933 = vmatprep.subr.mxu1 %v7454_v24 }
0x1be7   : > { %6934 = vmatpush3.msra.mxu1 %v7608_v2 }
0x1be8   : > { %6935 = vmatprep.subr.mxu1 %v7454_v24 }
0x1be9   : > { %6936 = vmatpush3.msra.mxu1 %v7606_v1 }
0x1bea   : > { %6937 = vmatprep.subr.mxu1 %v7454_v24 }
0x1beb   : > { %6938 = vmatpush3.msra.mxu1 %v7604_v0 }
0x1ca4   : > { %v4878_v31 = vpop.f32.mrf.mxu1 }
0x1ca5   : > { %v4879_v38 = vadd.f32 %v7615_v4, %v4878_v31 }
0x1ca6   : > { %v6919_v59 = vpop.f32.mrf.mxu1 }
0x1ca7   : > { %4890 = vrot.lane.b32.xlu1 %v4879_v38, %s7457_s6  ;;  %v4882_v57 = vadd.f32 %v4879_v38, %v4806_v62 }
0x1ca9   : > { %v6138_v13 = vmul.f32 -1.442695, %v4882_v57 }
0x1cab   : > { %7158 = vpow2.f32 %v6138_v13 }
0x1cb8   : > { %v7159_v60 = vpop.eup %7158 }
0x1cb9   : > { %v4886_v5 = vadd.f32 1.0, %v7159_v60 }
0x1cbb   : > { %7160 = vrcp.f32 %v4886_v5  ;;  %v5155_v5 = vrot.slane %v8747_v10, 7 }
0x1cc8   : > { %v7161_v24 = vpop.eup %7160 }
0x1cc9   : > { %v4900_v11 = vsub.f32 1.0, %v7161_v24  ;;  %v4906_v23 = vmul.f32 %v7161_v24, %v8792_v48 }
0x1d19   : > { %v4891_v29 = vpop.permute.xlu1 %4890 }
0x1d1a   : > { %v4893_v63 = vmul.f32 %v7161_v24, %v4891_v29  ;;  %v5167_v24 = vsel %vm4270_vm8, %v5153_v8, %v8724_v56  ;;  %v5122_v29 = vrot.slane %v8747_v10, 6 }
0x1d1c   : > { %4895 = vrot.lane.b32.xlu0 %v4893_v63, %s7457_s6  ;;  %v5124_v63 = vrot.slane %v8770_v39, 5 }
0x1d8e   : > { %v4896_v7 = vpop.permute.xlu0 %4895 }
0x1d8f   : > { %v4898_v49 = vadd.f32 %v4896_v7, %v4806_v62  ;;  %v5157_v7 = vrot.slane %v8770_v39, 6 }
0x1d91   : > { %7162 = vtanh.f32 %v4898_v49 }
0x1d9e   : > { %v7163_v55 = vpop.eup %7162 }
0x1d9f   : > { %4902 = vrot.lane.b32.xlu1 %v7163_v55, %s7456_s10  ;;  %v5135_v55 = vsel %vm4270_vm8, %v8701_v20, %v5120_v33 }
0x1e11   : > { %v4903_v58 = vpop.permute.xlu1 %4902 }
0x1e12   : > { %v4905_v14 = vmul.f32 %v4903_v58, %v4900_v11  ;;  %v5159_v58 = vrot.slane %v8792_v48, 5 }
0x1e14   : > { %v8814_v16 = vadd.f32 %v4906_v23, %v4905_v14  ;;  %v5168_v23 = vsel %vm5136_vm9, %v5167_v24, %v5155_v5  ;;  %v5126_v14 = vrot.slane %v8792_v48, 4  ;;  %v6163_v5 = vld [vmem:[%s9085_s26 + $0x58] sm:$0xff] (%p4256_p3)  ;;  %v6162_v24 = vld [vmem:[%s9085_s26 + $0x50] sm:$0xff] (%p4256_p3) }
0x1e16   : > { %4914 = vrot.lane.b32.xlu0 %v8814_v16, %s7456_s10  ;;  %v5128_v56 = vrot.slane %v8814_v16, 3  ;;  %v5161_v10 = vrot.slane %v8814_v16, 4 }
0x1e88   : > { %v4915_v25 = vpop.permute.xlu0 %4914 }
0x1e89   : > { %6929 = vmatmul.mubr.msk.f32.vlgmr.msra.gmra.mxu0 %vm471_vm4, %v4915_v25 }
0x1f49   : > { %v4984_v19 = vpop.f32.mrf.mxu0 }
0x1f4a   : > { %v4985_v52 = vadd.f32 %v7615_v4, %v4984_v19 }
0x1f4b   : > { %v6930_v36 = vpop.f32.mrf.mxu0 }
0x1f4c   : > { %4996 = vrot.lane.b32.xlu1 %v4985_v52, %s7457_s6  ;;  %v4988_v12 = vadd.f32 %v4985_v52, %v4912_v32  ;;  %v5137_v52 = vsel %vm5136_vm9, %v5135_v55, %v5122_v29  ;;  %v5169_v36 = vsel %vm5138_vm10, %v5168_v23, %v5157_v7  ;;  %v5206_v29 = vld [vmem:[%s9085_s26 + $0x28] sm:$0xff] (%p4256_p3)  ;;  %v7180_v7 = vld [vmem:[%s9067_s17 + $0x38] sm:$0xff] (%p4256_p3)   ;;  %v6164_v55 = vld [vmem:[%s9085_s26 + $0x60] sm:$0xff] (%p4256_p3) }
0x1f4d   : > { %v5139_v46 = vsel %vm5138_vm10, %v5137_v52, %v5124_v63  ;;  %v5170_v18 = vsel %vm273_vm0, %v5169_v36, %v5159_v58  ;;  %v5205_v63 = vld [vmem:[%s9085_s26 + $0x20] sm:$0xff] (%p4256_p3)  ;;  %v5208_v58 = vld [vmem:[%s9085_s26 + $0x38] sm:$0xff] (%p4256_p3)  ;;  %v5207_v23 = vld [vmem:[%s9085_s26 + $0x30] sm:$0xff] (%p4256_p3) }
0x1f4e   : > { %v6140_v50 = vmul.f32 -1.442695, %v4988_v12  ;;  %v7187_v52 = vld [vmem:[%s9067_s17] sm:$0xff] (%p4256_p3)  }
0x1f50   : > { %7164 = vpow2.f32 %v6140_v50  ;;  %v5171_v50 = vsel %vm5141_vm11, %v5170_v18, %v5161_v10  ;;  %v6167_v10 = vld [vmem:[%s9085_s26 + $0x78] sm:$0xff] (%p4256_p3) }
0x1f5d   : > { %v7165_v26 = vpop.eup %7164 }
0x1f5e   : > { %v4992_v6 = vadd.f32 1.0, %v7165_v26 }
0x1f60   : > { %7166 = vrcp.f32 %v4992_v6 }
0x1f6d   : > { %v7167_v61 = vpop.eup %7166 }
0x1f6e   : > { %v5006_v51 = vsub.f32 1.0, %v7167_v61  ;;  %v5012_v35 = vmul.f32 %v7167_v61, %v8814_v16  ;;  %v5140_v16 = vsel %vm273_vm0, %v5139_v46, %v5126_v14  ;;  %v7182_v14 = vld [vmem:[%s9067_s17 + $0x28] sm:$0xff] (%p4256_p3)  }
0x1f6f   : > { %v5142_v26 = vsel %vm5141_vm11, %v5140_v16, %v5128_v56  ;;  %v7183_v56 = vld [vmem:[%s9067_s17 + $0x20] sm:$0xff] (%p4256_p3)  }
0x1fbe   : > { %v4997_v54 = vpop.permute.xlu1 %4996 }
0x1fbf   : > { %v4999_v41 = vmul.f32 %v7167_v61, %v4997_v54 }
0x1fc1   : > { %5001 = vrot.lane.b32.xlu0 %v4999_v41, %s7457_s6 }
0x2033   : > { %v5002_v22 = vpop.permute.xlu0 %5001 }
0x2034   : > { %v5004_v9 = vadd.f32 %v5002_v22, %v4912_v32 }
0x2036   : > { %7168 = vtanh.f32 %v5004_v9 }
0x2043   : > { %v7169_v15 = vpop.eup %7168 }
0x2044   : > { %5008 = vrot.lane.b32.xlu1 %v7169_v15, %s7456_s10  ;;  %v7178_v15 = vld [vmem:[#allocation18 + $0x8] sm:$0xff] (%p4256_p3)  }
0x2045   :  { %6942 = vmatprep.subr.bf16.mxu1 (%p4256_p3), %v7178_v15  ;;  %6978 = vmatprep.subr.bf16.mxu0 (%p4256_p3), %v7178_v15 }
0x2046   :  { %6979 = vmatpush3.bf16.msra.mxu0 (%p4256_p3), %v7178_v15 }
0x20b6   : > { %v5009_v17 = vpop.permute.xlu1 %5008 }
0x20b7   : > { %v5011_v34 = vmul.f32 %v5009_v17, %v5006_v51  ;;  %v7179_v51 = vld [vmem:[#allocation18] sm:$0xff] (%p4256_p3)  }
0x20b8   :  { %6980 = vmatprep.subr.bf16.mxu0 (%p4256_p3), %v7179_v51 }
0x20b9   : > { %v8827_v42 = vadd.f32 %v5012_v35, %v5011_v34  ;;  %6981 = vmatpush3.bf16.msra.mxu0 (%p4256_p3), %v7179_v51 }
0x20ba   :  { %6990 = vmatprep.subr.bf16.mxu0 (%p4256_p3), %v7180_v7 }
0x20bb   : > { %5020 = vrot.lane.b32.xlu0 %v8827_v42, %s7456_s10  ;;  %v5163_v39 = vrot.slane %v8827_v42, 3  ;;  %v5130_v20 = vrot.slane %v8827_v42, 2 }
0x20bd   : > { %v5172_v6 = vsel %vm5143_vm12, %v5171_v50, %v5163_v39  ;;  %v5144_v61 = vsel %vm5143_vm12, %v5142_v26, %v5130_v20  ;;  %v7185_v39 = vld [vmem:[%s9067_s17 + $0x10] sm:$0xff] (%p4256_p3)   ;;  %v7186_v20 = vld [vmem:[%s9067_s17 + $0x8] sm:$0xff] (%p4256_p3)  }
0x212d   : > { %v5021_v30 = vpop.permute.xlu0 %5020 }
0x212e   : > { %6940 = vmatmul.mubr.msk.f32.vlgmr.msra.gmra.mxu1 %vm471_vm4, %v5021_v30 }
0x212f   :  { %6943 = vmatpush3.bf16.msra.mxu1 (%p4256_p3), %v7178_v15 }
0x2130   :  { %6944 = vmatprep.subr.bf16.mxu1 (%p4256_p3), %v7179_v51 }
0x2133   :  { %6945 = vmatpush3.bf16.msra.mxu1 (%p4256_p3), %v7179_v51 }
0x2134   :  { %6954 = vmatprep.subr.bf16.mxu1 (%p4256_p3), %v7180_v7 }
0x21ee   : > { %v5090_v27 = vpop.f32.mrf.mxu1 }
0x21ef   : > { %v5091_v40 = vadd.f32 %v7615_v4, %v5090_v27 }
0x21f0   : > { %v6941_v43 = vpop.f32.mrf.mxu1 }
0x21f1   : > { %5102 = vrot.lane.b32.xlu1 %v5091_v40, %s7457_s6  ;;  %v5094_v37 = vadd.f32 %v5091_v40, %v5018_v21 }
0x21f3   : > { %v6142_v31 = vmul.f32 -1.442695, %v5094_v37  ;;  %v6160_v37 = vld [vmem:[%s9085_s26 + $0x40] sm:$0xff] (%p4256_p3) }
0x21f5   : > { %7170 = vpow2.f32 %v6142_v31  ;;  %v5201_v31 = vld [vmem:[%s9085_s26] sm:$0xff] (%p4256_p3) }
0x2202   : > { %v7171_v38 = vpop.eup %7170 }
0x2203   : > { %v5098_v59 = vadd.f32 1.0, %v7171_v38  ;;  %v6161_v38 = vld [vmem:[%s9085_s26 + $0x48] sm:$0xff] (%p4256_p3) }
0x2205   : > { %7172 = vrcp.f32 %v5098_v59  ;;  %v5202_v59 = vld [vmem:[%s9085_s26 + $0x8] sm:$0xff] (%p4256_p3) }
0x2212   : > { %v7173_v45 = vpop.eup %7172 }
0x2213   : > { %v5112_v49 = vsub.f32 1.0, %v7173_v45  ;;  %v5118_v25 = vmul.f32 %v7173_v45, %v8827_v42 }
0x2263   : > { %v5103_v28 = vpop.permute.xlu1 %5102 }
0x2264   : > { %v5105_v62 = vmul.f32 %v7173_v45, %v5103_v28 }
0x2266   : > { %5107 = vrot.lane.b32.xlu0 %v5105_v62, %s7457_s6 }
0x22d8   : > { %v5108_v57 = vpop.permute.xlu0 %5107 }
0x22d9   : > { %v5110_v13 = vadd.f32 %v5108_v57, %v5018_v21 }
0x22db   : > { %7174 = vtanh.f32 %v5110_v13  ;;  %v5204_v13 = vld [vmem:[%s9085_s26 + $0x18] sm:$0xff] (%p4256_p3) }
0x22e8   : > { %v7175_v60 = vpop.eup %7174 }
0x22e9   : > { %5114 = vrot.lane.b32.xlu1 %v7175_v60, %s7456_s10  ;;  %v5203_v60 = vld [vmem:[%s9085_s26 + $0x10] sm:$0xff] (%p4256_p3) }
0x235b   : > { %v5115_v11 = vpop.permute.xlu1 %5114 }
0x235c   : > { %v5117_v19 = vmul.f32 %v5115_v11, %v5112_v49  ;;  %v6165_v49 = vld [vmem:[%s9085_s26 + $0x68] sm:$0xff] (%p4256_p3)  ;;  %v7181_v11 = vld [vmem:[%s9067_s17 + $0x30] sm:$0xff] (%p4256_p3)  }
0x235e   : > { %v5119_v48 = vadd.f32 %v5118_v25, %v5117_v19   ;;  %v6166_v25 = vld [vmem:[%s9085_s26 + $0x70] sm:$0xff] (%p4256_p3)  ;;  %v7184_v19 = vld [vmem:[%s9067_s17 + $0x18] sm:$0xff] (%p4256_p3)  }
0x2360   : > { %v5133_v32 = vrot.slane %v5119_v48, 1  ;;  %v5165_v12 = vrot.slane %v5119_v48, 2 }
0x2362   : > { %v5173_v54 = vsel %vm5145_vm13, %v5172_v6, %v5165_v12  ;;  %v5146_v41 = vsel %vm5145_vm13, %v5144_v61, %v5133_v32 }
0x2363   : > { %5175 = vrot.lane.b32.xlu1 %v5173_v54, %s7456_s10  ;;  %5148 = vrot.lane.b32.xlu0 %v5146_v41, %s7456_s10  ;;  %v8976_v54 = vld [vmem:[%s9065_s15] ss:$0 sm:$0xff] (%p4256_p3)  ;;  %s7458_s15 = smov (%p4256_p3), [#allocation20]  }
0x2364   :  { %s5793_s2 = sshll.u32 (%p4256_p3), %s7458_s15, 4  ;;  %s5794_s2 = int_to_ptr.vmem [resolvable:$true] %s5793_s2 }
0x2365   :  { %s7368_s12 = scalar_lea.vmem (%p4256_p3), %s5794_s2, 2048  ;;  %p7373_p5 = scmp.lt.s32.totalorder (%p4256_p3), %s5794_s2, %s5794_s2 }
0x2366   :  { %p7369_p4 = scmp.ne.s32.totalorder (%p4256_p3), %s5794_s2, %s7368_s12  ;;  %p7374_p6 = scmp.lt.s32.totalorder (%p4256_p3), %s7368_s12, %s7368_s12 }
0x2367   :  { %5531 = vperm.xlu1 (%p4256_p3), %7177, %v6160_v37   ;;  %5211 = vperm.xlu0 (%p4256_p3), %7176, %v5201_v31  }
0x2368   :  { %p7375_p7 = por (%p4256_p3), %p7374_p6, %p7373_p5 }
0x236a   :  { %p7376_p8 = pnand (%p4256_p3), %p7375_p7, %p7369_p4 }
0x236b   :  { %5536 = vperm.xlu1 (%p4256_p3), %7177, %v6161_v38   ;;  %5216 = vperm.xlu0 (%p4256_p3), %7176, %v5202_v59  }
0x236f   :  { %5226 = vperm.xlu1 (%p4256_p3), %7177, %v5204_v13   ;;  %5221 = vperm.xlu0 (%p4256_p3), %7176, %v5203_v60  }
0x2373   :  { %5546 = vperm.xlu1 (%p4256_p3), %7177, %v6163_v5   ;;  %5541 = vperm.xlu0 (%p4256_p3), %7176, %v6162_v24  }
0x2377   :  { %5236 = vperm.xlu1 (%p4256_p3), %7177, %v5206_v29   ;;  %5231 = vperm.xlu0 (%p4256_p3), %7176, %v5205_v63  }
0x237b   :  { %5556 = vperm.xlu1 (%p4256_p3), %7177, %v6165_v49   ;;  %5551 = vperm.xlu0 (%p4256_p3), %7176, %v6164_v55  }
0x237f   :  { %5246 = vperm.xlu1 (%p4256_p3), %7177, %v5208_v58   ;;  %5241 = vperm.xlu0 (%p4256_p3), %7176, %v5207_v23  }
0x2383   :  { %5566 = vperm.xlu1 (%p4256_p3), %7177, %v6167_v10   ;;  %5561 = vperm.xlu0 (%p4256_p3), %7176, %v6166_v25  }
0x23d2   :  { %4258 = sbr.rel (!%p4256_p3) target bundleno = 3638 (0xe36), region = 169 }
0x23d5   : > { %v5176_v22 = vpop.permute.xlu1 %5175  ;;  %v5149_v9 = vpop.permute.xlu0 %5148 }
0x23d6   : > { %6144 = vst.msk [vmem:[%s5151_s23 + $0x40] sm:$0xff] %vm471_vm4, %v5176_v22  ;;  %5152 = vst.msk [vmem:[%s5151_s23] sm:$0xff] %vm471_vm4, %v5149_v9 }
0x23dd   :  { %v5249_v17 = vld [vmem:[#allocation3] sm:$0xff]  ;;  %v5250_v35 = vld [vmem:[#allocation3 + $0x8] sm:$0xff]  ;;  %v5251_v27 = vld [vmem:[#allocation3 + $0x10] sm:$0xff] }
0x23de   :  { %v5569_v34 = vld [vmem:[#allocation3 + $0x40] sm:$0xff]  ;;  %v5257_v42 = vpack.c.bf16 %v5250_v35, %v5249_v17  ;;  %v5570_v30 = vld [vmem:[#allocation3 + $0x48] sm:$0xff]  ;;  %v5252_v48 = vld [vmem:[#allocation3 + $0x18] sm:$0xff] }
0x23df   :  { %v5577_v40 = vpack.c.bf16 %v5570_v30, %v5569_v34  ;;  %v5571_v0 = vld [vmem:[#allocation3 + $0x50] sm:$0xff]  ;;  %v5572_v1 = vld [vmem:[#allocation3 + $0x58] sm:$0xff]  ;;  %v5253_v2 = vld [vmem:[#allocation3 + $0x20] sm:$0xff]  ;;  %v5258_v43 = vpack.c.bf16 %v5252_v48, %v5251_v27 }
0x23e0   :  { %6946 = vmatprep.mubr.msk.bf16.mxu1 %vm471_vm4, %v5257_v42  ;;  %v5254_v3 = vld [vmem:[#allocation3 + $0x28] sm:$0xff]  ;;  %v5573_v4 = vld [vmem:[#allocation3 + $0x60] sm:$0xff]  ;;  %v5578_v53 = vpack.c.bf16 %v5572_v1, %v5571_v0  ;;  %v5255_v45 = vld [vmem:[#allocation3 + $0x30] sm:$0xff] }
0x23e1   :  { %v5574_v44 = vld [vmem:[#allocation3 + $0x68] sm:$0xff]  ;;  %6982 = vmatprep.mubr.msk.bf16.mxu0 %vm471_vm4, %v5577_v40  ;;  %v5259_v47 = vpack.c.bf16 %v5254_v3, %v5253_v2  ;;  %6947 = vmatmul.mubr.msk.bf16.vlgmr.msra.gmra.mxu1 %vm471_vm4, %v5258_v43  ;;  %v5256_v28 = vld [vmem:[#allocation3 + $0x38] sm:$0xff]  ;;  %v5575_v62 = vld [vmem:[#allocation3 + $0x70] sm:$0xff] }
0x23e2   :  { %v5579_v21 = vpack.c.bf16 %v5574_v44, %v5573_v4  ;;  %6983 = vmatmul.mubr.msk.bf16.vlgmr.msra.gmra.mxu0 %vm471_vm4, %v5578_v53  ;;  %v5576_v57 = vld [vmem:[#allocation3 + $0x78] sm:$0xff]  ;;  %v5260_v33 = vpack.c.bf16 %v5256_v28, %v5255_v45  ;;  %6955 = vmatpush3.bf16.msra.mxu1 %v7180_v7  ;;  %v8953_v36 = vpop.permute.xlu0 %5211  ;;  %v8955_v46 = vpop.permute.xlu1 %5531 }
0x23e3   :  { %6950 = vmatprep.mubr.msk.bf16.mxu1 %vm471_vm4, %v5259_v47  ;;  %v5580_v8 = vpack.c.bf16 %v5576_v57, %v5575_v62  ;;  %6991 = vmatpush3.bf16.msra.mxu0 %v7180_v7 }
0x23e4   :  { %6986 = vmatprep.mubr.msk.bf16.mxu0 %vm471_vm4, %v5579_v21  ;;  %6956 = vmatprep.subr.bf16.mxu1 %v7181_v11 }
0x23e5   :  { %6992 = vmatprep.subr.bf16.mxu0 %v7181_v11 }
0x23e6   :  { %6957 = vmatpush3.bf16.msra.mxu1 %v7181_v11  ;;  %v8957_v18 = vpop.permute.xlu0 %5216  ;;  %v8959_v16 = vpop.permute.xlu1 %5536 }
0x23e7   :  { %6993 = vmatpush3.bf16.msra.mxu0 %v7181_v11  ;;  %6958 = vmatprep.subr.bf16.mxu1 %v7182_v14 }
0x23e8   :  { %6994 = vmatprep.subr.bf16.mxu0 %v7182_v14 }
0x23e9   :  { %6951 = vmatmul.mubr.msk.bf16.gmra.mxu1 %vm471_vm4, %v5260_v33 }
0x23ea   :  { %6987 = vmatmul.mubr.msk.bf16.gmra.mxu0 %vm471_vm4, %v5580_v8  ;;  %6959 = vmatpush3.bf16.msra.mxu1 %v7182_v14  ;;  %v8961_v32 = vpop.permute.xlu0 %5221  ;;  %v8963_v12 = vpop.permute.xlu1 %5226 }
0x23eb   :  { %6995 = vmatpush3.bf16.msra.mxu0 %v7182_v14  ;;  %6960 = vmatprep.subr.bf16.mxu1 %v7183_v56 }
0x23ec   :  { %6996 = vmatprep.subr.bf16.mxu0 %v7183_v56 }
0x23ee   :  { %6961 = vmatpush3.bf16.msra.mxu1 %v7183_v56  ;;  %v8965_v50 = vpop.permute.xlu0 %5541  ;;  %v8967_v26 = vpop.permute.xlu1 %5546 }
0x23ef   :  { %6997 = vmatpush3.bf16.msra.mxu0 %v7183_v56  ;;  %6962 = vmatprep.subr.bf16.mxu1 %v7184_v19 }
0x23f0   :  { %6998 = vmatprep.subr.bf16.mxu0 %v7184_v19 }
0x23f2   :  { %6963 = vmatpush3.bf16.msra.mxu1 %v7184_v19  ;;  %v8969_v6 = vpop.permute.xlu0 %5231  ;;  %v8971_v61 = vpop.permute.xlu1 %5236 }
0x23f3   :  { %6999 = vmatpush3.bf16.msra.mxu0 %v7184_v19  ;;  %6964 = vmatprep.subr.bf16.mxu1 %v7185_v39 }
0x23f4   :  { %7000 = vmatprep.subr.bf16.mxu0 %v7185_v39 }
0x23f6   :  { %6965 = vmatpush3.bf16.msra.mxu1 %v7185_v39  ;;  %v8978_v41 = vpop.permute.xlu0 %5551  ;;  %v8980_v15 = vpop.permute.xlu1 %5556 }
0x23f7   :  { %7001 = vmatpush3.bf16.msra.mxu0 %v7185_v39  ;;  %6966 = vmatprep.subr.bf16.mxu1 %v7186_v20 }
0x23f8   :  { %7002 = vmatprep.subr.bf16.mxu0 %v7186_v20 }
0x23fa   :  { %6967 = vmatpush3.bf16.msra.mxu1 %v7186_v20  ;;  %v8988_v1 = vpop.permute.xlu0 %5241  ;;  %v8994_v47 = vpop.permute.xlu1 %5246 }
0x23fb   :  { %7003 = vmatpush3.bf16.msra.mxu0 %v7186_v20  ;;  %6968 = vmatprep.subr.bf16.mxu1 %v7187_v52 }
0x23fc   :  { %7004 = vmatprep.subr.bf16.mxu0 %v7187_v52 }
0x23fe   :  { %6969 = vmatpush3.bf16.msra.mxu1 %v7187_v52  ;;  %v9004_v8 = vpop.permute.xlu0 %5561  ;;  %v9010_v14 = vpop.permute.xlu1 %5566 }
0x23ff   :  { %7005 = vmatpush3.bf16.msra.mxu0 %v7187_v52 }
0x24a1   :  { %v6948_v22 = vpop.f32.mrf.mxu1 }
0x24a2   :  { %v6984_v9 = vpop.f32.mrf.mxu0  ;;  %v5334_v51 = vadd.f32 %v6948_v22, %v8976_v54 }
0x24a3   :  { %v5636_v17 = vadd.f32 %v6984_v9, %v8976_v54  ;;  %v5325_v35 = vpop.f32.mrf.mxu1 }
0x24a4   :  { %v5627_v34 = vpop.f32.mrf.mxu0  ;;  %v5358_v42 = vmul.f32 %v5334_v51, %v8961_v32  ;;  %v5326_v27 = vadd.f32 %v8976_v54, %v5325_v35 }
0x24a5   :  { %v5660_v30 = vmul.f32 %v5636_v17, %v8965_v50  ;;  %v5628_v48 = vadd.f32 %v8976_v54, %v5627_v34  ;;  %v6949_v40 = vpop.f32.mrf.mxu1 }
0x24a6   :  { %v6985_v0 = vpop.f32.mrf.mxu0  ;;  %5366 = vst [vmem:[#allocation20 + $0x10] sm:$0xff] %v5358_v42  ;;  %v5356_v2 = vmul.f32 %v5326_v27, %v8953_v36  ;;  %v5337_v4 = vadd.f32 %v6949_v40, %v8976_v54 }
0x24a7   :  { %5669 = vst [vmem:[#allocation20 + $0x50] sm:$0xff] %v5660_v30  ;;  %v5658_v3 = vmul.f32 %v5628_v48, %v8955_v46  ;;  %v5639_v44 = vadd.f32 %v6985_v0, %v8976_v54  ;;  %v5328_v43 = vpop.f32.mrf.mxu1 }
0x24a8   :  { %v5630_v53 = vpop.f32.mrf.mxu0  ;;  %5364 = vst [vmem:[#allocation20] sm:$0xff] %v5356_v2  ;;  %v5359_v21 = vmul.f32 %v5337_v4, %v8963_v12  ;;  %v5329_v31 = vadd.f32 %v8976_v54, %v5328_v43 }
0x24a9   :  { %5667 = vst [vmem:[#allocation20 + $0x40] sm:$0xff] %v5658_v3  ;;  %v5661_v37 = vmul.f32 %v5639_v44, %v8967_v26  ;;  %v5631_v38 = vadd.f32 %v8976_v54, %v5630_v53  ;;  %v6952_v59 = vpop.f32.mrf.mxu1 }
0x24aa   :  { %v6988_v45 = vpop.f32.mrf.mxu0  ;;  %5367 = vst [vmem:[#allocation20 + $0x18] sm:$0xff] %v5359_v21  ;;  %v5357_v28 = vmul.f32 %v5329_v31, %v8957_v18  ;;  %v5350_v57 = vadd.f32 %v6952_v59, %v8976_v54  ;;  %v5381_v7 = vpack.c.bf16 %v5359_v21, %v5358_v42 }
0x24ab   :  { %5670 = vst [vmem:[#allocation20 + $0x58] sm:$0xff] %v5661_v37  ;;  %v5659_v62 = vmul.f32 %v5631_v38, %v8959_v16  ;;  %v5652_v13 = vadd.f32 %v6988_v45, %v8976_v54  ;;  %v5341_v60 = vpop.f32.mrf.mxu1  ;;  %v5684_v49 = vpack.c.bf16 %v5661_v37, %v5660_v30 }
0x24ac   :  { %v5643_v33 = vpop.f32.mrf.mxu0  ;;  %5365 = vst [vmem:[#allocation20 + $0x8] sm:$0xff] %v5357_v28  ;;  %v5342_v5 = vadd.f32 %v8976_v54, %v5341_v60  ;;  %v5380_v29 = vpack.c.bf16 %v5357_v28, %v5356_v2  ;;  %v5362_v55 = vmul.f32 %v5350_v57, %v8988_v1 }
0x24ad   :  { %5668 = vst [vmem:[#allocation20 + $0x48] sm:$0xff] %v5659_v62  ;;  %v5644_v24 = vadd.f32 %v8976_v54, %v5643_v33  ;;  %v5683_v63 = vpack.c.bf16 %v5659_v62, %v5658_v3  ;;  %v5664_v11 = vmul.f32 %v5652_v13, %v9004_v8  ;;  %v6953_v58 = vpop.f32.mrf.mxu1 }
0x24ae   :  { %v6989_v23 = vpop.f32.mrf.mxu0  ;;  %v5360_v56 = vmul.f32 %v5342_v5, %v8969_v6  ;;  %v5353_v25 = vadd.f32 %v6953_v58, %v8976_v54  ;;  %6970 = vmatprep.mubr.bf16.mxu1 %v5380_v29  ;;  %5370 = vst [vmem:[#allocation20 + $0x30] sm:$0xff] %v5362_v55 }
0x24af   :  { %v5662_v10 = vmul.f32 %v5644_v24, %v8978_v41  ;;  %v5655_v19 = vadd.f32 %v6989_v23, %v8976_v54  ;;  %5673 = vst [vmem:[#allocation20 + $0x70] sm:$0xff] %v5664_v11  ;;  %7006 = vmatprep.mubr.bf16.mxu0 %v5683_v63  ;;  %v5344_v39 = vpop.f32.mrf.mxu1  ;;  %6971 = vmatmul.mubr.bf16.vlgmr.msra.gmra.mxu1 %v5381_v7 }
0x24b0   :  { %v5646_v20 = vpop.f32.mrf.mxu0  ;;  %5368 = vst [vmem:[#allocation20 + $0x20] sm:$0xff] %v5360_v56  ;;  %v5363_v52 = vmul.f32 %v5353_v25, %v8994_v47  ;;  %v5345_v9 = vadd.f32 %v8976_v54, %v5344_v39  ;;  %7007 = vmatmul.mubr.bf16.vlgmr.msra.gmra.mxu0 %v5684_v49 }
0x24b1   :  { %5671 = vst [vmem:[#allocation20 + $0x60] sm:$0xff] %v5662_v10  ;;  %v5665_v22 = vmul.f32 %v5655_v19, %v9010_v14  ;;  %v5647_v51 = vadd.f32 %v8976_v54, %v5646_v20 }
0x24b2   :  { %5371 = vst [vmem:[#allocation20 + $0x38] sm:$0xff] %v5363_v52  ;;  %v5361_v17 = vmul.f32 %v5345_v9, %v8971_v61  ;;  %v5383_v30 = vpack.c.bf16 %v5363_v52, %v5362_v55 }
0x24b3   :  { %5674 = vst [vmem:[#allocation20 + $0x78] sm:$0xff] %v5665_v22  ;;  %v5663_v35 = vmul.f32 %v5647_v51, %v8980_v15  ;;  %v5686_v27 = vpack.c.bf16 %v5665_v22, %v5664_v11 }
0x24b4   :  { %5369 = vst [vmem:[#allocation20 + $0x28] sm:$0xff] %v5361_v17  ;;  %v5382_v34 = vpack.c.bf16 %v5361_v17, %v5360_v56 }
0x24b5   :  { %5672 = vst [vmem:[#allocation20 + $0x68] sm:$0xff] %v5663_v35  ;;  %v5685_v42 = vpack.c.bf16 %v5663_v35, %v5662_v10 }
0x24b6   :  { %6974 = vmatprep.mubr.bf16.mxu1 %v5382_v34 }
0x24b7   :  { %7010 = vmatprep.mubr.bf16.mxu0 %v5685_v42  ;;  %6975 = vmatmul.mubr.bf16.gmra.mxu1 %v5383_v30 }
0x24b8   :  { %7011 = vmatmul.mubr.bf16.gmra.mxu0 %v5686_v27 }
0x24b9   :  { %7379 = shalt.err (!%p7376_p8)
}
0x24ba   :  { %5799 = dma.vmem_to_hbm [thread:$0]  %s5794_s2, 2048, %s9070_s20, [#allocation21], %s7450_s5, %s7450_s5, %s7451_s21   ;;  %v5374_v54 = vld [vmem:[#allocation19 + $0x10] sm:$0xff]  ;;  %v5372_v0 = vld [vmem:[#allocation19] sm:$0xff]  ;;  %v5375_v53 = vld [vmem:[#allocation19 + $0x18] sm:$0xff] }
0x24bb   :  { %v5677_v48 = vld [vmem:[#allocation19 + $0x50] sm:$0xff]  ;;  %v5675_v4 = vld [vmem:[#allocation19 + $0x40] sm:$0xff]  ;;  %v5678_v38 = vld [vmem:[#allocation19 + $0x58] sm:$0xff]  ;;  %s7459_s20 = smov [#allocation19]  }
0x24bc   :  { %v5373_v62 = vld [vmem:[#allocation19 + $0x8] sm:$0xff]  ;;  %v5681_v49 = vld [vmem:[#allocation19 + $0x70] sm:$0xff]  ;;  %v5376_v58 = vld [vmem:[#allocation19 + $0x20] sm:$0xff]  ;;  %s5781_s22 = sshll.u32 %s7459_s20, 4  ;;  %s5782_s22 = int_to_ptr.vmem [resolvable:$true] %s5781_s22 }
0x24bd   :  { %v5676_v33 = vld [vmem:[#allocation19 + $0x48] sm:$0xff]  ;;  %v5679_v10 = vld [vmem:[#allocation19 + $0x60] sm:$0xff]  ;;  %v5379_v39 = vld [vmem:[#allocation19 + $0x38] sm:$0xff]  ;;  %s7388_s3 = scalar_lea.vmem %s5782_s22, 2048  ;;  %p7393_p10 = scmp.lt.s32.totalorder %s5782_s22, %s5782_s22 }
0x24be   :  { %v5682_v22 = vld [vmem:[#allocation19 + $0x78] sm:$0xff]  ;;  %v5377_v17 = vld [vmem:[#allocation19 + $0x28] sm:$0xff]  ;;  %p7389_p9 = scmp.ne.s32.totalorder %s5782_s22, %s7388_s3  ;;  %p7394_p11 = scmp.lt.s32.totalorder %s7388_s3, %s7388_s3 }
0x24bf   :  { %v5680_v42 = vld [vmem:[#allocation19 + $0x68] sm:$0xff] }
0x24c0   :  { %p7395_p12 = por %p7394_p11, %p7393_p10 }
0x24c2   :  { %p7396_p13 = pnand %p7395_p12, %p7389_p9 }
0x256f   :  { %v6972_v40 = vpop.f32.mrf.mxu1 }
0x2570   :  { %v5499_v2 = vadd.f32 %v6972_v40, %v5374_v54  ;;  %v7008_v3 = vpop.f32.mrf.mxu0 }
0x2571   :  { %v5754_v44 = vadd.f32 %v7008_v3, %v5677_v48  ;;  %v5466_v43 = vpop.f32.mrf.mxu1 }
0x2572   :  { %v5507_v21 = vmul.f32 %v5499_v2, %v8961_v32  ;;  %v5497_v37 = vadd.f32 %v5466_v43, %v5372_v0  ;;  %v5721_v31 = vpop.f32.mrf.mxu0  ;;  %v5378_v32 = vld [vmem:[#allocation19 + $0x30] sm:$0xff] }
0x2573   :  { %v5762_v59 = vmul.f32 %v5754_v44, %v8965_v50  ;;  %v5752_v45 = vadd.f32 %v5721_v31, %v5675_v4  ;;  %v6973_v28 = vpop.f32.mrf.mxu1 }
0x2574   :  { %5515 = vst [vmem:[#allocation19 + $0x10] sm:$0xff] %v5507_v21  ;;  %v5505_v57 = vmul.f32 %v5497_v37, %v8953_v36  ;;  %v5500_v13 = vadd.f32 %v6973_v28, %v5375_v53  ;;  %v7009_v60 = vpop.f32.mrf.mxu0 }
0x2575   :  { %5770 = vst [vmem:[#allocation19 + $0x50] sm:$0xff] %v5762_v59  ;;  %v5760_v5 = vmul.f32 %v5752_v45, %v8955_v46  ;;  %v5755_v24 = vadd.f32 %v7009_v60, %v5678_v38  ;;  %v5469_v29 = vpop.f32.mrf.mxu1 }
0x2576   :  { %5513 = vst [vmem:[#allocation19] sm:$0xff] %v5505_v57  ;;  %v5508_v63 = vmul.f32 %v5500_v13, %v8963_v12  ;;  %v5498_v7 = vadd.f32 %v5469_v29, %v5373_v62  ;;  %v5724_v50 = vpop.f32.mrf.mxu0 }
0x2577   :  { %5768 = vst [vmem:[#allocation19 + $0x40] sm:$0xff] %v5760_v5  ;;  %v5763_v55 = vmul.f32 %v5755_v24, %v8967_v26  ;;  %v5753_v11 = vadd.f32 %v5724_v50, %v5676_v33  ;;  %v6976_v36 = vpop.f32.mrf.mxu1 }
0x2578   :  { %5516 = vst [vmem:[#allocation19 + $0x18] sm:$0xff] %v5508_v63  ;;  %v5506_v23 = vmul.f32 %v5498_v7, %v8957_v18  ;;  %v5503_v56 = vadd.f32 %v6976_v36, %v5378_v32  ;;  %v7012_v46 = vpop.f32.mrf.mxu0 }
0x2579   :  { %5771 = vst [vmem:[#allocation19 + $0x58] sm:$0xff] %v5763_v55  ;;  %v5761_v25 = vmul.f32 %v5753_v11, %v8959_v16  ;;  %v5758_v19 = vadd.f32 %v7012_v46, %v5681_v49  ;;  %v5482_v12 = vpop.f32.mrf.mxu1 }
0x257a   :  { %5514 = vst [vmem:[#allocation19 + $0x8] sm:$0xff] %v5506_v23  ;;  %v5511_v20 = vmul.f32 %v5503_v56, %v8988_v1  ;;  %v5501_v52 = vadd.f32 %v5482_v12, %v5376_v58  ;;  %v5737_v26 = vpop.f32.mrf.mxu0 }
0x257b   :  { %5769 = vst [vmem:[#allocation19 + $0x48] sm:$0xff] %v5761_v25  ;;  %v5766_v9 = vmul.f32 %v5758_v19, %v9004_v8  ;;  %v5756_v51 = vadd.f32 %v5737_v26, %v5679_v10  ;;  %v6977_v18 = vpop.f32.mrf.mxu1 }
0x257c   :  { %5519 = vst [vmem:[#allocation19 + $0x30] sm:$0xff] %v5511_v20  ;;  %v5509_v35 = vmul.f32 %v5501_v52, %v8969_v6  ;;  %v5504_v34 = vadd.f32 %v6977_v18, %v5379_v39  ;;  %v7013_v16 = vpop.f32.mrf.mxu0 }
0x257d   :  { %5774 = vst [vmem:[#allocation19 + $0x70] sm:$0xff] %v5766_v9  ;;  %v5764_v30 = vmul.f32 %v5756_v51, %v8978_v41  ;;  %v5759_v27 = vadd.f32 %v7013_v16, %v5682_v22  ;;  %v5485_v1 = vpop.f32.mrf.mxu1 }
0x257e   :  { %5517 = vst [vmem:[#allocation19 + $0x20] sm:$0xff] %v5509_v35  ;;  %v5512_v54 = vmul.f32 %v5504_v34, %v8994_v47  ;;  %v5502_v48 = vadd.f32 %v5485_v1, %v5377_v17  ;;  %v5740_v40 = vpop.f32.mrf.mxu0 }
0x257f   :  { %5772 = vst [vmem:[#allocation19 + $0x60] sm:$0xff] %v5764_v30  ;;  %v5767_v8 = vmul.f32 %v5759_v27, %v9010_v14  ;;  %v5757_v0 = vadd.f32 %v5740_v40, %v5680_v42 }
0x2580   :  { %5520 = vst [vmem:[#allocation19 + $0x38] sm:$0xff] %v5512_v54  ;;  %v5510_v6 = vmul.f32 %v5502_v48, %v8971_v61 }
0x2581   :  { %5775 = vst [vmem:[#allocation19 + $0x78] sm:$0xff] %v5767_v8  ;;  %v5765_v2 = vmul.f32 %v5757_v0, %v8980_v15 }
0x2582   :  { %5518 = vst [vmem:[#allocation19 + $0x28] sm:$0xff] %v5510_v6 }
0x2583   :  { %5773 = vst [vmem:[#allocation19 + $0x68] sm:$0xff] %v5765_v2 }
0x2584   :  { %7399 = shalt.err (!%p7396_p13)
}
0x2585   :  { %5787 = dma.vmem_to_hbm [thread:$0]  %s5782_s22, 2048, %s9069_s19, [#allocation6], %s7450_s5, %s7450_s5, %s7451_s21  }
0x2586   :  { %7426 = dma.done.wait [#allocation6], 2048  }
0x2587   :  { %7427 = vsyncadd [#allocation6], 4294965248 }
0x2588   :  { %7428 = dma.done.wait [#allocation21], 2048  }
0x2589   :  { %7429 = vsyncadd [#allocation21], 4294965248 }
0x258a   :  { %5806 = vsyncpa [#allocation5], 1 }
0x258b   :  { %5807 = vsyncpa [#allocation8], 1 }
0x258c   :  { %5808 = vsyncpa [#allocation11], 1 }
0x258d   :  { %5809 = vsyncpa [#allocation14], 1 }
0x258e   :  { %5810 = vsyncpa [#allocation17], 1 }
0x258f   :  { %5811 = vsyncpa [#allocation6], 1 }
0x2590   :  { %5812 = vsyncpa [#allocation21], 1 }

</bundles_post_ra>
